<compile_context>
chip_gen: v7x
topology: tpu7x:2x2x1
jax: 0.10.0
libtpu: 0.0.40
codegen_flags: <defaults>
</compile_context>

<pallas_src>
import math

import jax
import jax.numpy as jnp
from jax import lax
from jax.experimental import pallas as pl
from jax.experimental.pallas import tpu as pltpu

_LANE = 128
_SUBLANE = 8
# Full unroll gives the LLO scheduler cross-iteration visibility; kept small so
# register-carried h/c + adjacent weight reads stay within the 64-vreg file.
_UNROLL_LIMIT = 16


def _round_up(n, m):
    return ((n + m - 1) // m) * m


def _lstm_cell(gx, h, c, whh_ref):
    """One LSTM cell step.

    gx      : (Bp, 4*Hp) gate pre-activation from the input projection
              (bias folded in), bf16 or f32.
    h, c    : (Bp, Hp) f32 register-carried recurrent state.
    whh_ref : (Hp, 4*Hp) Ref — read *here*, inside the step (never hoisted as
              a value across the loop), so the RHS load stays adjacent to its
              matmul and no long-lived 32-vreg value is kept alive.
    Gate/elementwise math is f32 (v5e has no bf16 VPU/EUP); only the MXU
    operands are narrowed to the stored weight dtype.
    """
    Hp = h.shape[1]
    w = whh_ref[...]
    prec = lax.Precision.HIGHEST if w.dtype == jnp.float32 else None
    g = gx.astype(jnp.float32) + jnp.dot(
        h.astype(w.dtype), w,
        preferred_element_type=jnp.float32, precision=prec)
    # PyTorch gate order: i, f, g, o.  Hp is a multiple of 128 so every gate
    # slice is a lane-aligned vreg view (no XLU shuffles, no masking).
    i_g = jax.nn.sigmoid(g[:, 0 * Hp:1 * Hp])
    f_g = jax.nn.sigmoid(g[:, 1 * Hp:2 * Hp])
    g_g = jnp.tanh(g[:, 2 * Hp:3 * Hp])
    o_g = jax.nn.sigmoid(g[:, 3 * Hp:4 * Hp])
    c_new = f_g * c + i_g * g_g
    h_new = o_g * jnp.tanh(c_new)
    return h_new, c_new


def bilstm_resident_kernel(gxf_ref, gxb_ref, whf_ref, whb_ref, out_ref, outb_sc):
    """Fully VMEM-resident fused bidirectional LSTM, mean folded into the kernel.

    gxf_ref/gxb_ref : (T, Bp, 4*Hp)  x @ W_ih + b, time-major, gate-padded.
    whf_ref/whb_ref : (Hp, 4*Hp)     recurrent weights.
    out_ref         : (T, Bp, Hp) f32  final 0.5*(fwd+bwd).
    outb_sc         : (T, Bp, Hp) f32  backward-direction staging scratch.
    """
    T = gxf_ref.shape[0]
    Bp = gxf_ref.shape[1]
    Hp = whf_ref.shape[0]

    zeros = jnp.zeros((Bp, Hp), jnp.float32)

    # TODO(synk): on v6e, optionally fuse the two directions' recurrent dots
    # into one block-diagonal (Bp, 2*Hp) x (2*Hp, 8*Hp) matmul to fill the
    # 256-deep MXU.
    def step(t, hf, cf, hb, cb):
        tb = T - 1 - t
        # Both directions in one iteration: one direction's MXU work overlaps
        # the other's EUP/VPU gate math in the same bundles.
        hf, cf = _lstm_cell(gxf_ref[t], hf, cf, whf_ref)
        hb, cb = _lstm_cell(gxb_ref[tb], hb, cb, whb_ref)
        out_ref[t] = hf
        outb_sc[tb] = hb
        return hf, cf, hb, cb

    if T <= _UNROLL_LIMIT:
        hf, cf, hb, cb = zeros, zeros, zeros, zeros
        for t in range(T):                      # fully unrolled at trace time
            hf, cf, hb, cb = step(t, hf, cf, hb, cb)
    else:
        lax.fori_loop(0, T, lambda t, s: step(t, *s),
                      (zeros, zeros, zeros, zeros), unroll=8)

    # Fused mean epilogue (all VMEM): write the single output once instead of
    # two per-direction outputs plus an XLA elementwise mean pass.
    out_ref[...] = 0.5 * (out_ref[...] + outb_sc[...])


def bilstm_stream_kernel(gx_ref, whh_ref, out_ref, h_sc, c_sc):
    """Time-chunk-streamed, direction-parallel LSTM.

    grid = (2 directions ["parallel"], T//Tt chunks ["arbitrary"]).
    gx_ref   : (Tt, Bp, 4*Hp)  this direction's chunk (backward direction is
               pre-reversed in XLA so both directions iterate forward).
    whh_ref  : (Hp, 4*Hp)
    out_ref  : (Tt, Bp, Hp) f32
    h_sc/c_sc: (Bp, Hp) f32 recurrent state persisted across chunks.
    """
    @pl.when(pl.program_id(1) == 0)
    def _():
        h_sc[...] = jnp.zeros_like(h_sc)
        c_sc[...] = jnp.zeros_like(c_sc)

    Tt = gx_ref.shape[0]
    h = h_sc[...]
    c = c_sc[...]

    if Tt <= _UNROLL_LIMIT:
        for t in range(Tt):
            h, c = _lstm_cell(gx_ref[t], h, c, whh_ref)
            out_ref[t] = h
    else:
        def body(t, carry):
            hh, cc = carry
            hh, cc = _lstm_cell(gx_ref[t], hh, cc, whh_ref)
            out_ref[t] = hh
            return hh, cc
        h, c = lax.fori_loop(0, Tt, body, (h, c), unroll=8)

    h_sc[...] = h
    c_sc[...] = c


def _vmem_budget_bytes():
    """~75% of physical VMEM (generation-aware; conservative fallback)."""
    try:
        cap = pltpu.get_tpu_info().vmem_capacity_bytes
    except Exception:
        cap = 64 << 20  # v7x per-core physical VMEM (smallest generation)
    return int(0.75 * cap)


def _pick_time_chunk(T, Bp, Hp, itemsize, target_bytes=2 << 20):
    """Largest divisor of T whose gx chunk is <= ~target_bytes."""
    per_step = Bp * 4 * Hp * itemsize
    max_tt = int(max(1, min(T, target_bytes // max(per_step, 1))))
    for tt in range(max_tt, 0, -1):
        if T % tt == 0:
            return tt
    return 1


def _pad_gates_last(w, H, Hp):
    """(..., 4H) -> (..., 4Hp): each gate's H columns land in its Hp-wide slot."""
    if Hp == H:
        return w
    lead = w.shape[:-1]
    w4 = w.reshape(lead + (4, H))
    w4 = jnp.pad(w4, [(0, 0)] * (len(lead) + 1) + [(0, Hp - H)])
    return w4.reshape(lead + (4 * Hp,))


def sequence_encoder_forward(x_btd, params, *, mode="auto", time_chunk=None,
                             compute_dtype=jnp.bfloat16):
    """x_btd: [B, T, D] -> [B, T, H] = mean of fwd/bwd LSTM hidden states.

    compute_dtype: dtype used for gx / W_hh storage and MXU operands (gate
      math, cell state and outputs stay f32).
    mode: "resident" (single fused invocation, mean folded in), "stream"
      (time-chunked grid; the "parallel" direction axis lets v7x's two
      TensorCores each take one direction), or "auto".
    """
    B, T, D = x_btd.shape
    H = params["whh_f"].shape[0]
    Hp = _round_up(H, _LANE)
    Bp = _round_up(B, _SUBLANE)
    x = x_btd.astype(jnp.float32)
    itemsize_c = jnp.dtype(compute_dtype).itemsize
    # High-precision input projection only matters for the all-f32 path; the
    # bf16 path quantizes gx right afterwards anyway.
    prec = (lax.Precision.HIGHEST if compute_dtype == jnp.float32
            else lax.Precision.DEFAULT)

    def prep_gx(wih, b):
        # One time-major MXU matmul over all steps with gate-padded weights and
        # the bias folded in: no reshape/pad/transpose pass over the big
        # (T, B, 4H) tensor — only a cheap B -> Bp pad on the result.
        g = jnp.einsum("btd,dg->tbg", x, _pad_gates_last(wih, H, Hp),
                       precision=prec) + _pad_gates_last(b, H, Hp)
        g = jnp.pad(g, ((0, 0), (0, Bp - B), (0, 0)))
        return g.astype(compute_dtype)

    def prep_whh(whh):
        w = _pad_gates_last(whh, H, Hp)              # (H, 4*Hp)
        w = jnp.pad(w, ((0, Hp - H), (0, 0)))        # (Hp, 4*Hp)
        return w.astype(compute_dtype)

    gx_f = prep_gx(params["wih_f"], params["b_f"])
    gx_b = prep_gx(params["wih_b"], params["b_b"])
    whh_f = prep_whh(params["whh_f"])
    whh_b = prep_whh(params["whh_b"])

    budget = _vmem_budget_bytes()
    resident_need = (2 * T * Bp * 4 * Hp * itemsize_c     # gx_f, gx_b
                     + 2 * Hp * 4 * Hp * itemsize_c       # whh_f, whh_b
                     + 2 * T * Bp * Hp * 4)               # out + bwd scratch (f32)

    if mode == "auto":
        # TODO(synk): also auto-select "stream" on v7x (2 TensorCores) via
        # pltpu.get_tpu_info() so the "parallel" direction axis splits cores.
        mode = "resident" if resident_need + (4 << 20) <= budget else "stream"

    if mode == "resident":
        cost = pl.CostEstimate(
            flops=2 * T * 2 * Bp * Hp * (4 * Hp) + 2 * T * 10 * Bp * Hp,
            transcendentals=2 * T * 5 * Bp * Hp,
            bytes_accessed=resident_need + T * Bp * Hp * 4)
        out_tbh = pl.pallas_call(
            bilstm_resident_kernel,
            out_shape=jax.ShapeDtypeStruct((T, Bp, Hp), jnp.float32),
            in_specs=[pl.BlockSpec(memory_space=pltpu.MemorySpace.VMEM)] * 4,
            out_specs=pl.BlockSpec(memory_space=pltpu.MemorySpace.VMEM),
            scratch_shapes=[pltpu.VMEM((T, Bp, Hp), jnp.float32)],
            compiler_params=pltpu.CompilerParams(
                vmem_limit_bytes=int(min(
                    budget, max(resident_need + (4 << 20), 16 << 20)))),
            cost_estimate=cost,
        )(gx_f, gx_b, whh_f, whh_b)
    else:
        # Streamed: bounded VMEM for any T; the chunk-(i+1) gx DMA overlaps
        # the chunk-i recurrence via the BlockSpec pipeline.
        Tt = time_chunk or _pick_time_chunk(T, Bp, Hp, itemsize_c)
        assert T % Tt == 0, (T, Tt)
        nT = T // Tt
        gx = jnp.stack([gx_f, gx_b[::-1]], axis=0)       # bwd pre-reversed
        whh = jnp.stack([whh_f, whh_b], axis=0)
        # TODO(synk): pipeline_mode=pl.Buffered(3) on the gx spec if the DMA is
        # still exposed at very small chunk sizes.
        out2 = pl.pallas_call(
            bilstm_stream_kernel,
            out_shape=jax.ShapeDtypeStruct((2, T, Bp, Hp), jnp.float32),
            grid_spec=pltpu.PrefetchScalarGridSpec(
                num_scalar_prefetch=0,
                grid=(2, nT),
                in_specs=[
                    pl.BlockSpec((None, Tt, Bp, 4 * Hp),
                                 lambda d, i: (d, i, 0, 0)),
                    pl.BlockSpec((None, Hp, 4 * Hp),
                                 lambda d, i: (d, 0, 0)),
                ],
                out_specs=pl.BlockSpec((None, Tt, Bp, Hp),
                                       lambda d, i: (d, i, 0, 0)),
                scratch_shapes=[pltpu.VMEM((Bp, Hp), jnp.float32)] * 2),
            compiler_params=pltpu.CompilerParams(
                dimension_semantics=("parallel", "arbitrary")),
        )(gx, whh)
        out_tbh = 0.5 * (out2[0] + out2[1][::-1])         # mean in XLA here

    return jnp.transpose(out_tbh, (1, 0, 2))[:B, :, :H]


def init_params(key, input_dim, hidden_dim):
    """PyTorch-LSTM-shaped params, U(-1/sqrt(H), 1/sqrt(H)).

    Stored pre-transposed for right-multiplication:
      wih_*: (D, 4H), whh_*: (H, 4H), b_*: (1, 4H) = b_ih + b_hh.
    """
    k = 1.0 / math.sqrt(hidden_dim)
    keys = jax.random.split(key, 8)

    def u(kk, shape):
        return jax.random.uniform(kk, shape, jnp.float32, minval=-k, maxval=k)

    return {
        "wih_f": u(keys[0], (input_dim, 4 * hidden_dim)),
        "whh_f": u(keys[1], (hidden_dim, 4 * hidden_dim)),
        "b_f": u(keys[2], (1, 4 * hidden_dim)) + u(keys[3], (1, 4 * hidden_dim)),
        "wih_b": u(keys[4], (input_dim, 4 * hidden_dim)),
        "whh_b": u(keys[5], (hidden_dim, 4 * hidden_dim)),
        "b_b": u(keys[6], (1, 4 * hidden_dim)) + u(keys[7], (1, 4 * hidden_dim)),
    }


def sequence_encoder_reference(x_btd, params):
    """Pure-JAX reference (lax.scan bi-LSTM), full-precision matmuls."""
    B, T, D = x_btd.shape
    H = params["whh_f"].shape[0]

    def cell(carry, x_t, wih, whh, b):
        h, c = carry
        g = (jnp.dot(x_t, wih, precision=lax.Precision.HIGHEST)
             + jnp.dot(h, whh, precision=lax.Precision.HIGHEST) + b)
        i_g = jax.nn.sigmoid(g[:, :H])
        f_g = jax.nn.sigmoid(g[:, H:2 * H])
        g_g = jnp.tanh(g[:, 2 * H:3 * H])
        o_g = jax.nn.sigmoid(g[:, 3 * H:])
        c = f_g * c + i_g * g_g
        h = o_g * jnp.tanh(c)
        return (h, c), h

    x_tbd = jnp.transpose(x_btd, (1, 0, 2))
    init = (jnp.zeros((B, H), jnp.float32), jnp.zeros((B, H), jnp.float32))
    _, hs_f = lax.scan(
        lambda s, xt: cell(s, xt, params["wih_f"], params["whh_f"], params["b_f"]),
        init, x_tbd)
    _, hs_b = lax.scan(
        lambda s, xt: cell(s, xt, params["wih_b"], params["whh_b"], params["b_b"]),
        init, x_tbd[::-1])
    hs_b = hs_b[::-1]
    return jnp.transpose(0.5 * (hs_f + hs_b), (1, 0, 2))


if __name__ == "__main__":
    B, T, D, H = 2, 8, 16, 32  # batch, seq_len, input_dim, output_dim

    key = jax.random.PRNGKey(0)
    k_x, k_p = jax.random.split(key)
    x = jax.random.normal(k_x, (B, T, D), dtype=jnp.float32)
    params = init_params(k_p, D, H)

    ref = jax.block_until_ready(sequence_encoder_reference(x, params))

    # Default path: resident fused kernel, bf16 MXU operands / VMEM storage.
    out = jax.block_until_ready(jax.jit(sequence_encoder_forward)(x, params))
    assert out.shape == (B, T, H), out.shape
    err_bf16 = float(jnp.max(jnp.abs(out - ref)))
    assert err_bf16 < 3e-2, err_bf16          # bf16-appropriate tolerance

    # All-f32 path: tight tolerance validates the recurrence itself.
    out_f32 = jax.block_until_ready(jax.jit(
        lambda a, p: sequence_encoder_forward(a, p, compute_dtype=jnp.float32)
    )(x, params))
    err_f32 = float(jnp.max(jnp.abs(out_f32 - ref)))
    assert err_f32 < 1e-4, err_f32            # typically ~1e-6 observed

    # Streamed path (time-chunked grid, direction axis "parallel").
    out_s = jax.block_until_ready(jax.jit(
        lambda a, p: sequence_encoder_forward(a, p, mode="stream", time_chunk=4)
    )(x, params))
    err_s = float(jnp.max(jnp.abs(out_s - ref)))
    assert err_s < 3e-2, err_s

    print("KERNEL_OK")
</pallas_src>

<mosaic_0001>
module attributes {stable_mosaic.version = 11 : i64} {
  func.func @bilstm_resident_kernel(%arg0: memref<8x8x512xbf16, #tpu.memory_space<vmem>>, %arg1: memref<8x8x512xbf16, #tpu.memory_space<vmem>>, %arg2: memref<128x512xbf16, #tpu.memory_space<vmem>>, %arg3: memref<128x512xbf16, #tpu.memory_space<vmem>>, %arg4: memref<8x8x128xf32, #tpu.memory_space<vmem>>, %arg5: memref<8x8x128xf32, #tpu.memory_space<vmem>>) attributes {dimension_semantics = [], scalar_prefetch = 0 : i64, scratch_operands = 1 : i64, tpu.core_type = #tpu.core_type<tc>} {
    %cst = arith.constant 0.000000e+00 : f32
    %0 = vector.broadcast %cst : f32 to vector<8x128xf32>
    %c0 = arith.constant 0 : index
    %c0_0 = arith.constant 0 : index
    %c0_1 = arith.constant 0 : index
    %1 = vector.load %arg0[%c0, %c0_0, %c0_1] : memref<8x8x512xbf16, #tpu.memory_space<vmem>>, vector<1x8x512xbf16>
    %2 = vector.shape_cast %1 : vector<1x8x512xbf16> to vector<8x512xbf16>
    %c0_2 = arith.constant 0 : index
    %c0_3 = arith.constant 0 : index
    %3 = vector.load %arg2[%c0_2, %c0_3] : memref<128x512xbf16, #tpu.memory_space<vmem>>, vector<128x512xbf16>
    %4 = arith.extf %2 : vector<8x512xbf16> to vector<8x512xf32>
    %5 = arith.truncf %0 : vector<8x128xf32> to vector<8x128xbf16>
    %cst_4 = arith.constant dense<0.000000e+00> : vector<8x512xf32>
    %6 = tpu.matmul %5, %3, %cst_4 {dimension_numbers = #tpu.dot_dimension_numbers<[1], [0], [0], [1], [0, 0, 1, 1], [], []>} : vector<8x128xbf16>, vector<128x512xbf16>, vector<8x512xf32> -> vector<8x512xf32>
    %7 = arith.addf %4, %6 : vector<8x512xf32>
    %8 = vector.extract_strided_slice %7 {offsets = [0, 0], sizes = [8, 128], strides = [1, 1]} : vector<8x512xf32> to vector<8x128xf32>
    %9 = arith.negf %8 : vector<8x128xf32>
    %10 = math.exp %9 : vector<8x128xf32>
    %cst_5 = arith.constant 1.000000e+00 : f32
    %11 = vector.broadcast %cst_5 : f32 to vector<8x128xf32>
    %12 = arith.addf %11, %10 : vector<8x128xf32>
    %13 = arith.divf %11, %12 : vector<8x128xf32>
    %14 = vector.extract_strided_slice %7 {offsets = [0, 128], sizes = [8, 128], strides = [1, 1]} : vector<8x512xf32> to vector<8x128xf32>
    %15 = arith.negf %14 : vector<8x128xf32>
    %16 = math.exp %15 : vector<8x128xf32>
    %cst_6 = arith.constant 1.000000e+00 : f32
    %17 = vector.broadcast %cst_6 : f32 to vector<8x128xf32>
    %18 = arith.addf %17, %16 : vector<8x128xf32>
    %19 = arith.divf %17, %18 : vector<8x128xf32>
    %20 = vector.extract_strided_slice %7 {offsets = [0, 256], sizes = [8, 128], strides = [1, 1]} : vector<8x512xf32> to vector<8x128xf32>
    %21 = math.tanh %20 : vector<8x128xf32>
    %22 = vector.extract_strided_slice %7 {offsets = [0, 384], sizes = [8, 128], strides = [1, 1]} : vector<8x512xf32> to vector<8x128xf32>
    %23 = arith.negf %22 : vector<8x128xf32>
    %24 = math.exp %23 : vector<8x128xf32>
    %cst_7 = arith.constant 1.000000e+00 : f32
    %25 = vector.broadcast %cst_7 : f32 to vector<8x128xf32>
    %26 = arith.addf %25, %24 : vector<8x128xf32>
    %27 = arith.divf %25, %26 : vector<8x128xf32>
    %28 = arith.mulf %19, %0 : vector<8x128xf32>
    %29 = arith.mulf %13, %21 : vector<8x128xf32>
    %30 = arith.addf %28, %29 : vector<8x128xf32>
    %31 = math.tanh %30 : vector<8x128xf32>
    %32 = arith.mulf %27, %31 : vector<8x128xf32>
    %c7 = arith.constant 7 : index
    %c0_8 = arith.constant 0 : index
    %c0_9 = arith.constant 0 : index
    %33 = vector.load %arg1[%c7, %c0_8, %c0_9] : memref<8x8x512xbf16, #tpu.memory_space<vmem>>, vector<1x8x512xbf16>
    %34 = vector.shape_cast %33 : vector<1x8x512xbf16> to vector<8x512xbf16>
    %c0_10 = arith.constant 0 : index
    %c0_11 = arith.constant 0 : index
    %35 = vector.load %arg3[%c0_10, %c0_11] : memref<128x512xbf16, #tpu.memory_space<vmem>>, vector<128x512xbf16>
    %36 = arith.extf %34 : vector<8x512xbf16> to vector<8x512xf32>
    %37 = arith.truncf %0 : vector<8x128xf32> to vector<8x128xbf16>
    %cst_12 = arith.constant dense<0.000000e+00> : vector<8x512xf32>
    %38 = tpu.matmul %37, %35, %cst_12 {dimension_numbers = #tpu.dot_dimension_numbers<[1], [0], [0], [1], [0, 0, 1, 1], [], []>} : vector<8x128xbf16>, vector<128x512xbf16>, vector<8x512xf32> -> vector<8x512xf32>
    %39 = arith.addf %36, %38 : vector<8x512xf32>
    %40 = vector.extract_strided_slice %39 {offsets = [0, 0], sizes = [8, 128], strides = [1, 1]} : vector<8x512xf32> to vector<8x128xf32>
    %41 = arith.negf %40 : vector<8x128xf32>
    %42 = math.exp %41 : vector<8x128xf32>
    %cst_13 = arith.constant 1.000000e+00 : f32
    %43 = vector.broadcast %cst_13 : f32 to vector<8x128xf32>
    %44 = arith.addf %43, %42 : vector<8x128xf32>
    %45 = arith.divf %43, %44 : vector<8x128xf32>
    %46 = vector.extract_strided_slice %39 {offsets = [0, 128], sizes = [8, 128], strides = [1, 1]} : vector<8x512xf32> to vector<8x128xf32>
    %47 = arith.negf %46 : vector<8x128xf32>
    %48 = math.exp %47 : vector<8x128xf32>
    %cst_14 = arith.constant 1.000000e+00 : f32
    %49 = vector.broadcast %cst_14 : f32 to vector<8x128xf32>
    %50 = arith.addf %49, %48 : vector<8x128xf32>
    %51 = arith.divf %49, %50 : vector<8x128xf32>
    %52 = vector.extract_strided_slice %39 {offsets = [0, 256], sizes = [8, 128], strides = [1, 1]} : vector<8x512xf32> to vector<8x128xf32>
    %53 = math.tanh %52 : vector<8x128xf32>
    %54 = vector.extract_strided_slice %39 {offsets = [0, 384], sizes = [8, 128], strides = [1, 1]} : vector<8x512xf32> to vector<8x128xf32>
    %55 = arith.negf %54 : vector<8x128xf32>
    %56 = math.exp %55 : vector<8x128xf32>
    %cst_15 = arith.constant 1.000000e+00 : f32
    %57 = vector.broadcast %cst_15 : f32 to vector<8x128xf32>
    %58 = arith.addf %57, %56 : vector<8x128xf32>
    %59 = arith.divf %57, %58 : vector<8x128xf32>
    %60 = arith.mulf %51, %0 : vector<8x128xf32>
    %61 = arith.mulf %45, %53 : vector<8x128xf32>
    %62 = arith.addf %60, %61 : vector<8x128xf32>
    %63 = math.tanh %62 : vector<8x128xf32>
    %64 = arith.mulf %59, %63 : vector<8x128xf32>
    %c0_16 = arith.constant 0 : index
    %c0_17 = arith.constant 0 : index
    %c0_18 = arith.constant 0 : index
    %65 = vector.load %arg4[%c0_16, %c0_17, %c0_18] : memref<8x8x128xf32, #tpu.memory_space<vmem>>, vector<1x8x128xf32>
    %66 = vector.shape_cast %65 : vector<1x8x128xf32> to vector<8x128xf32>
    %67 = vector.shape_cast %32 : vector<8x128xf32> to vector<1x8x128xf32>
    tpu.vector_store %arg4[%c0_16, %c0_17, %c0_18], %67 {strides = array<i32>} : memref<8x8x128xf32, #tpu.memory_space<vmem>>, vector<1x8x128xf32>,
    %c7_19 = arith.constant 7 : index
    %c0_20 = arith.constant 0 : index
    %c0_21 = arith.constant 0 : index
    %68 = vector.load %arg5[%c7_19, %c0_20, %c0_21] : memref<8x8x128xf32, #tpu.memory_space<vmem>>, vector<1x8x128xf32>
    %69 = vector.shape_cast %68 : vector<1x8x128xf32> to vector<8x128xf32>
    %70 = vector.shape_cast %64 : vector<8x128xf32> to vector<1x8x128xf32>
    tpu.vector_store %arg5[%c7_19, %c0_20, %c0_21], %70 {strides = array<i32>} : memref<8x8x128xf32, #tpu.memory_space<vmem>>, vector<1x8x128xf32>,
    %c1 = arith.constant 1 : index
    %c0_22 = arith.constant 0 : index
    %c0_23 = arith.constant 0 : index
    %71 = vector.load %arg0[%c1, %c0_22, %c0_23] : memref<8x8x512xbf16, #tpu.memory_space<vmem>>, vector<1x8x512xbf16>
    %72 = vector.shape_cast %71 : vector<1x8x512xbf16> to vector<8x512xbf16>
    %c0_24 = arith.constant 0 : index
    %c0_25 = arith.constant 0 : index
    %73 = vector.load %arg2[%c0_24, %c0_25] : memref<128x512xbf16, #tpu.memory_space<vmem>>, vector<128x512xbf16>
    %74 = arith.extf %72 : vector<8x512xbf16> to vector<8x512xf32>
    %75 = arith.truncf %32 : vector<8x128xf32> to vector<8x128xbf16>
    %cst_26 = arith.constant dense<0.000000e+00> : vector<8x512xf32>
    %76 = tpu.matmul %75, %73, %cst_26 {dimension_numbers = #tpu.dot_dimension_numbers<[1], [0], [0], [1], [0, 0, 1, 1], [], []>} : vector<8x128xbf16>, vector<128x512xbf16>, vector<8x512xf32> -> vector<8x512xf32>
    %77 = arith.addf %74, %76 : vector<8x512xf32>
    %78 = vector.extract_strided_slice %77 {offsets = [0, 0], sizes = [8, 128], strides = [1, 1]} : vector<8x512xf32> to vector<8x128xf32>
    %79 = arith.negf %78 : vector<8x128xf32>
    %80 = math.exp %79 : vector<8x128xf32>
    %cst_27 = arith.constant 1.000000e+00 : f32
    %81 = vector.broadcast %cst_27 : f32 to vector<8x128xf32>
    %82 = arith.addf %81, %80 : vector<8x128xf32>
    %83 = arith.divf %81, %82 : vector<8x128xf32>
    %84 = vector.extract_strided_slice %77 {offsets = [0, 128], sizes = [8, 128], strides = [1, 1]} : vector<8x512xf32> to vector<8x128xf32>
    %85 = arith.negf %84 : vector<8x128xf32>
    %86 = math.exp %85 : vector<8x128xf32>
    %cst_28 = arith.constant 1.000000e+00 : f32
    %87 = vector.broadcast %cst_28 : f32 to vector<8x128xf32>
    %88 = arith.addf %87, %86 : vector<8x128xf32>
    %89 = arith.divf %87, %88 : vector<8x128xf32>
    %90 = vector.extract_strided_slice %77 {offsets = [0, 256], sizes = [8, 128], strides = [1, 1]} : vector<8x512xf32> to vector<8x128xf32>
    %91 = math.tanh %90 : vector<8x128xf32>
    %92 = vector.extract_strided_slice %77 {offsets = [0, 384], sizes = [8, 128], strides = [1, 1]} : vector<8x512xf32> to vector<8x128xf32>
    %93 = arith.negf %92 : vector<8x128xf32>
    %94 = math.exp %93 : vector<8x128xf32>
    %cst_29 = arith.constant 1.000000e+00 : f32
    %95 = vector.broadcast %cst_29 : f32 to vector<8x128xf32>
    %96 = arith.addf %95, %94 : vector<8x128xf32>
    %97 = arith.divf %95, %96 : vector<8x128xf32>
    %98 = arith.mulf %89, %30 : vector<8x128xf32>
    %99 = arith.mulf %83, %91 : vector<8x128xf32>
    %100 = arith.addf %98, %99 : vector<8x128xf32>
    %101 = math.tanh %100 : vector<8x128xf32>
    %102 = arith.mulf %97, %101 : vector<8x128xf32>
    %c6 = arith.constant 6 : index
    %c0_30 = arith.constant 0 : index
    %c0_31 = arith.constant 0 : index
    %103 = vector.load %arg1[%c6, %c0_30, %c0_31] : memref<8x8x512xbf16, #tpu.memory_space<vmem>>, vector<1x8x512xbf16>
    %104 = vector.shape_cast %103 : vector<1x8x512xbf16> to vector<8x512xbf16>
    %c0_32 = arith.constant 0 : index
    %c0_33 = arith.constant 0 : index
    %105 = vector.load %arg3[%c0_32, %c0_33] : memref<128x512xbf16, #tpu.memory_space<vmem>>, vector<128x512xbf16>
    %106 = arith.extf %104 : vector<8x512xbf16> to vector<8x512xf32>
    %107 = arith.truncf %64 : vector<8x128xf32> to vector<8x128xbf16>
    %cst_34 = arith.constant dense<0.000000e+00> : vector<8x512xf32>
    %108 = tpu.matmul %107, %105, %cst_34 {dimension_numbers = #tpu.dot_dimension_numbers<[1], [0], [0], [1], [0, 0, 1, 1], [], []>} : vector<8x128xbf16>, vector<128x512xbf16>, vector<8x512xf32> -> vector<8x512xf32>
    %109 = arith.addf %106, %108 : vector<8x512xf32>
    %110 = vector.extract_strided_slice %109 {offsets = [0, 0], sizes = [8, 128], strides = [1, 1]} : vector<8x512xf32> to vector<8x128xf32>
    %111 = arith.negf %110 : vector<8x128xf32>
    %112 = math.exp %111 : vector<8x128xf32>
    %cst_35 = arith.constant 1.000000e+00 : f32
    %113 = vector.broadcast %cst_35 : f32 to vector<8x128xf32>
    %114 = arith.addf %113, %112 : vector<8x128xf32>
    %115 = arith.divf %113, %114 : vector<8x128xf32>
    %116 = vector.extract_strided_slice %109 {offsets = [0, 128], sizes = [8, 128], strides = [1, 1]} : vector<8x512xf32> to vector<8x128xf32>
    %117 = arith.negf %116 : vector<8x128xf32>
    %118 = math.exp %117 : vector<8x128xf32>
    %cst_36 = arith.constant 1.000000e+00 : f32
    %119 = vector.broadcast %cst_36 : f32 to vector<8x128xf32>
    %120 = arith.addf %119, %118 : vector<8x128xf32>
    %121 = arith.divf %119, %120 : vector<8x128xf32>
    %122 = vector.extract_strided_slice %109 {offsets = [0, 256], sizes = [8, 128], strides = [1, 1]} : vector<8x512xf32> to vector<8x128xf32>
    %123 = math.tanh %122 : vector<8x128xf32>
    %124 = vector.extract_strided_slice %109 {offsets = [0, 384], sizes = [8, 128], strides = [1, 1]} : vector<8x512xf32> to vector<8x128xf32>
    %125 = arith.negf %124 : vector<8x128xf32>
    %126 = math.exp %125 : vector<8x128xf32>
    %cst_37 = arith.constant 1.000000e+00 : f32
    %127 = vector.broadcast %cst_37 : f32 to vector<8x128xf32>
    %128 = arith.addf %127, %126 : vector<8x128xf32>
    %129 = arith.divf %127, %128 : vector<8x128xf32>
    %130 = arith.mulf %121, %62 : vector<8x128xf32>
    %131 = arith.mulf %115, %123 : vector<8x128xf32>
    %132 = arith.addf %130, %131 : vector<8x128xf32>
    %133 = math.tanh %132 : vector<8x128xf32>
    %134 = arith.mulf %129, %133 : vector<8x128xf32>
    %c1_38 = arith.constant 1 : index
    %c0_39 = arith.constant 0 : index
    %c0_40 = arith.constant 0 : index
    %135 = vector.load %arg4[%c1_38, %c0_39, %c0_40] : memref<8x8x128xf32, #tpu.memory_space<vmem>>, vector<1x8x128xf32>
    %136 = vector.shape_cast %135 : vector<1x8x128xf32> to vector<8x128xf32>
    %137 = vector.shape_cast %102 : vector<8x128xf32> to vector<1x8x128xf32>
    tpu.vector_store %arg4[%c1_38, %c0_39, %c0_40], %137 {strides = array<i32>} : memref<8x8x128xf32, #tpu.memory_space<vmem>>, vector<1x8x128xf32>,
    %c6_41 = arith.constant 6 : index
    %c0_42 = arith.constant 0 : index
    %c0_43 = arith.constant 0 : index
    %138 = vector.load %arg5[%c6_41, %c0_42, %c0_43] : memref<8x8x128xf32, #tpu.memory_space<vmem>>, vector<1x8x128xf32>
    %139 = vector.shape_cast %138 : vector<1x8x128xf32> to vector<8x128xf32>
    %140 = vector.shape_cast %134 : vector<8x128xf32> to vector<1x8x128xf32>
    tpu.vector_store %arg5[%c6_41, %c0_42, %c0_43], %140 {strides = array<i32>} : memref<8x8x128xf32, #tpu.memory_space<vmem>>, vector<1x8x128xf32>,
    %c2 = arith.constant 2 : index
    %c0_44 = arith.constant 0 : index
    %c0_45 = arith.constant 0 : index
    %141 = vector.load %arg0[%c2, %c0_44, %c0_45] : memref<8x8x512xbf16, #tpu.memory_space<vmem>>, vector<1x8x512xbf16>
    %142 = vector.shape_cast %141 : vector<1x8x512xbf16> to vector<8x512xbf16>
    %c0_46 = arith.constant 0 : index
    %c0_47 = arith.constant 0 : index
    %143 = vector.load %arg2[%c0_46, %c0_47] : memref<128x512xbf16, #tpu.memory_space<vmem>>, vector<128x512xbf16>
    %144 = arith.extf %142 : vector<8x512xbf16> to vector<8x512xf32>
    %145 = arith.truncf %102 : vector<8x128xf32> to vector<8x128xbf16>
    %cst_48 = arith.constant dense<0.000000e+00> : vector<8x512xf32>
    %146 = tpu.matmul %145, %143, %cst_48 {dimension_numbers = #tpu.dot_dimension_numbers<[1], [0], [0], [1], [0, 0, 1, 1], [], []>} : vector<8x128xbf16>, vector<128x512xbf16>, vector<8x512xf32> -> vector<8x512xf32>
    %147 = arith.addf %144, %146 : vector<8x512xf32>
    %148 = vector.extract_strided_slice %147 {offsets = [0, 0], sizes = [8, 128], strides = [1, 1]} : vector<8x512xf32> to vector<8x128xf32>
    %149 = arith.negf %148 : vector<8x128xf32>
    %150 = math.exp %149 : vector<8x128xf32>
    %cst_49 = arith.constant 1.000000e+00 : f32
    %151 = vector.broadcast %cst_49 : f32 to vector<8x128xf32>
    %152 = arith.addf %151, %150 : vector<8x128xf32>
    %153 = arith.divf %151, %152 : vector<8x128xf32>
    %154 = vector.extract_strided_slice %147 {offsets = [0, 128], sizes = [8, 128], strides = [1, 1]} : vector<8x512xf32> to vector<8x128xf32>
    %155 = arith.negf %154 : vector<8x128xf32>
    %156 = math.exp %155 : vector<8x128xf32>
    %cst_50 = arith.constant 1.000000e+00 : f32
    %157 = vector.broadcast %cst_50 : f32 to vector<8x128xf32>
    %158 = arith.addf %157, %156 : vector<8x128xf32>
    %159 = arith.divf %157, %158 : vector<8x128xf32>
    %160 = vector.extract_strided_slice %147 {offsets = [0, 256], sizes = [8, 128], strides = [1, 1]} : vector<8x512xf32> to vector<8x128xf32>
    %161 = math.tanh %160 : vector<8x128xf32>
    %162 = vector.extract_strided_slice %147 {offsets = [0, 384], sizes = [8, 128], strides = [1, 1]} : vector<8x512xf32> to vector<8x128xf32>
    %163 = arith.negf %162 : vector<8x128xf32>
    %164 = math.exp %163 : vector<8x128xf32>
    %cst_51 = arith.constant 1.000000e+00 : f32
    %165 = vector.broadcast %cst_51 : f32 to vector<8x128xf32>
    %166 = arith.addf %165, %164 : vector<8x128xf32>
    %167 = arith.divf %165, %166 : vector<8x128xf32>
    %168 = arith.mulf %159, %100 : vector<8x128xf32>
    %169 = arith.mulf %153, %161 : vector<8x128xf32>
    %170 = arith.addf %168, %169 : vector<8x128xf32>
    %171 = math.tanh %170 : vector<8x128xf32>
    %172 = arith.mulf %167, %171 : vector<8x128xf32>
    %c5 = arith.constant 5 : index
    %c0_52 = arith.constant 0 : index
    %c0_53 = arith.constant 0 : index
    %173 = vector.load %arg1[%c5, %c0_52, %c0_53] : memref<8x8x512xbf16, #tpu.memory_space<vmem>>, vector<1x8x512xbf16>
    %174 = vector.shape_cast %173 : vector<1x8x512xbf16> to vector<8x512xbf16>
    %c0_54 = arith.constant 0 : index
    %c0_55 = arith.constant 0 : index
    %175 = vector.load %arg3[%c0_54, %c0_55] : memref<128x512xbf16, #tpu.memory_space<vmem>>, vector<128x512xbf16>
    %176 = arith.extf %174 : vector<8x512xbf16> to vector<8x512xf32>
    %177 = arith.truncf %134 : vector<8x128xf32> to vector<8x128xbf16>
    %cst_56 = arith.constant dense<0.000000e+00> : vector<8x512xf32>
    %178 = tpu.matmul %177, %175, %cst_56 {dimension_numbers = #tpu.dot_dimension_numbers<[1], [0], [0], [1], [0, 0, 1, 1], [], []>} : vector<8x128xbf16>, vector<128x512xbf16>, vector<8x512xf32> -> vector<8x512xf32>
    %179 = arith.addf %176, %178 : vector<8x512xf32>
    %180 = vector.extract_strided_slice %179 {offsets = [0, 0], sizes = [8, 128], strides = [1, 1]} : vector<8x512xf32> to vector<8x128xf32>
    %181 = arith.negf %180 : vector<8x128xf32>
    %182 = math.exp %181 : vector<8x128xf32>
    %cst_57 = arith.constant 1.000000e+00 : f32
    %183 = vector.broadcast %cst_57 : f32 to vector<8x128xf32>
    %184 = arith.addf %183, %182 : vector<8x128xf32>
    %185 = arith.divf %183, %184 : vector<8x128xf32>
    %186 = vector.extract_strided_slice %179 {offsets = [0, 128], sizes = [8, 128], strides = [1, 1]} : vector<8x512xf32> to vector<8x128xf32>
    %187 = arith.negf %186 : vector<8x128xf32>
    %188 = math.exp %187 : vector<8x128xf32>
    %cst_58 = arith.constant 1.000000e+00 : f32
    %189 = vector.broadcast %cst_58 : f32 to vector<8x128xf32>
    %190 = arith.addf %189, %188 : vector<8x128xf32>
    %191 = arith.divf %189, %190 : vector<8x128xf32>
    %192 = vector.extract_strided_slice %179 {offsets = [0, 256], sizes = [8, 128], strides = [1, 1]} : vector<8x512xf32> to vector<8x128xf32>
    %193 = math.tanh %192 : vector<8x128xf32>
    %194 = vector.extract_strided_slice %179 {offsets = [0, 384], sizes = [8, 128], strides = [1, 1]} : vector<8x512xf32> to vector<8x128xf32>
    %195 = arith.negf %194 : vector<8x128xf32>
    %196 = math.exp %195 : vector<8x128xf32>
    %cst_59 = arith.constant 1.000000e+00 : f32
    %197 = vector.broadcast %cst_59 : f32 to vector<8x128xf32>
    %198 = arith.addf %197, %196 : vector<8x128xf32>
    %199 = arith.divf %197, %198 : vector<8x128xf32>
    %200 = arith.mulf %191, %132 : vector<8x128xf32>
    %201 = arith.mulf %185, %193 : vector<8x128xf32>
    %202 = arith.addf %200, %201 : vector<8x128xf32>
    %203 = math.tanh %202 : vector<8x128xf32>
    %204 = arith.mulf %199, %203 : vector<8x128xf32>
    %c2_60 = arith.constant 2 : index
    %c0_61 = arith.constant 0 : index
    %c0_62 = arith.constant 0 : index
    %205 = vector.load %arg4[%c2_60, %c0_61, %c0_62] : memref<8x8x128xf32, #tpu.memory_space<vmem>>, vector<1x8x128xf32>
    %206 = vector.shape_cast %205 : vector<1x8x128xf32> to vector<8x128xf32>
    %207 = vector.shape_cast %172 : vector<8x128xf32> to vector<1x8x128xf32>
    tpu.vector_store %arg4[%c2_60, %c0_61, %c0_62], %207 {strides = array<i32>} : memref<8x8x128xf32, #tpu.memory_space<vmem>>, vector<1x8x128xf32>,
    %c5_63 = arith.constant 5 : index
    %c0_64 = arith.constant 0 : index
    %c0_65 = arith.constant 0 : index
    %208 = vector.load %arg5[%c5_63, %c0_64, %c0_65] : memref<8x8x128xf32, #tpu.memory_space<vmem>>, vector<1x8x128xf32>
    %209 = vector.shape_cast %208 : vector<1x8x128xf32> to vector<8x128xf32>
    %210 = vector.shape_cast %204 : vector<8x128xf32> to vector<1x8x128xf32>
    tpu.vector_store %arg5[%c5_63, %c0_64, %c0_65], %210 {strides = array<i32>} : memref<8x8x128xf32, #tpu.memory_space<vmem>>, vector<1x8x128xf32>,
    %c3 = arith.constant 3 : index
    %c0_66 = arith.constant 0 : index
    %c0_67 = arith.constant 0 : index
    %211 = vector.load %arg0[%c3, %c0_66, %c0_67] : memref<8x8x512xbf16, #tpu.memory_space<vmem>>, vector<1x8x512xbf16>
    %212 = vector.shape_cast %211 : vector<1x8x512xbf16> to vector<8x512xbf16>
    %c0_68 = arith.constant 0 : index
    %c0_69 = arith.constant 0 : index
    %213 = vector.load %arg2[%c0_68, %c0_69] : memref<128x512xbf16, #tpu.memory_space<vmem>>, vector<128x512xbf16>
    %214 = arith.extf %212 : vector<8x512xbf16> to vector<8x512xf32>
    %215 = arith.truncf %172 : vector<8x128xf32> to vector<8x128xbf16>
    %cst_70 = arith.constant dense<0.000000e+00> : vector<8x512xf32>
    %216 = tpu.matmul %215, %213, %cst_70 {dimension_numbers = #tpu.dot_dimension_numbers<[1], [0], [0], [1], [0, 0, 1, 1], [], []>} : vector<8x128xbf16>, vector<128x512xbf16>, vector<8x512xf32> -> vector<8x512xf32>
    %217 = arith.addf %214, %216 : vector<8x512xf32>
    %218 = vector.extract_strided_slice %217 {offsets = [0, 0], sizes = [8, 128], strides = [1, 1]} : vector<8x512xf32> to vector<8x128xf32>
    %219 = arith.negf %218 : vector<8x128xf32>
    %220 = math.exp %219 : vector<8x128xf32>
    %cst_71 = arith.constant 1.000000e+00 : f32
    %221 = vector.broadcast %cst_71 : f32 to vector<8x128xf32>
    %222 = arith.addf %221, %220 : vector<8x128xf32>
    %223 = arith.divf %221, %222 : vector<8x128xf32>
    %224 = vector.extract_strided_slice %217 {offsets = [0, 128], sizes = [8, 128], strides = [1, 1]} : vector<8x512xf32> to vector<8x128xf32>
    %225 = arith.negf %224 : vector<8x128xf32>
    %226 = math.exp %225 : vector<8x128xf32>
    %cst_72 = arith.constant 1.000000e+00 : f32
    %227 = vector.broadcast %cst_72 : f32 to vector<8x128xf32>
    %228 = arith.addf %227, %226 : vector<8x128xf32>
    %229 = arith.divf %227, %228 : vector<8x128xf32>
    %230 = vector.extract_strided_slice %217 {offsets = [0, 256], sizes = [8, 128], strides = [1, 1]} : vector<8x512xf32> to vector<8x128xf32>
    %231 = math.tanh %230 : vector<8x128xf32>
    %232 = vector.extract_strided_slice %217 {offsets = [0, 384], sizes = [8, 128], strides = [1, 1]} : vector<8x512xf32> to vector<8x128xf32>
    %233 = arith.negf %232 : vector<8x128xf32>
    %234 = math.exp %233 : vector<8x128xf32>
    %cst_73 = arith.constant 1.000000e+00 : f32
    %235 = vector.broadcast %cst_73 : f32 to vector<8x128xf32>
    %236 = arith.addf %235, %234 : vector<8x128xf32>
    %237 = arith.divf %235, %236 : vector<8x128xf32>
    %238 = arith.mulf %229, %170 : vector<8x128xf32>
    %239 = arith.mulf %223, %231 : vector<8x128xf32>
    %240 = arith.addf %238, %239 : vector<8x128xf32>
    %241 = math.tanh %240 : vector<8x128xf32>
    %242 = arith.mulf %237, %241 : vector<8x128xf32>
    %c4 = arith.constant 4 : index
    %c0_74 = arith.constant 0 : index
    %c0_75 = arith.constant 0 : index
    %243 = vector.load %arg1[%c4, %c0_74, %c0_75] : memref<8x8x512xbf16, #tpu.memory_space<vmem>>, vector<1x8x512xbf16>
    %244 = vector.shape_cast %243 : vector<1x8x512xbf16> to vector<8x512xbf16>
    %c0_76 = arith.constant 0 : index
    %c0_77 = arith.constant 0 : index
    %245 = vector.load %arg3[%c0_76, %c0_77] : memref<128x512xbf16, #tpu.memory_space<vmem>>, vector<128x512xbf16>
    %246 = arith.extf %244 : vector<8x512xbf16> to vector<8x512xf32>
    %247 = arith.truncf %204 : vector<8x128xf32> to vector<8x128xbf16>
    %cst_78 = arith.constant dense<0.000000e+00> : vector<8x512xf32>
    %248 = tpu.matmul %247, %245, %cst_78 {dimension_numbers = #tpu.dot_dimension_numbers<[1], [0], [0], [1], [0, 0, 1, 1], [], []>} : vector<8x128xbf16>, vector<128x512xbf16>, vector<8x512xf32> -> vector<8x512xf32>
    %249 = arith.addf %246, %248 : vector<8x512xf32>
    %250 = vector.extract_strided_slice %249 {offsets = [0, 0], sizes = [8, 128], strides = [1, 1]} : vector<8x512xf32> to vector<8x128xf32>
    %251 = arith.negf %250 : vector<8x128xf32>
    %252 = math.exp %251 : vector<8x128xf32>
    %cst_79 = arith.constant 1.000000e+00 : f32
    %253 = vector.broadcast %cst_79 : f32 to vector<8x128xf32>
    %254 = arith.addf %253, %252 : vector<8x128xf32>
    %255 = arith.divf %253, %254 : vector<8x128xf32>
    %256 = vector.extract_strided_slice %249 {offsets = [0, 128], sizes = [8, 128], strides = [1, 1]} : vector<8x512xf32> to vector<8x128xf32>
    %257 = arith.negf %256 : vector<8x128xf32>
    %258 = math.exp %257 : vector<8x128xf32>
    %cst_80 = arith.constant 1.000000e+00 : f32
    %259 = vector.broadcast %cst_80 : f32 to vector<8x128xf32>
    %260 = arith.addf %259, %258 : vector<8x128xf32>
    %261 = arith.divf %259, %260 : vector<8x128xf32>
    %262 = vector.extract_strided_slice %249 {offsets = [0, 256], sizes = [8, 128], strides = [1, 1]} : vector<8x512xf32> to vector<8x128xf32>
    %263 = math.tanh %262 : vector<8x128xf32>
    %264 = vector.extract_strided_slice %249 {offsets = [0, 384], sizes = [8, 128], strides = [1, 1]} : vector<8x512xf32> to vector<8x128xf32>
    %265 = arith.negf %264 : vector<8x128xf32>
    %266 = math.exp %265 : vector<8x128xf32>
    %cst_81 = arith.constant 1.000000e+00 : f32
    %267 = vector.broadcast %cst_81 : f32 to vector<8x128xf32>
    %268 = arith.addf %267, %266 : vector<8x128xf32>
    %269 = arith.divf %267, %268 : vector<8x128xf32>
    %270 = arith.mulf %261, %202 : vector<8x128xf32>
    %271 = arith.mulf %255, %263 : vector<8x128xf32>
    %272 = arith.addf %270, %271 : vector<8x128xf32>
    %273 = math.tanh %272 : vector<8x128xf32>
    %274 = arith.mulf %269, %273 : vector<8x128xf32>
    %c3_82 = arith.constant 3 : index
    %c0_83 = arith.constant 0 : index
    %c0_84 = arith.constant 0 : index
    %275 = vector.load %arg4[%c3_82, %c0_83, %c0_84] : memref<8x8x128xf32, #tpu.memory_space<vmem>>, vector<1x8x128xf32>
    %276 = vector.shape_cast %275 : vector<1x8x128xf32> to vector<8x128xf32>
    %277 = vector.shape_cast %242 : vector<8x128xf32> to vector<1x8x128xf32>
    tpu.vector_store %arg4[%c3_82, %c0_83, %c0_84], %277 {strides = array<i32>} : memref<8x8x128xf32, #tpu.memory_space<vmem>>, vector<1x8x128xf32>,
    %c4_85 = arith.constant 4 : index
    %c0_86 = arith.constant 0 : index
    %c0_87 = arith.constant 0 : index
    %278 = vector.load %arg5[%c4_85, %c0_86, %c0_87] : memref<8x8x128xf32, #tpu.memory_space<vmem>>, vector<1x8x128xf32>
    %279 = vector.shape_cast %278 : vector<1x8x128xf32> to vector<8x128xf32>
    %280 = vector.shape_cast %274 : vector<8x128xf32> to vector<1x8x128xf32>
    tpu.vector_store %arg5[%c4_85, %c0_86, %c0_87], %280 {strides = array<i32>} : memref<8x8x128xf32, #tpu.memory_space<vmem>>, vector<1x8x128xf32>,
    %c4_88 = arith.constant 4 : index
    %c0_89 = arith.constant 0 : index
    %c0_90 = arith.constant 0 : index
    %281 = vector.load %arg0[%c4_88, %c0_89, %c0_90] : memref<8x8x512xbf16, #tpu.memory_space<vmem>>, vector<1x8x512xbf16>
    %282 = vector.shape_cast %281 : vector<1x8x512xbf16> to vector<8x512xbf16>
    %c0_91 = arith.constant 0 : index
    %c0_92 = arith.constant 0 : index
    %283 = vector.load %arg2[%c0_91, %c0_92] : memref<128x512xbf16, #tpu.memory_space<vmem>>, vector<128x512xbf16>
    %284 = arith.extf %282 : vector<8x512xbf16> to vector<8x512xf32>
    %285 = arith.truncf %242 : vector<8x128xf32> to vector<8x128xbf16>
    %cst_93 = arith.constant dense<0.000000e+00> : vector<8x512xf32>
    %286 = tpu.matmul %285, %283, %cst_93 {dimension_numbers = #tpu.dot_dimension_numbers<[1], [0], [0], [1], [0, 0, 1, 1], [], []>} : vector<8x128xbf16>, vector<128x512xbf16>, vector<8x512xf32> -> vector<8x512xf32>
    %287 = arith.addf %284, %286 : vector<8x512xf32>
    %288 = vector.extract_strided_slice %287 {offsets = [0, 0], sizes = [8, 128], strides = [1, 1]} : vector<8x512xf32> to vector<8x128xf32>
    %289 = arith.negf %288 : vector<8x128xf32>
    %290 = math.exp %289 : vector<8x128xf32>
    %cst_94 = arith.constant 1.000000e+00 : f32
    %291 = vector.broadcast %cst_94 : f32 to vector<8x128xf32>
    %292 = arith.addf %291, %290 : vector<8x128xf32>
    %293 = arith.divf %291, %292 : vector<8x128xf32>
    %294 = vector.extract_strided_slice %287 {offsets = [0, 128], sizes = [8, 128], strides = [1, 1]} : vector<8x512xf32> to vector<8x128xf32>
    %295 = arith.negf %294 : vector<8x128xf32>
    %296 = math.exp %295 : vector<8x128xf32>
    %cst_95 = arith.constant 1.000000e+00 : f32
    %297 = vector.broadcast %cst_95 : f32 to vector<8x128xf32>
    %298 = arith.addf %297, %296 : vector<8x128xf32>
    %299 = arith.divf %297, %298 : vector<8x128xf32>
    %300 = vector.extract_strided_slice %287 {offsets = [0, 256], sizes = [8, 128], strides = [1, 1]} : vector<8x512xf32> to vector<8x128xf32>
    %301 = math.tanh %300 : vector<8x128xf32>
    %302 = vector.extract_strided_slice %287 {offsets = [0, 384], sizes = [8, 128], strides = [1, 1]} : vector<8x512xf32> to vector<8x128xf32>
    %303 = arith.negf %302 : vector<8x128xf32>
    %304 = math.exp %303 : vector<8x128xf32>
    %cst_96 = arith.constant 1.000000e+00 : f32
    %305 = vector.broadcast %cst_96 : f32 to vector<8x128xf32>
    %306 = arith.addf %305, %304 : vector<8x128xf32>
    %307 = arith.divf %305, %306 : vector<8x128xf32>
    %308 = arith.mulf %299, %240 : vector<8x128xf32>
    %309 = arith.mulf %293, %301 : vector<8x128xf32>
    %310 = arith.addf %308, %309 : vector<8x128xf32>
    %311 = math.tanh %310 : vector<8x128xf32>
    %312 = arith.mulf %307, %311 : vector<8x128xf32>
    %c3_97 = arith.constant 3 : index
    %c0_98 = arith.constant 0 : index
    %c0_99 = arith.constant 0 : index
    %313 = vector.load %arg1[%c3_97, %c0_98, %c0_99] : memref<8x8x512xbf16, #tpu.memory_space<vmem>>, vector<1x8x512xbf16>
    %314 = vector.shape_cast %313 : vector<1x8x512xbf16> to vector<8x512xbf16>
    %c0_100 = arith.constant 0 : index
    %c0_101 = arith.constant 0 : index
    %315 = vector.load %arg3[%c0_100, %c0_101] : memref<128x512xbf16, #tpu.memory_space<vmem>>, vector<128x512xbf16>
    %316 = arith.extf %314 : vector<8x512xbf16> to vector<8x512xf32>
    %317 = arith.truncf %274 : vector<8x128xf32> to vector<8x128xbf16>
    %cst_102 = arith.constant dense<0.000000e+00> : vector<8x512xf32>
    %318 = tpu.matmul %317, %315, %cst_102 {dimension_numbers = #tpu.dot_dimension_numbers<[1], [0], [0], [1], [0, 0, 1, 1], [], []>} : vector<8x128xbf16>, vector<128x512xbf16>, vector<8x512xf32> -> vector<8x512xf32>
    %319 = arith.addf %316, %318 : vector<8x512xf32>
    %320 = vector.extract_strided_slice %319 {offsets = [0, 0], sizes = [8, 128], strides = [1, 1]} : vector<8x512xf32> to vector<8x128xf32>
    %321 = arith.negf %320 : vector<8x128xf32>
    %322 = math.exp %321 : vector<8x128xf32>
    %cst_103 = arith.constant 1.000000e+00 : f32
    %323 = vector.broadcast %cst_103 : f32 to vector<8x128xf32>
    %324 = arith.addf %323, %322 : vector<8x128xf32>
    %325 = arith.divf %323, %324 : vector<8x128xf32>
    %326 = vector.extract_strided_slice %319 {offsets = [0, 128], sizes = [8, 128], strides = [1, 1]} : vector<8x512xf32> to vector<8x128xf32>
    %327 = arith.negf %326 : vector<8x128xf32>
    %328 = math.exp %327 : vector<8x128xf32>
    %cst_104 = arith.constant 1.000000e+00 : f32
    %329 = vector.broadcast %cst_104 : f32 to vector<8x128xf32>
    %330 = arith.addf %329, %328 : vector<8x128xf32>
    %331 = arith.divf %329, %330 : vector<8x128xf32>
    %332 = vector.extract_strided_slice %319 {offsets = [0, 256], sizes = [8, 128], strides = [1, 1]} : vector<8x512xf32> to vector<8x128xf32>
    %333 = math.tanh %332 : vector<8x128xf32>
    %334 = vector.extract_strided_slice %319 {offsets = [0, 384], sizes = [8, 128], strides = [1, 1]} : vector<8x512xf32> to vector<8x128xf32>
    %335 = arith.negf %334 : vector<8x128xf32>
    %336 = math.exp %335 : vector<8x128xf32>
    %cst_105 = arith.constant 1.000000e+00 : f32
    %337 = vector.broadcast %cst_105 : f32 to vector<8x128xf32>
    %338 = arith.addf %337, %336 : vector<8x128xf32>
    %339 = arith.divf %337, %338 : vector<8x128xf32>
    %340 = arith.mulf %331, %272 : vector<8x128xf32>
    %341 = arith.mulf %325, %333 : vector<8x128xf32>
    %342 = arith.addf %340, %341 : vector<8x128xf32>
    %343 = math.tanh %342 : vector<8x128xf32>
    %344 = arith.mulf %339, %343 : vector<8x128xf32>
    %c4_106 = arith.constant 4 : index
    %c0_107 = arith.constant 0 : index
    %c0_108 = arith.constant 0 : index
    %345 = vector.load %arg4[%c4_106, %c0_107, %c0_108] : memref<8x8x128xf32, #tpu.memory_space<vmem>>, vector<1x8x128xf32>
    %346 = vector.shape_cast %345 : vector<1x8x128xf32> to vector<8x128xf32>
    %347 = vector.shape_cast %312 : vector<8x128xf32> to vector<1x8x128xf32>
    tpu.vector_store %arg4[%c4_106, %c0_107, %c0_108], %347 {strides = array<i32>} : memref<8x8x128xf32, #tpu.memory_space<vmem>>, vector<1x8x128xf32>,
    %c3_109 = arith.constant 3 : index
    %c0_110 = arith.constant 0 : index
    %c0_111 = arith.constant 0 : index
    %348 = vector.load %arg5[%c3_109, %c0_110, %c0_111] : memref<8x8x128xf32, #tpu.memory_space<vmem>>, vector<1x8x128xf32>
    %349 = vector.shape_cast %348 : vector<1x8x128xf32> to vector<8x128xf32>
    %350 = vector.shape_cast %344 : vector<8x128xf32> to vector<1x8x128xf32>
    tpu.vector_store %arg5[%c3_109, %c0_110, %c0_111], %350 {strides = array<i32>} : memref<8x8x128xf32, #tpu.memory_space<vmem>>, vector<1x8x128xf32>,
    %c5_112 = arith.constant 5 : index
    %c0_113 = arith.constant 0 : index
    %c0_114 = arith.constant 0 : index
    %351 = vector.load %arg0[%c5_112, %c0_113, %c0_114] : memref<8x8x512xbf16, #tpu.memory_space<vmem>>, vector<1x8x512xbf16>
    %352 = vector.shape_cast %351 : vector<1x8x512xbf16> to vector<8x512xbf16>
    %c0_115 = arith.constant 0 : index
    %c0_116 = arith.constant 0 : index
    %353 = vector.load %arg2[%c0_115, %c0_116] : memref<128x512xbf16, #tpu.memory_space<vmem>>, vector<128x512xbf16>
    %354 = arith.extf %352 : vector<8x512xbf16> to vector<8x512xf32>
    %355 = arith.truncf %312 : vector<8x128xf32> to vector<8x128xbf16>
    %cst_117 = arith.constant dense<0.000000e+00> : vector<8x512xf32>
    %356 = tpu.matmul %355, %353, %cst_117 {dimension_numbers = #tpu.dot_dimension_numbers<[1], [0], [0], [1], [0, 0, 1, 1], [], []>} : vector<8x128xbf16>, vector<128x512xbf16>, vector<8x512xf32> -> vector<8x512xf32>
    %357 = arith.addf %354, %356 : vector<8x512xf32>
    %358 = vector.extract_strided_slice %357 {offsets = [0, 0], sizes = [8, 128], strides = [1, 1]} : vector<8x512xf32> to vector<8x128xf32>
    %359 = arith.negf %358 : vector<8x128xf32>
    %360 = math.exp %359 : vector<8x128xf32>
    %cst_118 = arith.constant 1.000000e+00 : f32
    %361 = vector.broadcast %cst_118 : f32 to vector<8x128xf32>
    %362 = arith.addf %361, %360 : vector<8x128xf32>
    %363 = arith.divf %361, %362 : vector<8x128xf32>
    %364 = vector.extract_strided_slice %357 {offsets = [0, 128], sizes = [8, 128], strides = [1, 1]} : vector<8x512xf32> to vector<8x128xf32>
    %365 = arith.negf %364 : vector<8x128xf32>
    %366 = math.exp %365 : vector<8x128xf32>
    %cst_119 = arith.constant 1.000000e+00 : f32
    %367 = vector.broadcast %cst_119 : f32 to vector<8x128xf32>
    %368 = arith.addf %367, %366 : vector<8x128xf32>
    %369 = arith.divf %367, %368 : vector<8x128xf32>
    %370 = vector.extract_strided_slice %357 {offsets = [0, 256], sizes = [8, 128], strides = [1, 1]} : vector<8x512xf32> to vector<8x128xf32>
    %371 = math.tanh %370 : vector<8x128xf32>
    %372 = vector.extract_strided_slice %357 {offsets = [0, 384], sizes = [8, 128], strides = [1, 1]} : vector<8x512xf32> to vector<8x128xf32>
    %373 = arith.negf %372 : vector<8x128xf32>
    %374 = math.exp %373 : vector<8x128xf32>
    %cst_120 = arith.constant 1.000000e+00 : f32
    %375 = vector.broadcast %cst_120 : f32 to vector<8x128xf32>
    %376 = arith.addf %375, %374 : vector<8x128xf32>
    %377 = arith.divf %375, %376 : vector<8x128xf32>
    %378 = arith.mulf %369, %310 : vector<8x128xf32>
    %379 = arith.mulf %363, %371 : vector<8x128xf32>
    %380 = arith.addf %378, %379 : vector<8x128xf32>
    %381 = math.tanh %380 : vector<8x128xf32>
    %382 = arith.mulf %377, %381 : vector<8x128xf32>
    %c2_121 = arith.constant 2 : index
    %c0_122 = arith.constant 0 : index
    %c0_123 = arith.constant 0 : index
    %383 = vector.load %arg1[%c2_121, %c0_122, %c0_123] : memref<8x8x512xbf16, #tpu.memory_space<vmem>>, vector<1x8x512xbf16>
    %384 = vector.shape_cast %383 : vector<1x8x512xbf16> to vector<8x512xbf16>
    %c0_124 = arith.constant 0 : index
    %c0_125 = arith.constant 0 : index
    %385 = vector.load %arg3[%c0_124, %c0_125] : memref<128x512xbf16, #tpu.memory_space<vmem>>, vector<128x512xbf16>
    %386 = arith.extf %384 : vector<8x512xbf16> to vector<8x512xf32>
    %387 = arith.truncf %344 : vector<8x128xf32> to vector<8x128xbf16>
    %cst_126 = arith.constant dense<0.000000e+00> : vector<8x512xf32>
    %388 = tpu.matmul %387, %385, %cst_126 {dimension_numbers = #tpu.dot_dimension_numbers<[1], [0], [0], [1], [0, 0, 1, 1], [], []>} : vector<8x128xbf16>, vector<128x512xbf16>, vector<8x512xf32> -> vector<8x512xf32>
    %389 = arith.addf %386, %388 : vector<8x512xf32>
    %390 = vector.extract_strided_slice %389 {offsets = [0, 0], sizes = [8, 128], strides = [1, 1]} : vector<8x512xf32> to vector<8x128xf32>
    %391 = arith.negf %390 : vector<8x128xf32>
    %392 = math.exp %391 : vector<8x128xf32>
    %cst_127 = arith.constant 1.000000e+00 : f32
    %393 = vector.broadcast %cst_127 : f32 to vector<8x128xf32>
    %394 = arith.addf %393, %392 : vector<8x128xf32>
    %395 = arith.divf %393, %394 : vector<8x128xf32>
    %396 = vector.extract_strided_slice %389 {offsets = [0, 128], sizes = [8, 128], strides = [1, 1]} : vector<8x512xf32> to vector<8x128xf32>
    %397 = arith.negf %396 : vector<8x128xf32>
    %398 = math.exp %397 : vector<8x128xf32>
    %cst_128 = arith.constant 1.000000e+00 : f32
    %399 = vector.broadcast %cst_128 : f32 to vector<8x128xf32>
    %400 = arith.addf %399, %398 : vector<8x128xf32>
    %401 = arith.divf %399, %400 : vector<8x128xf32>
    %402 = vector.extract_strided_slice %389 {offsets = [0, 256], sizes = [8, 128], strides = [1, 1]} : vector<8x512xf32> to vector<8x128xf32>
    %403 = math.tanh %402 : vector<8x128xf32>
    %404 = vector.extract_strided_slice %389 {offsets = [0, 384], sizes = [8, 128], strides = [1, 1]} : vector<8x512xf32> to vector<8x128xf32>
    %405 = arith.negf %404 : vector<8x128xf32>
    %406 = math.exp %405 : vector<8x128xf32>
    %cst_129 = arith.constant 1.000000e+00 : f32
    %407 = vector.broadcast %cst_129 : f32 to vector<8x128xf32>
    %408 = arith.addf %407, %406 : vector<8x128xf32>
    %409 = arith.divf %407, %408 : vector<8x128xf32>
    %410 = arith.mulf %401, %342 : vector<8x128xf32>
    %411 = arith.mulf %395, %403 : vector<8x128xf32>
    %412 = arith.addf %410, %411 : vector<8x128xf32>
    %413 = math.tanh %412 : vector<8x128xf32>
    %414 = arith.mulf %409, %413 : vector<8x128xf32>
    %c5_130 = arith.constant 5 : index
    %c0_131 = arith.constant 0 : index
    %c0_132 = arith.constant 0 : index
    %415 = vector.load %arg4[%c5_130, %c0_131, %c0_132] : memref<8x8x128xf32, #tpu.memory_space<vmem>>, vector<1x8x128xf32>
    %416 = vector.shape_cast %415 : vector<1x8x128xf32> to vector<8x128xf32>
    %417 = vector.shape_cast %382 : vector<8x128xf32> to vector<1x8x128xf32>
    tpu.vector_store %arg4[%c5_130, %c0_131, %c0_132], %417 {strides = array<i32>} : memref<8x8x128xf32, #tpu.memory_space<vmem>>, vector<1x8x128xf32>,
    %c2_133 = arith.constant 2 : index
    %c0_134 = arith.constant 0 : index
    %c0_135 = arith.constant 0 : index
    %418 = vector.load %arg5[%c2_133, %c0_134, %c0_135] : memref<8x8x128xf32, #tpu.memory_space<vmem>>, vector<1x8x128xf32>
    %419 = vector.shape_cast %418 : vector<1x8x128xf32> to vector<8x128xf32>
    %420 = vector.shape_cast %414 : vector<8x128xf32> to vector<1x8x128xf32>
    tpu.vector_store %arg5[%c2_133, %c0_134, %c0_135], %420 {strides = array<i32>} : memref<8x8x128xf32, #tpu.memory_space<vmem>>, vector<1x8x128xf32>,
    %c6_136 = arith.constant 6 : index
    %c0_137 = arith.constant 0 : index
    %c0_138 = arith.constant 0 : index
    %421 = vector.load %arg0[%c6_136, %c0_137, %c0_138] : memref<8x8x512xbf16, #tpu.memory_space<vmem>>, vector<1x8x512xbf16>
    %422 = vector.shape_cast %421 : vector<1x8x512xbf16> to vector<8x512xbf16>
    %c0_139 = arith.constant 0 : index
    %c0_140 = arith.constant 0 : index
    %423 = vector.load %arg2[%c0_139, %c0_140] : memref<128x512xbf16, #tpu.memory_space<vmem>>, vector<128x512xbf16>
    %424 = arith.extf %422 : vector<8x512xbf16> to vector<8x512xf32>
    %425 = arith.truncf %382 : vector<8x128xf32> to vector<8x128xbf16>
    %cst_141 = arith.constant dense<0.000000e+00> : vector<8x512xf32>
    %426 = tpu.matmul %425, %423, %cst_141 {dimension_numbers = #tpu.dot_dimension_numbers<[1], [0], [0], [1], [0, 0, 1, 1], [], []>} : vector<8x128xbf16>, vector<128x512xbf16>, vector<8x512xf32> -> vector<8x512xf32>
    %427 = arith.addf %424, %426 : vector<8x512xf32>
    %428 = vector.extract_strided_slice %427 {offsets = [0, 0], sizes = [8, 128], strides = [1, 1]} : vector<8x512xf32> to vector<8x128xf32>
    %429 = arith.negf %428 : vector<8x128xf32>
    %430 = math.exp %429 : vector<8x128xf32>
    %cst_142 = arith.constant 1.000000e+00 : f32
    %431 = vector.broadcast %cst_142 : f32 to vector<8x128xf32>
    %432 = arith.addf %431, %430 : vector<8x128xf32>
    %433 = arith.divf %431, %432 : vector<8x128xf32>
    %434 = vector.extract_strided_slice %427 {offsets = [0, 128], sizes = [8, 128], strides = [1, 1]} : vector<8x512xf32> to vector<8x128xf32>
    %435 = arith.negf %434 : vector<8x128xf32>
    %436 = math.exp %435 : vector<8x128xf32>
    %cst_143 = arith.constant 1.000000e+00 : f32
    %437 = vector.broadcast %cst_143 : f32 to vector<8x128xf32>
    %438 = arith.addf %437, %436 : vector<8x128xf32>
    %439 = arith.divf %437, %438 : vector<8x128xf32>
    %440 = vector.extract_strided_slice %427 {offsets = [0, 256], sizes = [8, 128], strides = [1, 1]} : vector<8x512xf32> to vector<8x128xf32>
    %441 = math.tanh %440 : vector<8x128xf32>
    %442 = vector.extract_strided_slice %427 {offsets = [0, 384], sizes = [8, 128], strides = [1, 1]} : vector<8x512xf32> to vector<8x128xf32>
    %443 = arith.negf %442 : vector<8x128xf32>
    %444 = math.exp %443 : vector<8x128xf32>
    %cst_144 = arith.constant 1.000000e+00 : f32
    %445 = vector.broadcast %cst_144 : f32 to vector<8x128xf32>
    %446 = arith.addf %445, %444 : vector<8x128xf32>
    %447 = arith.divf %445, %446 : vector<8x128xf32>
    %448 = arith.mulf %439, %380 : vector<8x128xf32>
    %449 = arith.mulf %433, %441 : vector<8x128xf32>
    %450 = arith.addf %448, %449 : vector<8x128xf32>
    %451 = math.tanh %450 : vector<8x128xf32>
    %452 = arith.mulf %447, %451 : vector<8x128xf32>
    %c1_145 = arith.constant 1 : index
    %c0_146 = arith.constant 0 : index
    %c0_147 = arith.constant 0 : index
    %453 = vector.load %arg1[%c1_145, %c0_146, %c0_147] : memref<8x8x512xbf16, #tpu.memory_space<vmem>>, vector<1x8x512xbf16>
    %454 = vector.shape_cast %453 : vector<1x8x512xbf16> to vector<8x512xbf16>
    %c0_148 = arith.constant 0 : index
    %c0_149 = arith.constant 0 : index
    %455 = vector.load %arg3[%c0_148, %c0_149] : memref<128x512xbf16, #tpu.memory_space<vmem>>, vector<128x512xbf16>
    %456 = arith.extf %454 : vector<8x512xbf16> to vector<8x512xf32>
    %457 = arith.truncf %414 : vector<8x128xf32> to vector<8x128xbf16>
    %cst_150 = arith.constant dense<0.000000e+00> : vector<8x512xf32>
    %458 = tpu.matmul %457, %455, %cst_150 {dimension_numbers = #tpu.dot_dimension_numbers<[1], [0], [0], [1], [0, 0, 1, 1], [], []>} : vector<8x128xbf16>, vector<128x512xbf16>, vector<8x512xf32> -> vector<8x512xf32>
    %459 = arith.addf %456, %458 : vector<8x512xf32>
    %460 = vector.extract_strided_slice %459 {offsets = [0, 0], sizes = [8, 128], strides = [1, 1]} : vector<8x512xf32> to vector<8x128xf32>
    %461 = arith.negf %460 : vector<8x128xf32>
    %462 = math.exp %461 : vector<8x128xf32>
    %cst_151 = arith.constant 1.000000e+00 : f32
    %463 = vector.broadcast %cst_151 : f32 to vector<8x128xf32>
    %464 = arith.addf %463, %462 : vector<8x128xf32>
    %465 = arith.divf %463, %464 : vector<8x128xf32>
    %466 = vector.extract_strided_slice %459 {offsets = [0, 128], sizes = [8, 128], strides = [1, 1]} : vector<8x512xf32> to vector<8x128xf32>
    %467 = arith.negf %466 : vector<8x128xf32>
    %468 = math.exp %467 : vector<8x128xf32>
    %cst_152 = arith.constant 1.000000e+00 : f32
    %469 = vector.broadcast %cst_152 : f32 to vector<8x128xf32>
    %470 = arith.addf %469, %468 : vector<8x128xf32>
    %471 = arith.divf %469, %470 : vector<8x128xf32>
    %472 = vector.extract_strided_slice %459 {offsets = [0, 256], sizes = [8, 128], strides = [1, 1]} : vector<8x512xf32> to vector<8x128xf32>
    %473 = math.tanh %472 : vector<8x128xf32>
    %474 = vector.extract_strided_slice %459 {offsets = [0, 384], sizes = [8, 128], strides = [1, 1]} : vector<8x512xf32> to vector<8x128xf32>
    %475 = arith.negf %474 : vector<8x128xf32>
    %476 = math.exp %475 : vector<8x128xf32>
    %cst_153 = arith.constant 1.000000e+00 : f32
    %477 = vector.broadcast %cst_153 : f32 to vector<8x128xf32>
    %478 = arith.addf %477, %476 : vector<8x128xf32>
    %479 = arith.divf %477, %478 : vector<8x128xf32>
    %480 = arith.mulf %471, %412 : vector<8x128xf32>
    %481 = arith.mulf %465, %473 : vector<8x128xf32>
    %482 = arith.addf %480, %481 : vector<8x128xf32>
    %483 = math.tanh %482 : vector<8x128xf32>
    %484 = arith.mulf %479, %483 : vector<8x128xf32>
    %c6_154 = arith.constant 6 : index
    %c0_155 = arith.constant 0 : index
    %c0_156 = arith.constant 0 : index
    %485 = vector.load %arg4[%c6_154, %c0_155, %c0_156] : memref<8x8x128xf32, #tpu.memory_space<vmem>>, vector<1x8x128xf32>
    %486 = vector.shape_cast %485 : vector<1x8x128xf32> to vector<8x128xf32>
    %487 = vector.shape_cast %452 : vector<8x128xf32> to vector<1x8x128xf32>
    tpu.vector_store %arg4[%c6_154, %c0_155, %c0_156], %487 {strides = array<i32>} : memref<8x8x128xf32, #tpu.memory_space<vmem>>, vector<1x8x128xf32>,
    %c1_157 = arith.constant 1 : index
    %c0_158 = arith.constant 0 : index
    %c0_159 = arith.constant 0 : index
    %488 = vector.load %arg5[%c1_157, %c0_158, %c0_159] : memref<8x8x128xf32, #tpu.memory_space<vmem>>, vector<1x8x128xf32>
    %489 = vector.shape_cast %488 : vector<1x8x128xf32> to vector<8x128xf32>
    %490 = vector.shape_cast %484 : vector<8x128xf32> to vector<1x8x128xf32>
    tpu.vector_store %arg5[%c1_157, %c0_158, %c0_159], %490 {strides = array<i32>} : memref<8x8x128xf32, #tpu.memory_space<vmem>>, vector<1x8x128xf32>,
    %c7_160 = arith.constant 7 : index
    %c0_161 = arith.constant 0 : index
    %c0_162 = arith.constant 0 : index
    %491 = vector.load %arg0[%c7_160, %c0_161, %c0_162] : memref<8x8x512xbf16, #tpu.memory_space<vmem>>, vector<1x8x512xbf16>
    %492 = vector.shape_cast %491 : vector<1x8x512xbf16> to vector<8x512xbf16>
    %c0_163 = arith.constant 0 : index
    %c0_164 = arith.constant 0 : index
    %493 = vector.load %arg2[%c0_163, %c0_164] : memref<128x512xbf16, #tpu.memory_space<vmem>>, vector<128x512xbf16>
    %494 = arith.extf %492 : vector<8x512xbf16> to vector<8x512xf32>
    %495 = arith.truncf %452 : vector<8x128xf32> to vector<8x128xbf16>
    %cst_165 = arith.constant dense<0.000000e+00> : vector<8x512xf32>
    %496 = tpu.matmul %495, %493, %cst_165 {dimension_numbers = #tpu.dot_dimension_numbers<[1], [0], [0], [1], [0, 0, 1, 1], [], []>} : vector<8x128xbf16>, vector<128x512xbf16>, vector<8x512xf32> -> vector<8x512xf32>
    %497 = arith.addf %494, %496 : vector<8x512xf32>
    %498 = vector.extract_strided_slice %497 {offsets = [0, 0], sizes = [8, 128], strides = [1, 1]} : vector<8x512xf32> to vector<8x128xf32>
    %499 = arith.negf %498 : vector<8x128xf32>
    %500 = math.exp %499 : vector<8x128xf32>
    %cst_166 = arith.constant 1.000000e+00 : f32
    %501 = vector.broadcast %cst_166 : f32 to vector<8x128xf32>
    %502 = arith.addf %501, %500 : vector<8x128xf32>
    %503 = arith.divf %501, %502 : vector<8x128xf32>
    %504 = vector.extract_strided_slice %497 {offsets = [0, 128], sizes = [8, 128], strides = [1, 1]} : vector<8x512xf32> to vector<8x128xf32>
    %505 = arith.negf %504 : vector<8x128xf32>
    %506 = math.exp %505 : vector<8x128xf32>
    %cst_167 = arith.constant 1.000000e+00 : f32
    %507 = vector.broadcast %cst_167 : f32 to vector<8x128xf32>
    %508 = arith.addf %507, %506 : vector<8x128xf32>
    %509 = arith.divf %507, %508 : vector<8x128xf32>
    %510 = vector.extract_strided_slice %497 {offsets = [0, 256], sizes = [8, 128], strides = [1, 1]} : vector<8x512xf32> to vector<8x128xf32>
    %511 = math.tanh %510 : vector<8x128xf32>
    %512 = vector.extract_strided_slice %497 {offsets = [0, 384], sizes = [8, 128], strides = [1, 1]} : vector<8x512xf32> to vector<8x128xf32>
    %513 = arith.negf %512 : vector<8x128xf32>
    %514 = math.exp %513 : vector<8x128xf32>
    %cst_168 = arith.constant 1.000000e+00 : f32
    %515 = vector.broadcast %cst_168 : f32 to vector<8x128xf32>
    %516 = arith.addf %515, %514 : vector<8x128xf32>
    %517 = arith.divf %515, %516 : vector<8x128xf32>
    %518 = arith.mulf %509, %450 : vector<8x128xf32>
    %519 = arith.mulf %503, %511 : vector<8x128xf32>
    %520 = arith.addf %518, %519 : vector<8x128xf32>
    %521 = math.tanh %520 : vector<8x128xf32>
    %522 = arith.mulf %517, %521 : vector<8x128xf32>
    %c0_169 = arith.constant 0 : index
    %c0_170 = arith.constant 0 : index
    %c0_171 = arith.constant 0 : index
    %523 = vector.load %arg1[%c0_169, %c0_170, %c0_171] : memref<8x8x512xbf16, #tpu.memory_space<vmem>>, vector<1x8x512xbf16>
    %524 = vector.shape_cast %523 : vector<1x8x512xbf16> to vector<8x512xbf16>
    %c0_172 = arith.constant 0 : index
    %c0_173 = arith.constant 0 : index
    %525 = vector.load %arg3[%c0_172, %c0_173] : memref<128x512xbf16, #tpu.memory_space<vmem>>, vector<128x512xbf16>
    %526 = arith.extf %524 : vector<8x512xbf16> to vector<8x512xf32>
    %527 = arith.truncf %484 : vector<8x128xf32> to vector<8x128xbf16>
    %cst_174 = arith.constant dense<0.000000e+00> : vector<8x512xf32>
    %528 = tpu.matmul %527, %525, %cst_174 {dimension_numbers = #tpu.dot_dimension_numbers<[1], [0], [0], [1], [0, 0, 1, 1], [], []>} : vector<8x128xbf16>, vector<128x512xbf16>, vector<8x512xf32> -> vector<8x512xf32>
    %529 = arith.addf %526, %528 : vector<8x512xf32>
    %530 = vector.extract_strided_slice %529 {offsets = [0, 0], sizes = [8, 128], strides = [1, 1]} : vector<8x512xf32> to vector<8x128xf32>
    %531 = arith.negf %530 : vector<8x128xf32>
    %532 = math.exp %531 : vector<8x128xf32>
    %cst_175 = arith.constant 1.000000e+00 : f32
    %533 = vector.broadcast %cst_175 : f32 to vector<8x128xf32>
    %534 = arith.addf %533, %532 : vector<8x128xf32>
    %535 = arith.divf %533, %534 : vector<8x128xf32>
    %536 = vector.extract_strided_slice %529 {offsets = [0, 128], sizes = [8, 128], strides = [1, 1]} : vector<8x512xf32> to vector<8x128xf32>
    %537 = arith.negf %536 : vector<8x128xf32>
    %538 = math.exp %537 : vector<8x128xf32>
    %cst_176 = arith.constant 1.000000e+00 : f32
    %539 = vector.broadcast %cst_176 : f32 to vector<8x128xf32>
    %540 = arith.addf %539, %538 : vector<8x128xf32>
    %541 = arith.divf %539, %540 : vector<8x128xf32>
    %542 = vector.extract_strided_slice %529 {offsets = [0, 256], sizes = [8, 128], strides = [1, 1]} : vector<8x512xf32> to vector<8x128xf32>
    %543 = math.tanh %542 : vector<8x128xf32>
    %544 = vector.extract_strided_slice %529 {offsets = [0, 384], sizes = [8, 128], strides = [1, 1]} : vector<8x512xf32> to vector<8x128xf32>
    %545 = arith.negf %544 : vector<8x128xf32>
    %546 = math.exp %545 : vector<8x128xf32>
    %cst_177 = arith.constant 1.000000e+00 : f32
    %547 = vector.broadcast %cst_177 : f32 to vector<8x128xf32>
    %548 = arith.addf %547, %546 : vector<8x128xf32>
    %549 = arith.divf %547, %548 : vector<8x128xf32>
    %550 = arith.mulf %541, %482 : vector<8x128xf32>
    %551 = arith.mulf %535, %543 : vector<8x128xf32>
    %552 = arith.addf %550, %551 : vector<8x128xf32>
    %553 = math.tanh %552 : vector<8x128xf32>
    %554 = arith.mulf %549, %553 : vector<8x128xf32>
    %c7_178 = arith.constant 7 : index
    %c0_179 = arith.constant 0 : index
    %c0_180 = arith.constant 0 : index
    %555 = vector.load %arg4[%c7_178, %c0_179, %c0_180] : memref<8x8x128xf32, #tpu.memory_space<vmem>>, vector<1x8x128xf32>
    %556 = vector.shape_cast %555 : vector<1x8x128xf32> to vector<8x128xf32>
    %557 = vector.shape_cast %522 : vector<8x128xf32> to vector<1x8x128xf32>
    tpu.vector_store %arg4[%c7_178, %c0_179, %c0_180], %557 {strides = array<i32>} : memref<8x8x128xf32, #tpu.memory_space<vmem>>, vector<1x8x128xf32>,
    %c0_181 = arith.constant 0 : index
    %c0_182 = arith.constant 0 : index
    %c0_183 = arith.constant 0 : index
    %558 = vector.load %arg5[%c0_181, %c0_182, %c0_183] : memref<8x8x128xf32, #tpu.memory_space<vmem>>, vector<1x8x128xf32>
    %559 = vector.shape_cast %558 : vector<1x8x128xf32> to vector<8x128xf32>
    %560 = vector.shape_cast %554 : vector<8x128xf32> to vector<1x8x128xf32>
    tpu.vector_store %arg5[%c0_181, %c0_182, %c0_183], %560 {strides = array<i32>} : memref<8x8x128xf32, #tpu.memory_space<vmem>>, vector<1x8x128xf32>,
    %c0_184 = arith.constant 0 : index
    %c0_185 = arith.constant 0 : index
    %c0_186 = arith.constant 0 : index
    %561 = vector.load %arg4[%c0_184, %c0_185, %c0_186] : memref<8x8x128xf32, #tpu.memory_space<vmem>>, vector<8x8x128xf32>
    %c0_187 = arith.constant 0 : index
    %c0_188 = arith.constant 0 : index
    %c0_189 = arith.constant 0 : index
    %562 = vector.load %arg5[%c0_187, %c0_188, %c0_189] : memref<8x8x128xf32, #tpu.memory_space<vmem>>, vector<8x8x128xf32>
    %563 = arith.addf %561, %562 : vector<8x8x128xf32>
    %cst_190 = arith.constant 5.000000e-01 : f32
    %564 = vector.broadcast %cst_190 : f32 to vector<8x8x128xf32>
    %565 = arith.mulf %564, %563 : vector<8x8x128xf32>
    %c0_191 = arith.constant 0 : index
    %c0_192 = arith.constant 0 : index
    %c0_193 = arith.constant 0 : index
    %566 = vector.load %arg4[%c0_191, %c0_192, %c0_193] : memref<8x8x128xf32, #tpu.memory_space<vmem>>, vector<8x8x128xf32>
    tpu.vector_store %arg4[%c0_191, %c0_192, %c0_193], %565 {strides = array<i32>} : memref<8x8x128xf32, #tpu.memory_space<vmem>>, vector<8x8x128xf32>,
    return
  }
}

</mosaic_0001>

<bundles_post_ra>
// kernel: sequence_encoder_forward.1
= control target key start
LH: loop header
LB: loop body
LE: loop exit
PB: predicated region body
PF: predicated region fallthrough
CT: control target
= control target key end

     0   :  { %v8359_v1 = vmov 0   ;;  %s8354_s2 = inlined_call_operand.vmem [shape: bf16[128,512], index: 2, kind: input, shape index: {}]   ;;  %s8355_s3 = inlined_call_operand.vmem [shape: bf16[128,512], index: 3, kind: input, shape index: {}]   ;;  %s8356_s0 = inlined_call_operand.vmem [shape: bf16[8,8,512], index: 0, kind: input, shape index: {}]   ;;  %s8357_s1 = inlined_call_operand.vmem [shape: bf16[8,8,512], index: 1, kind: input, shape index: {}]   ;;  %s8358_s4 = inlined_call_operand.vmem [shape: f32[8,8,128], index: 4, kind: output, shape index: {}]  }
   0x1   :  { %v6320_v0 = vld [vmem:[%s8354_s2 + $0x4] ss:$16 sps:$4 sm:$0xff]   ;;  %248 = vmatprep.mubr.bf16.mxu0 %v8359_v1  ;;  %289 = vmatprep.mubr.bf16.mxu1 %v8359_v1  ;;  %v6327_v2 = vld [vmem:[%s8354_s2] ss:$16 sps:$4 sm:$0xff]   ;;  %v6350_v6 = vld [vmem:[%s8354_s2 + $0xc] ss:$16 sps:$4 sm:$0xff]  }
   0x2   :  { %216 = vmatprep.subr.bf16.mxu0 %v6320_v0  ;;  %v6333_v3 = vld [vmem:[%s8354_s2 + $0x24] ss:$16 sps:$4 sm:$0xff]   ;;  %v6339_v4 = vld [vmem:[%s8354_s2 + $0x20] ss:$16 sps:$4 sm:$0xff]   ;;  %v6355_v7 = vld [vmem:[%s8354_s2 + $0x8] ss:$16 sps:$4 sm:$0xff]   ;;  %257 = vmatprep.subr.bf16.mxu1 %v6350_v6 }
   0x3   :  { %217 = vmatpush1.bf16.msra.mxu0 %v6327_v2  ;;  %v6345_v5 = vld [vmem:[%s8354_s2 + $0x44] ss:$16 sps:$4 sm:$0xff]   ;;  %v6361_v8 = vld [vmem:[%s8354_s2 + $0x40] ss:$16 sps:$4 sm:$0xff]   ;;  %258 = vmatpush1.bf16.msra.mxu1 %v6355_v7  ;;  %v6374_v10 = vld [vmem:[%s8354_s2 + $0x2c] ss:$16 sps:$4 sm:$0xff]  }
   0x4   :  { %218 = vmatprep.subr.bf16.mxu0 %v6333_v3  ;;  %v6368_v9 = vld [vmem:[%s8354_s2 + $0x64] ss:$16 sps:$4 sm:$0xff]   ;;  %v6379_v11 = vld [vmem:[%s8354_s2 + $0x28] ss:$16 sps:$4 sm:$0xff]   ;;  %259 = vmatprep.subr.bf16.mxu1 %v6374_v10  ;;  %v6386_v12 = vld [vmem:[%s8354_s2 + $0x60] ss:$16 sps:$4 sm:$0xff]  }
   0x5   :  { %v6391_v13 = vld [vmem:[%s8354_s2 + $0x84] ss:$16 sps:$4 sm:$0xff]   ;;  %v6396_v14 = vld [vmem:[%s8354_s2 + $0x4c] ss:$16 sps:$4 sm:$0xff]   ;;  %v6403_v15 = vld [vmem:[%s8354_s2 + $0x48] ss:$16 sps:$4 sm:$0xff]  }
   0x6   :  { %v6409_v16 = vld [vmem:[%s8354_s2 + $0x6c] ss:$16 sps:$4 sm:$0xff]   ;;  %v6415_v17 = vld [vmem:[%s8354_s2 + $0x80] ss:$16 sps:$4 sm:$0xff]   ;;  %v6421_v18 = vld [vmem:[%s8354_s2 + $0xa4] ss:$16 sps:$4 sm:$0xff]  }
   0x7   :  { %219 = vmatpush1.bf16.msra.mxu0 %v6339_v4  ;;  %260 = vmatpush1.bf16.msra.mxu1 %v6379_v11  ;;  %v6427_v19 = vld [vmem:[%s8354_s2 + $0x68] ss:$16 sps:$4 sm:$0xff]   ;;  %v6433_v20 = vld [vmem:[%s8354_s2 + $0x8c] ss:$16 sps:$4 sm:$0xff]   ;;  %v6439_v21 = vld [vmem:[%s8354_s2 + $0xa0] ss:$16 sps:$4 sm:$0xff]  }
   0x8   :  { %220 = vmatprep.subr.bf16.mxu0 %v6345_v5  ;;  %261 = vmatprep.subr.bf16.mxu1 %v6396_v14  ;;  %v6444_v22 = vld [vmem:[%s8354_s2 + $0xc4] ss:$16 sps:$4 sm:$0xff]   ;;  %v6451_v23 = vld [vmem:[%s8354_s2 + $0x88] ss:$16 sps:$4 sm:$0xff]   ;;  %v6457_v24 = vld [vmem:[%s8354_s2 + $0xac] ss:$16 sps:$4 sm:$0xff]  }
   0x9   :  { %v6463_v25 = vld [vmem:[%s8354_s2 + $0xc0] ss:$16 sps:$4 sm:$0xff]   ;;  %v6469_v26 = vld [vmem:[%s8354_s2 + $0xe4] ss:$16 sps:$4 sm:$0xff]   ;;  %v6475_v27 = vld [vmem:[%s8354_s2 + $0xa8] ss:$16 sps:$4 sm:$0xff]  }
   0xa   :  { %v6481_v28 = vld [vmem:[%s8354_s2 + $0xcc] ss:$16 sps:$4 sm:$0xff]   ;;  %v6487_v29 = vld [vmem:[%s8354_s2 + $0xe0] ss:$16 sps:$4 sm:$0xff]   ;;  %v6492_v30 = vld [vmem:[%s8355_s3 + $0x4] ss:$16 sps:$4 sm:$0xff]  }
   0xb   :  { %221 = vmatpush1.bf16.msra.mxu0 %v6361_v8  ;;  %262 = vmatpush1.bf16.msra.mxu1 %v6403_v15  ;;  %v6499_v31 = vld [vmem:[%s8354_s2 + $0xc8] ss:$16 sps:$4 sm:$0xff]   ;;  %v6505_v32 = vld [vmem:[%s8354_s2 + $0xec] ss:$16 sps:$4 sm:$0xff]   ;;  %v6511_v33 = vld [vmem:[%s8355_s3] ss:$16 sps:$4 sm:$0xff]  }
   0xc   :  { %222 = vmatprep.subr.bf16.mxu0 %v6368_v9  ;;  %263 = vmatprep.subr.bf16.mxu1 %v6409_v16  ;;  %v6516_v34 = vld [vmem:[%s8355_s3 + $0x24] ss:$16 sps:$4 sm:$0xff]   ;;  %v6523_v35 = vld [vmem:[%s8354_s2 + $0xe8] ss:$16 sps:$4 sm:$0xff]   ;;  %v6529_v36 = vld [vmem:[%s8355_s3 + $0xc] ss:$16 sps:$4 sm:$0xff]  }
   0xd   :  { %v6536_v37 = vld [vmem:[%s8355_s3 + $0x20] ss:$16 sps:$4 sm:$0xff]   ;;  %v6541_v38 = vld [vmem:[%s8355_s3 + $0x44] ss:$16 sps:$4 sm:$0xff]   ;;  %v6549_v39 = vld [vmem:[%s8355_s3 + $0x8] ss:$16 sps:$4 sm:$0xff]  }
   0xe   :  { %v6555_v40 = vld [vmem:[%s8355_s3 + $0x2c] ss:$16 sps:$4 sm:$0xff]   ;;  %v6561_v41 = vld [vmem:[%s8355_s3 + $0x40] ss:$16 sps:$4 sm:$0xff]   ;;  %v6566_v42 = vld [vmem:[%s8355_s3 + $0x64] ss:$16 sps:$4 sm:$0xff]  }
   0xf   :  { %223 = vmatpush1.bf16.msra.mxu0 %v6386_v12  ;;  %264 = vmatpush1.bf16.msra.mxu1 %v6427_v19  ;;  %v6574_v43 = vld [vmem:[%s8355_s3 + $0x28] ss:$16 sps:$4 sm:$0xff]   ;;  %v6580_v44 = vld [vmem:[%s8355_s3 + $0x4c] ss:$16 sps:$4 sm:$0xff]   ;;  %v6586_v45 = vld [vmem:[%s8355_s3 + $0x60] ss:$16 sps:$4 sm:$0xff]  }
  0x10   :  { %224 = vmatprep.subr.bf16.mxu0 %v6391_v13  ;;  %265 = vmatprep.subr.bf16.mxu1 %v6433_v20  ;;  %v6591_v46 = vld [vmem:[%s8355_s3 + $0x84] ss:$16 sps:$4 sm:$0xff]   ;;  %v6596_v47 = vld [vmem:[%s8355_s3 + $0x48] ss:$16 sps:$4 sm:$0xff]   ;;  %v6602_v48 = vld [vmem:[%s8355_s3 + $0x6c] ss:$16 sps:$4 sm:$0xff]  }
  0x11   :  { %v6609_v49 = vld [vmem:[%s8355_s3 + $0x80] ss:$16 sps:$4 sm:$0xff]   ;;  %v6615_v50 = vld [vmem:[%s8355_s3 + $0xa4] ss:$16 sps:$4 sm:$0xff]   ;;  %v6620_v51 = vld [vmem:[%s8355_s3 + $0x68] ss:$16 sps:$4 sm:$0xff]  }
  0x12   :  { %v6626_v52 = vld [vmem:[%s8355_s3 + $0x8c] ss:$16 sps:$4 sm:$0xff]   ;;  %v6633_v53 = vld [vmem:[%s8355_s3 + $0xa0] ss:$16 sps:$4 sm:$0xff]   ;;  %v6639_v54 = vld [vmem:[%s8355_s3 + $0xc4] ss:$16 sps:$4 sm:$0xff]  }
  0x13   :  { %225 = vmatpush1.bf16.msra.mxu0 %v6415_v17  ;;  %266 = vmatpush1.bf16.msra.mxu1 %v6451_v23  ;;  %v6644_v55 = vld [vmem:[%s8355_s3 + $0x88] ss:$16 sps:$4 sm:$0xff]   ;;  %v6650_v56 = vld [vmem:[%s8355_s3 + $0xac] ss:$16 sps:$4 sm:$0xff]   ;;  %v6657_v57 = vld [vmem:[%s8355_s3 + $0xc0] ss:$16 sps:$4 sm:$0xff]  }
  0x14   :  { %226 = vmatprep.subr.bf16.mxu0 %v6421_v18  ;;  %267 = vmatprep.subr.bf16.mxu1 %v6457_v24  ;;  %8369 = vst [vmem:[#allocation3_spill] sm:$0xff] %v6657_v57  ;;  %v6663_v58 = vld [vmem:[%s8355_s3 + $0xe4] ss:$16 sps:$4 sm:$0xff]   ;;  %v6668_v59 = vld [vmem:[%s8355_s3 + $0xa8] ss:$16 sps:$4 sm:$0xff]  }
  0x15   :  { %v6674_v60 = vld [vmem:[%s8355_s3 + $0xcc] ss:$16 sps:$4 sm:$0xff]   ;;  %v6681_v61 = vld [vmem:[%s8355_s3 + $0xe0] ss:$16 sps:$4 sm:$0xff]   ;;  %v6687_v62 = vld [vmem:[%s8355_s3 + $0xc8] ss:$16 sps:$4 sm:$0xff]  }
  0x16   :  { %v6693_v63 = vld [vmem:[%s8355_s3 + $0xec] ss:$16 sps:$4 sm:$0xff]  }
  0x17   :  { %227 = vmatpush1.bf16.msra.mxu0 %v6439_v21  ;;  %268 = vmatpush1.bf16.msra.mxu1 %v6475_v27 }
  0x18   :  { %228 = vmatprep.subr.bf16.mxu0 %v6444_v22  ;;  %269 = vmatprep.subr.bf16.mxu1 %v6481_v28 }
  0x1b   :  { %229 = vmatpush1.bf16.msra.mxu0 %v6463_v25  ;;  %270 = vmatpush1.bf16.msra.mxu1 %v6499_v31 }
  0x1c   :  { %230 = vmatprep.subr.bf16.mxu0 %v6469_v26  ;;  %271 = vmatprep.subr.bf16.mxu1 %v6505_v32 }
  0x1f   :  { %231 = vmatpush1.bf16.msra.mxu0 %v6487_v29  ;;  %272 = vmatpush1.bf16.msra.mxu1 %v6523_v35 }
  0x20   :  { %525 = vmatprep.subr.bf16.mxu0 %v6492_v30  ;;  %566 = vmatprep.subr.bf16.mxu1 %v6529_v36 }
  0x22   :  { %249 = vmatmul.mubr.bf16.vlgmr.msra.gmra.mrb[0].mxu0 %v8359_v1  ;;  %290 = vmatmul.mubr.bf16.vlgmr.msra.gmra.mrb[0].mxu1 %v8359_v1 }
  0x23   :  { %526 = vmatpush1.bf16.msra.mxu0 %v6511_v33  ;;  %557 = vmatprep.mubr.bf16.mxu0 %v8359_v1 }
  0x24   :  { %527 = vmatprep.subr.bf16.mxu0 %v6516_v34  ;;  %567 = vmatpush1.bf16.msra.mxu1 %v6549_v39 }
  0x25   :  { %568 = vmatprep.subr.bf16.mxu1 %v6555_v40  ;;  %598 = vmatprep.mubr.bf16.mxu1 %v8359_v1  ;;  %v6701_v1 = vld [vmem:[%s8355_s3 + $0xe8] ss:$16 sps:$4 sm:$0xff]  }
  0x27   :  { %528 = vmatpush1.bf16.msra.mxu0 %v6536_v37 }
  0x28   :  { %529 = vmatprep.subr.bf16.mxu0 %v6541_v38  ;;  %569 = vmatpush1.bf16.msra.mxu1 %v6574_v43 }
  0x29   :  { %570 = vmatprep.subr.bf16.mxu1 %v6580_v44 }
  0x2b   :  { %530 = vmatpush1.bf16.msra.mxu0 %v6561_v41 }
  0x2c   :  { %531 = vmatprep.subr.bf16.mxu0 %v6566_v42  ;;  %571 = vmatpush1.bf16.msra.mxu1 %v6596_v47 }
  0x2d   :  { %572 = vmatprep.subr.bf16.mxu1 %v6602_v48 }
  0x2f   :  { %532 = vmatpush1.bf16.msra.mxu0 %v6586_v45 }
  0x30   :  { %533 = vmatprep.subr.bf16.mxu0 %v6591_v46  ;;  %573 = vmatpush1.bf16.msra.mxu1 %v6620_v51 }
  0x31   :  { %574 = vmatprep.subr.bf16.mxu1 %v6626_v52 }
  0x33   :  { %534 = vmatpush1.bf16.msra.mxu0 %v6609_v49 }
  0x34   :  { %535 = vmatprep.subr.bf16.mxu0 %v6615_v50  ;;  %575 = vmatpush1.bf16.msra.mxu1 %v6644_v55 }
  0x35   :  { %576 = vmatprep.subr.bf16.mxu1 %v6650_v56 }
  0x37   :  { %536 = vmatpush1.bf16.msra.mxu0 %v6633_v53 }
  0x38   :  { %537 = vmatprep.subr.bf16.mxu0 %v6639_v54  ;;  %577 = vmatpush1.bf16.msra.mxu1 %v6668_v59 }
  0x39   :  { %578 = vmatprep.subr.bf16.mxu1 %v6674_v60 }
  0x3b   :  { %538 = vmatpush1.bf16.msra.mxu0 %v6657_v57  ;;  %v8370_v57 = vmov 0  }
  0x3c   :  { %539 = vmatprep.subr.bf16.mxu0 %v6663_v58  ;;  %579 = vmatpush1.bf16.msra.mxu1 %v6687_v62 }
  0x3d   :  { %580 = vmatprep.subr.bf16.mxu1 %v6693_v63 }
  0x3f   :  { %540 = vmatpush1.bf16.msra.mxu0 %v6681_v61 }
  0x40   :  { %838 = vmatprep.subr.bf16.mxu0 %v6320_v0  ;;  %581 = vmatpush1.bf16.msra.mxu1 %v6701_v1  ;;  %v18_v0 = vld [vmem:[%s8356_s0] sm:$0xff] }
  0x41   :  { %879 = vmatprep.subr.bf16.mxu1 %v6350_v6 }
  0x42   :  { %558 = vmatmul.mubr.bf16.vlgmr.msra.gmra.mrb[4].mxu0 %v8370_v57 }
  0x43   :  { %839 = vmatpush1.bf16.msra.mxu0 %v6327_v2  ;;  %870 = vmatprep.mubr.bf16.mxu0 %v8370_v57  ;;  %v52_v2 = vunpack.c.l.bf16 %v18_v0 }
  0x44   :  { %840 = vmatprep.subr.bf16.mxu0 %v6333_v3  ;;  %599 = vmatmul.mubr.bf16.vlgmr.msra.gmra.mrb[4].mxu1 %v8370_v57  ;;  %v53_v3 = vunpack.c.h.bf16 %v18_v0 }
  0x45   :  { %880 = vmatpush1.bf16.msra.mxu1 %v6355_v7  ;;  %911 = vmatprep.mubr.bf16.mxu1 %v8370_v57 }
  0x46   :  { %881 = vmatprep.subr.bf16.mxu1 %v6374_v10 }
  0x47   :  { %841 = vmatpush1.bf16.msra.mxu0 %v6339_v4 }
  0x48   :  { %842 = vmatprep.subr.bf16.mxu0 %v6345_v5  ;;  %v19_v5 = vld [vmem:[%s8356_s0 + $0x8] sm:$0xff] }
  0x49   :  { %882 = vmatpush1.bf16.msra.mxu1 %v6379_v11 }
  0x4a   :  { %883 = vmatprep.subr.bf16.mxu1 %v6396_v14 }
  0x4b   :  { %843 = vmatpush1.bf16.msra.mxu0 %v6361_v8 }
  0x4c   :  { %844 = vmatprep.subr.bf16.mxu0 %v6368_v9 }
  0x4d   :  { %884 = vmatpush1.bf16.msra.mxu1 %v6403_v15 }
  0x4e   :  { %885 = vmatprep.subr.bf16.mxu1 %v6409_v16 }
  0x4f   :  { %845 = vmatpush1.bf16.msra.mxu0 %v6386_v12  ;;  %v55_v12 = vunpack.c.h.bf16 %v19_v5 }
  0x50   :  { %846 = vmatprep.subr.bf16.mxu0 %v6391_v13 }
  0x51   :  { %886 = vmatpush1.bf16.msra.mxu1 %v6427_v19 }
  0x52   :  { %887 = vmatprep.subr.bf16.mxu1 %v6433_v20 }
  0x53   :  { %847 = vmatpush1.bf16.msra.mxu0 %v6415_v17 }
  0x54   :  { %848 = vmatprep.subr.bf16.mxu0 %v6421_v18  ;;  %v54_v18 = vunpack.c.l.bf16 %v19_v5  ;;  %v5084_v5 = vld [vmem:[%s8357_s1 + $0x78] sm:$0xff] }
  0x55   :  { %888 = vmatpush1.bf16.msra.mxu1 %v6451_v23 }
  0x56   :  { %889 = vmatprep.subr.bf16.mxu1 %v6457_v24 }
  0x57   :  { %849 = vmatpush1.bf16.msra.mxu0 %v6439_v21 }
  0x58   :  { %850 = vmatprep.subr.bf16.mxu0 %v6444_v22 }
  0x59   :  { %890 = vmatpush1.bf16.msra.mxu1 %v6475_v27 }
  0x5a   :  { %891 = vmatprep.subr.bf16.mxu1 %v6481_v28 }
  0x5b   :  { %851 = vmatpush1.bf16.msra.mxu0 %v6463_v25 }
  0x5c   :  { %852 = vmatprep.subr.bf16.mxu0 %v6469_v26 }
  0x5d   :  { %892 = vmatpush1.bf16.msra.mxu1 %v6499_v31 }
  0x5e   :  { %893 = vmatprep.subr.bf16.mxu1 %v6505_v32 }
  0x5f   :  { %853 = vmatpush1.bf16.msra.mxu0 %v6487_v29  ;;  %v5083_v29 = vld [vmem:[%s8357_s1 + $0x70] sm:$0xff] }
  0x60   :  { %1148 = vmatprep.subr.bf16.mxu0 %v6492_v30 }
  0x61   :  { %894 = vmatpush1.bf16.msra.mxu1 %v6523_v35 }
  0x62   :  { %1189 = vmatprep.subr.bf16.mxu1 %v6529_v36  ;;  %v361_v36 = vunpack.c.l.bf16 %v5083_v29 }
  0xf5   :  { %v250_v4 = vpop.f32.mrb[0].mxu0  ;;  %v291_v14 = vpop.f32.mrb[0].mxu1 }
  0xf6   :  { %v298_v6 = vadd.f32 %v250_v4, %v52_v2  ;;  %v252_v7 = vpop.f32.mrb[1].mxu0  ;;  %v293_v15 = vpop.f32.mrb[1].mxu1  ;;  %v300_v22 = vadd.f32 %v291_v14, %v54_v18  ;;  %v362_v2 = vunpack.c.h.bf16 %v5083_v29  ;;  %v363_v18 = vunpack.c.l.bf16 %v5084_v5 }
  0xf7   :  { %v299_v8 = vadd.f32 %v252_v7, %v53_v3  ;;  %v254_v9 = vpop.f32.mrb[2].mxu0  ;;  %v301_v16 = vadd.f32 %v293_v15, %v55_v12  ;;  %v295_v17 = vpop.f32.mrb[2].mxu1  ;;  %v364_v12 = vunpack.c.h.bf16 %v5084_v5  ;;  %v6930_v5 = vld [vmem:[%s8354_s2 + $0xcc] ss:$16 sps:$4 sm:$0xff]  }
  0xf8   :  { %v5080_v10 = vmul.f32 -1.442695, %v298_v6  ;;  %v255_v11 = vpop.f32.mrb[3].mxu0  ;;  %v296_v20 = vpop.f32.mrb[3].mxu1 }
  0xf9   :  { %v5081_v13 = vmul.f32 -1.442695, %v299_v8  ;;  %v5082_v21 = vmul.f32 -1.442695, %v301_v16 }
  0xfa   :  { %6028 = vpow2.f32 %v5080_v10 }
  0xfb   :  { %6030 = vpow2.f32 %v5081_v13 }
  0xfc   :  { %6032 = vpow2.f32 %v5082_v21 }
  0xfd   :  { %6034 = vtanh.f32 %v300_v22 }
 0x104   :  { %v6029_v23 = vpop.eup %6028 }
 0x105   :  { %v6031_v24 = vpop.eup %6030  ;;  %v305_v25 = vadd.f32 1.0, %v6029_v23 }
 0x106   :  { %v311_v26 = vadd.f32 1.0, %v6031_v24  ;;  %v6033_v27 = vpop.eup %6032 }
 0x107   :  { %6036 = vrcp.f32 %v305_v25  ;;  %v6035_v28 = vpop.eup %6034  ;;  %v318_v31 = vadd.f32 1.0, %v6033_v27 }
 0x108   :  { %6038 = vrcp.f32 %v311_v26 }
 0x109   :  { %6040 = vrcp.f32 %v318_v31 }
 0x111   :  { %v6037_v30 = vpop.eup %6036 }
 0x112   :  { %v6039_v32 = vpop.eup %6038  ;;  %v322_v35 = vmul.f32 %v6037_v30, %v6035_v28 }
 0x113   :  { %v321_v0 = vmul.f32 0.0, %v6039_v32  ;;  %v6041_v21 = vpop.eup %6040 }
 0x115   :  { %v6754_v3 = vadd.f32 %v322_v35, %v321_v0  ;;  %v559_v4 = vpop.f32.mrb[4].mxu0  ;;  %v6901_v35 = vld [vmem:[%s8354_s2 + $0xa4] ss:$16 sps:$4 sm:$0xff]   ;;  %v6911_v0 = vld [vmem:[%s8354_s2 + $0xa0] ss:$16 sps:$4 sm:$0xff]  }
 0x116   :  { %v607_v6 = vadd.f32 %v559_v4, %v361_v36  ;;  %v561_v7 = vpop.f32.mrb[5].mxu0  ;;  %v6906_v36 = vld [vmem:[%s8354_s2 + $0xac] ss:$16 sps:$4 sm:$0xff]   ;;  %v6925_v4 = vld [vmem:[%s8354_s2 + $0xc4] ss:$16 sps:$4 sm:$0xff]  }
 0x117   :  { %6042 = vtanh.f32 %v6754_v3  ;;  %v608_v8 = vadd.f32 %v561_v7, %v362_v2  ;;  %v563_v9 = vpop.f32.mrb[6].mxu0  ;;  %v600_v14 = vpop.f32.mrb[4].mxu1  ;;  %v6916_v2 = vld [vmem:[%s8354_s2 + $0xa8] ss:$16 sps:$4 sm:$0xff]  }
 0x118   :  { %v5117_v10 = vmul.f32 -1.442695, %v607_v6  ;;  %v564_v11 = vpop.f32.mrb[7].mxu0  ;;  %v602_v15 = vpop.f32.mrb[5].mxu1  ;;  %v609_v24 = vadd.f32 %v600_v14, %v363_v18  ;;  %v6935_v6 = vld [vmem:[%s8354_s2 + $0xc0] ss:$16 sps:$4 sm:$0xff]  }
 0x119   :  { %v5118_v13 = vmul.f32 -1.442695, %v608_v8  ;;  %v610_v16 = vadd.f32 %v602_v15, %v364_v12  ;;  %v604_v17 = vpop.f32.mrb[6].mxu1  ;;  %v6940_v7 = vld [vmem:[%s8354_s2 + $0xc8] ss:$16 sps:$4 sm:$0xff]   ;;  %v5120_v14 = vld [vmem:[%s8356_s0 + $0x10] sm:$0xff] }
 0x11a   :  { %6044 = vpow2.f32 %v5117_v10  ;;  %v605_v20 = vpop.f32.mrb[7].mxu1  ;;  %v6949_v8 = vld [vmem:[%s8354_s2 + $0xe4] ss:$16 sps:$4 sm:$0xff]   ;;  %v6954_v9 = vld [vmem:[%s8354_s2 + $0xec] ss:$16 sps:$4 sm:$0xff]   ;;  %v673_v15 = vunpack.c.l.bf16 %v5120_v14 }
 0x11b   :  { %6046 = vpow2.f32 %v5118_v13  ;;  %v5119_v22 = vmul.f32 -1.442695, %v610_v16  ;;  %v6959_v10 = vld [vmem:[%s8354_s2 + $0xe0] ss:$16 sps:$4 sm:$0xff]   ;;  %v6964_v11 = vld [vmem:[%s8354_s2 + $0xe8] ss:$16 sps:$4 sm:$0xff]   ;;  %v674_v16 = vunpack.c.h.bf16 %v5120_v14 }
 0x11c   :  { %v6973_v12 = vld [vmem:[%s8355_s3 + $0x4] ss:$16 sps:$4 sm:$0xff]   ;;  %v6978_v13 = vld [vmem:[%s8355_s3 + $0xc] ss:$16 sps:$4 sm:$0xff]  }
 0x11d   :  { %6048 = vpow2.f32 %v5119_v22 }
 0x11e   :  { %6050 = vtanh.f32 %v609_v24 }
 0x121   :  { %v6043_v23 = vpop.eup %6042 }
 0x122   :  { %v325_v25 = vmul.f32 %v6043_v23, %v6041_v21  ;;  %v5121_v21 = vld [vmem:[%s8356_s0 + $0x18] sm:$0xff] }
 0x124   :  { %v6045_v26 = vpop.eup %6044  ;;  %635 = vst [vmem:[%s8358_s4] sm:$0xff] %v325_v25  ;;  %v677_v27 = vpack.c.bf16 %v325_v25, %v325_v25 }
 0x125   :  { %v6047_v28 = vpop.eup %6046  ;;  %v614_v29 = vadd.f32 1.0, %v6045_v26 }
 0x126   :  { %v620_v30 = vadd.f32 1.0, %v6047_v28  ;;  %871 = vmatmul.mubr.bf16.vlgmr.msra.gmra.mrb[8].mxu0 %v677_v27  ;;  %912 = vmatmul.mubr.bf16.vlgmr.msra.gmra.mrb[8].mxu1 %v677_v27 }
 0x127   :  { %6052 = vrcp.f32 %v614_v29  ;;  %1149 = vmatpush1.bf16.msra.mxu0 %v6511_v33  ;;  %1190 = vmatpush1.bf16.msra.mxu1 %v6549_v39  ;;  %v6049_v33 = vpop.eup %6048 }
 0x128   :  { %6054 = vrcp.f32 %v620_v30  ;;  %1150 = vmatprep.subr.bf16.mxu0 %v6516_v34  ;;  %1191 = vmatprep.subr.bf16.mxu1 %v6555_v40  ;;  %v6051_v31 = vpop.eup %6050  ;;  %v627_v39 = vadd.f32 1.0, %v6049_v33  ;;  %v676_v33 = vunpack.c.h.bf16 %v5121_v21 }
 0x129   :  { %1180 = vmatprep.mubr.bf16.mxu0 %v8370_v57  ;;  %1221 = vmatprep.mubr.bf16.mxu1 %v8370_v57 }
 0x12a   :  { %6056 = vrcp.f32 %v627_v39 }
 0x12b   :  { %1151 = vmatpush1.bf16.msra.mxu0 %v6536_v37  ;;  %1192 = vmatpush1.bf16.msra.mxu1 %v6574_v43 }
 0x12c   :  { %1152 = vmatprep.subr.bf16.mxu0 %v6541_v38  ;;  %1193 = vmatprep.subr.bf16.mxu1 %v6580_v44 }
 0x12f   :  { %1153 = vmatpush1.bf16.msra.mxu0 %v6561_v41  ;;  %1194 = vmatpush1.bf16.msra.mxu1 %v6596_v47  ;;  %v6285_v47 = vld [vmem:[%s8354_s2 + $0x8] ss:$16 sps:$4 sm:$0xff]  }
 0x130   :  { %1154 = vmatprep.subr.bf16.mxu0 %v6566_v42  ;;  %1195 = vmatprep.subr.bf16.mxu1 %v6602_v48  ;;  %v8371_v42 = vld [vmem:[#allocation3_spill] sm:$0xff]  ;;  %v6287_v48 = vld [vmem:[%s8354_s2 + $0x28] ss:$16 sps:$4 sm:$0xff]  }
 0x131   :  { %v6053_v34 = vpop.eup %6052 }
 0x132   :  { %v6055_v40 = vpop.eup %6054  ;;  %v631_v37 = vmul.f32 %v6053_v34, %v6051_v31  ;;  %v675_v34 = vunpack.c.l.bf16 %v5121_v21 }
 0x133   :  { %v630_v32 = vmul.f32 0.0, %v6055_v40  ;;  %1155 = vmatpush1.bf16.msra.mxu0 %v6586_v45  ;;  %1196 = vmatpush1.bf16.msra.mxu1 %v6620_v51  ;;  %v6290_v51 = vld [vmem:[%s8354_s2 + $0x6c] ss:$16 sps:$4 sm:$0xff]  }
 0x134   :  { %1156 = vmatprep.subr.bf16.mxu0 %v6591_v46  ;;  %1197 = vmatprep.subr.bf16.mxu1 %v6626_v52  ;;  %v6057_v41 = vpop.eup %6056  ;;  %v6284_v46 = vld [vmem:[%s8354_s2 + $0xc] ss:$16 sps:$4 sm:$0xff]   ;;  %v6829_v52 = vld [vmem:[%s8354_s2 + $0x4] ss:$16 sps:$4 sm:$0xff]  }
 0x135   :  { %v6781_v38 = vadd.f32 %v631_v37, %v630_v32 }
 0x137   :  { %6058 = vtanh.f32 %v6781_v38  ;;  %1157 = vmatpush1.bf16.msra.mxu0 %v6609_v49  ;;  %1198 = vmatpush1.bf16.msra.mxu1 %v6644_v55  ;;  %v6288_v49 = vld [vmem:[%s8354_s2 + $0x4c] ss:$16 sps:$4 sm:$0xff]   ;;  %v6853_v55 = vld [vmem:[%s8354_s2 + $0x44] ss:$16 sps:$4 sm:$0xff]  }
 0x138   :  { %1158 = vmatprep.subr.bf16.mxu0 %v6615_v50  ;;  %1199 = vmatprep.subr.bf16.mxu1 %v6650_v56  ;;  %v6289_v50 = vld [vmem:[%s8354_s2 + $0x48] ss:$16 sps:$4 sm:$0xff]   ;;  %v6858_v56 = vld [vmem:[%s8354_s2 + $0x40] ss:$16 sps:$4 sm:$0xff]  }
 0x13b   :  { %1159 = vmatpush1.bf16.msra.mxu0 %v6633_v53  ;;  %1200 = vmatpush1.bf16.msra.mxu1 %v6668_v59  ;;  %v6834_v53 = vld [vmem:[%s8354_s2] ss:$16 sps:$4 sm:$0xff]  }
 0x13c   :  { %1160 = vmatprep.subr.bf16.mxu0 %v6639_v54  ;;  %1201 = vmatprep.subr.bf16.mxu1 %v6674_v60  ;;  %v6841_v54 = vld [vmem:[%s8354_s2 + $0x24] ss:$16 sps:$4 sm:$0xff]   ;;  %v6870_v59 = vld [vmem:[%s8354_s2 + $0x60] ss:$16 sps:$4 sm:$0xff]  }
 0x13d   :  { %v6877_v60 = vld [vmem:[%s8354_s2 + $0x84] ss:$16 sps:$4 sm:$0xff]  }
 0x13f   :  { %1161 = vmatpush1.bf16.msra.mxu0 %v8371_v42  ;;  %1202 = vmatpush1.bf16.msra.mxu1 %v6687_v62  ;;  %v6887_v62 = vld [vmem:[%s8354_s2 + $0x80] ss:$16 sps:$4 sm:$0xff]  }
 0x140   :  { %1162 = vmatprep.subr.bf16.mxu0 %v6663_v58  ;;  %1203 = vmatprep.subr.bf16.mxu1 %v6693_v63  ;;  %v6865_v58 = vld [vmem:[%s8354_s2 + $0x64] ss:$16 sps:$4 sm:$0xff]   ;;  %v6892_v63 = vld [vmem:[%s8354_s2 + $0x88] ss:$16 sps:$4 sm:$0xff]  }
 0x141   :  { %v6059_v43 = vpop.eup %6058 }
 0x142   :  { %v6796_v44 = vmul.f32 %v6059_v43, %v6057_v41 }
 0x143   :  { %1163 = vmatpush1.bf16.msra.mxu0 %v6681_v61  ;;  %1204 = vmatpush1.bf16.msra.mxu1 %v6701_v1  ;;  %v6286_v1 = vld [vmem:[%s8354_s2 + $0x2c] ss:$16 sps:$4 sm:$0xff]  }
 0x144   :  { %8372 = vst [vmem:[#allocation3_spill] sm:$0xff] %v6796_v44  ;;  %v987_v45 = vpack.c.bf16 %v6796_v44, %v6796_v44  ;;  %1503 = vmatprep.subr.bf16.mxu1 %v6284_v46  ;;  %1462 = vmatprep.subr.bf16.mxu0 %v6829_v52  ;;  %v6882_v61 = vld [vmem:[%s8354_s2 + $0x8c] ss:$16 sps:$4 sm:$0xff]  }
 0x146   :  { %1181 = vmatmul.mubr.bf16.vlgmr.msra.gmra.mrb[12].mxu0 %v987_v45  ;;  %1222 = vmatmul.mubr.bf16.vlgmr.msra.gmra.mrb[12].mxu1 %v987_v45  ;;  %v5157_v45 = vld [vmem:[%s8357_s1 + $0x60] sm:$0xff] }
 0x147   :  { %1504 = vmatpush1.bf16.msra.mxu1 %v6285_v47  ;;  %1494 = vmatprep.mubr.bf16.mxu0 %v8370_v57  ;;  %v984_v14 = vunpack.c.h.bf16 %v5157_v45 }
 0x148   :  { %1505 = vmatprep.subr.bf16.mxu1 %v6286_v1  ;;  %1535 = vmatprep.mubr.bf16.mxu1 %v8370_v57 }
 0x149   :  { %1463 = vmatpush1.bf16.msra.mxu0 %v6834_v53 }
 0x14a   :  { %1464 = vmatprep.subr.bf16.mxu0 %v6841_v54 }
 0x14b   :  { %1506 = vmatpush1.bf16.msra.mxu1 %v6287_v48 }
 0x14c   :  { %1507 = vmatprep.subr.bf16.mxu1 %v6288_v49 }
 0x14f   :  { %1508 = vmatpush1.bf16.msra.mxu1 %v6289_v50  ;;  %v983_v50 = vunpack.c.l.bf16 %v5157_v45  ;;  %v7014_v45 = vld [vmem:[%s8355_s3 + $0x24] ss:$16 sps:$4 sm:$0xff]  }
 0x150   :  { %1509 = vmatprep.subr.bf16.mxu1 %v6290_v51 }
 0x153   :  { %1510 = vmatpush1.bf16.msra.mxu1 %v6427_v19  ;;  %v6846_v19 = vld [vmem:[%s8354_s2 + $0x20] ss:$16 sps:$4 sm:$0xff]  }
 0x154   :  { %1465 = vmatpush1.bf16.msra.mxu0 %v6846_v19  ;;  %1511 = vmatprep.subr.bf16.mxu1 %v6882_v61 }
 0x155   :  { %1466 = vmatprep.subr.bf16.mxu0 %v6853_v55 }
 0x157   :  { %1512 = vmatpush1.bf16.msra.mxu1 %v6892_v63 }
 0x158   :  { %1467 = vmatpush1.bf16.msra.mxu0 %v6858_v56  ;;  %1513 = vmatprep.subr.bf16.mxu1 %v6906_v36 }
 0x159   :  { %1468 = vmatprep.subr.bf16.mxu0 %v6865_v58 }
 0x15b   :  { %1514 = vmatpush1.bf16.msra.mxu1 %v6916_v2 }
 0x15c   :  { %1469 = vmatpush1.bf16.msra.mxu0 %v6870_v59  ;;  %1515 = vmatprep.subr.bf16.mxu1 %v6930_v5 }
 0x15d   :  { %1470 = vmatprep.subr.bf16.mxu0 %v6877_v60 }
 0x15f   :  { %1516 = vmatpush1.bf16.msra.mxu1 %v6940_v7 }
 0x160   :  { %1471 = vmatpush1.bf16.msra.mxu0 %v6887_v62  ;;  %1517 = vmatprep.subr.bf16.mxu1 %v6954_v9 }
 0x161   :  { %1472 = vmatprep.subr.bf16.mxu0 %v6901_v35 }
 0x163   :  { %1518 = vmatpush1.bf16.msra.mxu1 %v6964_v11 }
 0x164   :  { %1473 = vmatpush1.bf16.msra.mxu0 %v6911_v0  ;;  %1813 = vmatprep.subr.bf16.mxu1 %v6978_v13 }
 0x165   :  { %1474 = vmatprep.subr.bf16.mxu0 %v6925_v4 }
 0x168   :  { %1475 = vmatpush1.bf16.msra.mxu0 %v6935_v6 }
 0x169   :  { %1476 = vmatprep.subr.bf16.mxu0 %v6949_v8 }
 0x16c   :  { %1477 = vmatpush1.bf16.msra.mxu0 %v6959_v10 }
 0x16d   :  { %1772 = vmatprep.subr.bf16.mxu0 %v6973_v12 }
 0x1f9   :  { %v872_v17 = vpop.f32.mrb[8].mxu0  ;;  %v913_v18 = vpop.f32.mrb[8].mxu1 }
 0x1fa   :  { %v920_v20 = vadd.f32 %v872_v17, %v673_v15  ;;  %v874_v22 = vpop.f32.mrb[9].mxu0  ;;  %v915_v23 = vpop.f32.mrb[9].mxu1  ;;  %v922_v40 = vadd.f32 %v913_v18, %v675_v34 }
 0x1fb   :  { %v921_v24 = vadd.f32 %v874_v22, %v674_v16  ;;  %v876_v25 = vpop.f32.mrb[10].mxu0  ;;  %v917_v26 = vpop.f32.mrb[10].mxu1  ;;  %v923_v31 = vadd.f32 %v915_v23, %v676_v33 }
 0x1fc   :  { %v5154_v27 = vmul.f32 -1.442695, %v920_v20  ;;  %v877_v28 = vpop.f32.mrb[11].mxu0  ;;  %v918_v29 = vpop.f32.mrb[11].mxu1  ;;  %v5158_v20 = vld [vmem:[%s8357_s1 + $0x68] sm:$0xff] }
 0x1fd   :  { %v5155_v30 = vmul.f32 -1.442695, %v921_v24  ;;  %v5156_v39 = vmul.f32 -1.442695, %v923_v31  ;;  %v986_v29 = vunpack.c.h.bf16 %v5158_v20  ;;  %v985_v33 = vunpack.c.l.bf16 %v5158_v20  ;;  %v7069_v20 = vld [vmem:[%s8355_s3 + $0x6c] ss:$16 sps:$4 sm:$0xff]  }
 0x1fe   :  { %6060 = vpow2.f32 %v5154_v27 }
 0x1ff   :  { %6062 = vpow2.f32 %v5155_v30 }
 0x200   :  { %6064 = vpow2.f32 %v5156_v39 }
 0x201   :  { %6066 = vtanh.f32 %v922_v40 }
 0x208   :  { %v6061_v37 = vpop.eup %6060 }
 0x209   :  { %v6063_v32 = vpop.eup %6062  ;;  %v927_v41 = vadd.f32 1.0, %v6061_v37 }
 0x20a   :  { %v933_v42 = vadd.f32 1.0, %v6063_v32  ;;  %v6065_v43 = vpop.eup %6064  ;;  %v7001_v32 = vld [vmem:[%s8355_s3] ss:$16 sps:$4 sm:$0xff]  }
 0x20b   :  { %6068 = vrcp.f32 %v927_v41  ;;  %v6067_v46 = vpop.eup %6066  ;;  %v940_v49 = vadd.f32 1.0, %v6065_v43  ;;  %v7006_v41 = vld [vmem:[%s8355_s3 + $0x8] ss:$16 sps:$4 sm:$0xff]  }
 0x20c   :  { %6070 = vrcp.f32 %v933_v42 }
 0x20d   :  { %6072 = vrcp.f32 %v940_v49  ;;  %v7026_v49 = vld [vmem:[%s8355_s3 + $0x20] ss:$16 sps:$4 sm:$0xff]  }
 0x215   :  { %v6069_v47 = vpop.eup %6068 }
 0x216   :  { %v6071_v1 = vpop.eup %6070  ;;  %v944_v48 = vmul.f32 %v6069_v47, %v6067_v46  ;;  %v7019_v46 = vld [vmem:[%s8355_s3 + $0x2c] ss:$16 sps:$4 sm:$0xff]  }
 0x217   :  { %v943_v51 = vmul.f32 %v6071_v1, %v6754_v3  ;;  %v6073_v31 = vpop.eup %6072 }
 0x219   :  { %v6992_v15 = vadd.f32 %v944_v48, %v943_v51  ;;  %v1182_v16 = vpop.f32.mrb[12].mxu0  ;;  %v1223_v17 = vpop.f32.mrb[12].mxu1  ;;  %v7038_v51 = vld [vmem:[%s8355_s3 + $0x44] ss:$16 sps:$4 sm:$0xff]  }
 0x21a   :  { %v1230_v18 = vadd.f32 %v1182_v16, %v983_v50  ;;  %v1184_v21 = vpop.f32.mrb[13].mxu0  ;;  %v1225_v22 = vpop.f32.mrb[13].mxu1  ;;  %v1232_v40 = vadd.f32 %v1223_v17, %v985_v33  ;;  %v7031_v50 = vld [vmem:[%s8355_s3 + $0x28] ss:$16 sps:$4 sm:$0xff]   ;;  %v7052_v16 = vld [vmem:[%s8355_s3 + $0x40] ss:$16 sps:$4 sm:$0xff]  }
 0x21b   :  { %6074 = vtanh.f32 %v6992_v15  ;;  %v1231_v23 = vadd.f32 %v1184_v21, %v984_v14  ;;  %v1186_v24 = vpop.f32.mrb[14].mxu0  ;;  %v1227_v25 = vpop.f32.mrb[14].mxu1  ;;  %v1233_v30 = vadd.f32 %v1225_v22, %v986_v29  ;;  %v7043_v14 = vld [vmem:[%s8355_s3 + $0x4c] ss:$16 sps:$4 sm:$0xff]   ;;  %v7057_v17 = vld [vmem:[%s8355_s3 + $0x48] ss:$16 sps:$4 sm:$0xff]  }
 0x21c   :  { %v5191_v26 = vmul.f32 -1.442695, %v1230_v18  ;;  %v1187_v3 = vpop.f32.mrb[15].mxu0  ;;  %v1228_v27 = vpop.f32.mrb[15].mxu1  ;;  %v7064_v18 = vld [vmem:[%s8355_s3 + $0x64] ss:$16 sps:$4 sm:$0xff]  }
 0x21d   :  { %v5192_v28 = vmul.f32 -1.442695, %v1231_v23  ;;  %v5193_v39 = vmul.f32 -1.442695, %v1233_v30  ;;  %v7076_v22 = vld [vmem:[%s8355_s3 + $0x60] ss:$16 sps:$4 sm:$0xff]  }
 0x21e   :  { %6076 = vpow2.f32 %v5191_v26  ;;  %v7081_v23 = vld [vmem:[%s8355_s3 + $0x68] ss:$16 sps:$4 sm:$0xff]   ;;  %v7088_v25 = vld [vmem:[%s8355_s3 + $0x84] ss:$16 sps:$4 sm:$0xff]   ;;  %v7093_v26 = vld [vmem:[%s8355_s3 + $0x8c] ss:$16 sps:$4 sm:$0xff]  }
 0x21f   :  { %6078 = vpow2.f32 %v5192_v28  ;;  %v7101_v33 = vld [vmem:[%s8355_s3 + $0x80] ss:$16 sps:$4 sm:$0xff]  }
 0x220   :  { %6080 = vpow2.f32 %v5193_v39 }
 0x221   :  { %6082 = vtanh.f32 %v1232_v40  ;;  %v7128_v40 = vld [vmem:[%s8355_s3 + $0xa0] ss:$16 sps:$4 sm:$0xff]  }
 0x225   :  { %v6075_v34 = vpop.eup %6074 }
 0x226   :  { %v947_v37 = vmul.f32 %v6075_v34, %v6073_v31  ;;  %v7106_v31 = vld [vmem:[%s8355_s3 + $0x88] ss:$16 sps:$4 sm:$0xff]   ;;  %v7118_v34 = vld [vmem:[%s8355_s3 + $0xac] ss:$16 sps:$4 sm:$0xff]  }
 0x228   :  { %v6077_v42 = vpop.eup %6076  ;;  %5194 = vst [vmem:[%s8358_s4 + $0x8] sm:$0xff] %v947_v37  ;;  %v1301_v43 = vpack.c.bf16 %v947_v37, %v947_v37  ;;  %v7133_v37 = vld [vmem:[%s8355_s3 + $0xa8] ss:$16 sps:$4 sm:$0xff]  }
 0x229   :  { %v6079_v47 = vpop.eup %6078  ;;  %v1237_v1 = vadd.f32 1.0, %v6077_v42  ;;  %v7140_v42 = vld [vmem:[%s8355_s3 + $0xc4] ss:$16 sps:$4 sm:$0xff]  }
 0x22a   :  { %v1243_v48 = vadd.f32 1.0, %v6079_v47  ;;  %1495 = vmatmul.mubr.bf16.vlgmr.msra.gmra.mrb[16].mxu0 %v1301_v43  ;;  %1536 = vmatmul.mubr.bf16.vlgmr.msra.gmra.mrb[16].mxu1 %v1301_v43  ;;  %v6081_v21 = vpop.eup %6080  ;;  %v7145_v43 = vld [vmem:[%s8355_s3 + $0xcc] ss:$16 sps:$4 sm:$0xff]   ;;  %v7152_v47 = vld [vmem:[%s8355_s3 + $0xc0] ss:$16 sps:$4 sm:$0xff]  }
 0x22b   :  { %6084 = vrcp.f32 %v1237_v1  ;;  %1773 = vmatpush1.bf16.msra.mxu0 %v7001_v32  ;;  %1814 = vmatpush1.bf16.msra.mxu1 %v7006_v41  ;;  %v6083_v24 = vpop.eup %6082  ;;  %v1250_v29 = vadd.f32 1.0, %v6081_v21  ;;  %v7157_v1 = vld [vmem:[%s8355_s3 + $0xc8] ss:$16 sps:$4 sm:$0xff]   ;;  %v7169_v21 = vld [vmem:[%s8355_s3 + $0xec] ss:$16 sps:$4 sm:$0xff]  }
 0x22c   :  { %6086 = vrcp.f32 %v1243_v48  ;;  %1774 = vmatprep.subr.bf16.mxu0 %v7014_v45  ;;  %1815 = vmatprep.subr.bf16.mxu1 %v7019_v46  ;;  %v7164_v48 = vld [vmem:[%s8355_s3 + $0xe4] ss:$16 sps:$4 sm:$0xff]  }
 0x22d   :  { %1804 = vmatprep.mubr.bf16.mxu0 %v8370_v57  ;;  %1845 = vmatprep.mubr.bf16.mxu1 %v8370_v57  ;;  %6088 = vrcp.f32 %v1250_v29 }
 0x22f   :  { %1775 = vmatpush1.bf16.msra.mxu0 %v7026_v49  ;;  %1816 = vmatpush1.bf16.msra.mxu1 %v7031_v50 }
 0x230   :  { %1776 = vmatprep.subr.bf16.mxu0 %v7038_v51  ;;  %1817 = vmatprep.subr.bf16.mxu1 %v7043_v14 }
 0x233   :  { %1777 = vmatpush1.bf16.msra.mxu0 %v7052_v16  ;;  %1818 = vmatpush1.bf16.msra.mxu1 %v7057_v17 }
 0x234   :  { %1778 = vmatprep.subr.bf16.mxu0 %v7064_v18  ;;  %1819 = vmatprep.subr.bf16.mxu1 %v7069_v20 }
 0x235   :  { %v6085_v3 = vpop.eup %6084 }
 0x236   :  { %v6087_v27 = vpop.eup %6086  ;;  %v1254_v28 = vmul.f32 %v6085_v3, %v6083_v24  ;;  %v7176_v24 = vld [vmem:[%s8355_s3 + $0xe0] ss:$16 sps:$4 sm:$0xff]   ;;  %v7181_v3 = vld [vmem:[%s8355_s3 + $0xe8] ss:$16 sps:$4 sm:$0xff]  }
 0x237   :  { %v1253_v30 = vmul.f32 %v6087_v27, %v6781_v38  ;;  %1779 = vmatpush1.bf16.msra.mxu0 %v7076_v22  ;;  %1820 = vmatpush1.bf16.msra.mxu1 %v7081_v23  ;;  %v7113_v38 = vld [vmem:[%s8355_s3 + $0xa4] ss:$16 sps:$4 sm:$0xff]   ;;  %v6089_v27 = vpop.eup %6088 }
 0x238   :  { %1780 = vmatprep.subr.bf16.mxu0 %v7088_v25  ;;  %1821 = vmatprep.subr.bf16.mxu1 %v7093_v26 }
 0x239   :  { %v7120_v39 = vadd.f32 %v1254_v28, %v1253_v30 }
 0x23b   :  { %6090 = vtanh.f32 %v7120_v39  ;;  %1781 = vmatpush1.bf16.msra.mxu0 %v7101_v33  ;;  %1822 = vmatpush1.bf16.msra.mxu1 %v7106_v31 }
 0x23c   :  { %1782 = vmatprep.subr.bf16.mxu0 %v7113_v38  ;;  %1823 = vmatprep.subr.bf16.mxu1 %v7118_v34 }
 0x23f   :  { %1783 = vmatpush1.bf16.msra.mxu0 %v7128_v40  ;;  %1824 = vmatpush1.bf16.msra.mxu1 %v7133_v37 }
 0x240   :  { %1784 = vmatprep.subr.bf16.mxu0 %v7140_v42  ;;  %1825 = vmatprep.subr.bf16.mxu1 %v7145_v43 }
 0x243   :  { %1785 = vmatpush1.bf16.msra.mxu0 %v7152_v47  ;;  %1826 = vmatpush1.bf16.msra.mxu1 %v7157_v1 }
 0x244   :  { %1786 = vmatprep.subr.bf16.mxu0 %v7164_v48  ;;  %1827 = vmatprep.subr.bf16.mxu1 %v7169_v21 }
 0x245   :  { %v6091_v28 = vpop.eup %6090 }
 0x246   :  { %v7185_v29 = vmul.f32 %v6091_v28, %v6089_v27 }
 0x247   :  { %1787 = vmatpush1.bf16.msra.mxu0 %v7176_v24  ;;  %1828 = vmatpush1.bf16.msra.mxu1 %v7181_v3 }
 0x248   :  { %8373 = vst [vmem:[#allocation4_spill] sm:$0xff] %v7185_v29  ;;  %v1611_v30 = vpack.c.bf16 %v7185_v29, %v7185_v29  ;;  %2086 = vmatprep.subr.bf16.mxu0 %v6829_v52  ;;  %v7213_v52 = vld [vmem:[%s8354_s2 + $0xc] ss:$16 sps:$4 sm:$0xff]  }
 0x249   :  { %2127 = vmatprep.subr.bf16.mxu1 %v7213_v52 }
 0x24a   :  { %1805 = vmatmul.mubr.bf16.vlgmr.msra.gmra.mrb[20].mxu0 %v1611_v30  ;;  %1846 = vmatmul.mubr.bf16.vlgmr.msra.gmra.mrb[20].mxu1 %v1611_v30 }
 0x24b   :  { %2087 = vmatpush1.bf16.msra.mxu0 %v6834_v53  ;;  %2118 = vmatprep.mubr.bf16.mxu0 %v8370_v57  ;;  %v7218_v53 = vld [vmem:[%s8354_s2 + $0x8] ss:$16 sps:$4 sm:$0xff]  }
 0x24c   :  { %2088 = vmatprep.subr.bf16.mxu0 %v6841_v54  ;;  %2159 = vmatprep.mubr.bf16.mxu1 %v8370_v57  ;;  %v7225_v54 = vld [vmem:[%s8354_s2 + $0x2c] ss:$16 sps:$4 sm:$0xff]  }
 0x24d   :  { %2128 = vmatpush1.bf16.msra.mxu1 %v7218_v53 }
 0x24e   :  { %2129 = vmatprep.subr.bf16.mxu1 %v7225_v54 }
 0x24f   :  { %2089 = vmatpush1.bf16.msra.mxu0 %v6846_v19  ;;  %v7230_v19 = vld [vmem:[%s8354_s2 + $0x28] ss:$16 sps:$4 sm:$0xff]  }
 0x250   :  { %2090 = vmatprep.subr.bf16.mxu0 %v6853_v55  ;;  %v7237_v55 = vld [vmem:[%s8354_s2 + $0x4c] ss:$16 sps:$4 sm:$0xff]  }
 0x251   :  { %2130 = vmatpush1.bf16.msra.mxu1 %v7230_v19 }
 0x252   :  { %2131 = vmatprep.subr.bf16.mxu1 %v7237_v55 }
 0x253   :  { %2091 = vmatpush1.bf16.msra.mxu0 %v6858_v56  ;;  %v7242_v56 = vld [vmem:[%s8354_s2 + $0x48] ss:$16 sps:$4 sm:$0xff]  }
 0x254   :  { %2092 = vmatprep.subr.bf16.mxu0 %v6865_v58  ;;  %v7249_v58 = vld [vmem:[%s8354_s2 + $0x6c] ss:$16 sps:$4 sm:$0xff]  }
 0x255   :  { %2132 = vmatpush1.bf16.msra.mxu1 %v7242_v56 }
 0x256   :  { %2133 = vmatprep.subr.bf16.mxu1 %v7249_v58 }
 0x257   :  { %2093 = vmatpush1.bf16.msra.mxu0 %v6870_v59  ;;  %v7254_v59 = vld [vmem:[%s8354_s2 + $0x68] ss:$16 sps:$4 sm:$0xff]  }
 0x258   :  { %2094 = vmatprep.subr.bf16.mxu0 %v6877_v60  ;;  %v5195_v60 = vld [vmem:[%s8356_s0 + $0x20] sm:$0xff] }
 0x259   :  { %2134 = vmatpush1.bf16.msra.mxu1 %v7254_v59 }
 0x25a   :  { %2135 = vmatprep.subr.bf16.mxu1 %v6882_v61  ;;  %v1297_v61 = vunpack.c.l.bf16 %v5195_v60 }
 0x25b   :  { %2095 = vmatpush1.bf16.msra.mxu0 %v6887_v62  ;;  %v1298_v62 = vunpack.c.h.bf16 %v5195_v60 }
 0x25c   :  { %2096 = vmatprep.subr.bf16.mxu0 %v6901_v35 }
 0x25d   :  { %2136 = vmatpush1.bf16.msra.mxu1 %v6892_v63 }
 0x25e   :  { %2137 = vmatprep.subr.bf16.mxu1 %v6906_v36 }
 0x25f   :  { %2097 = vmatpush1.bf16.msra.mxu0 %v6911_v0  ;;  %v5196_v0 = vld [vmem:[%s8356_s0 + $0x28] sm:$0xff] }
 0x260   :  { %2098 = vmatprep.subr.bf16.mxu0 %v6925_v4  ;;  %v1299_v27 = vunpack.c.l.bf16 %v5196_v0 }
 0x261   :  { %2138 = vmatpush1.bf16.msra.mxu1 %v6916_v2 }
 0x262   :  { %2139 = vmatprep.subr.bf16.mxu1 %v6930_v5 }
 0x263   :  { %2099 = vmatpush1.bf16.msra.mxu0 %v6935_v6 }
 0x264   :  { %2100 = vmatprep.subr.bf16.mxu0 %v6949_v8 }
 0x265   :  { %2140 = vmatpush1.bf16.msra.mxu1 %v6940_v7 }
 0x266   :  { %2141 = vmatprep.subr.bf16.mxu1 %v6954_v9 }
 0x267   :  { %2101 = vmatpush1.bf16.msra.mxu0 %v6959_v10 }
 0x268   :  { %2396 = vmatprep.subr.bf16.mxu0 %v6973_v12  ;;  %v1300_v12 = vunpack.c.h.bf16 %v5196_v0 }
 0x269   :  { %2142 = vmatpush1.bf16.msra.mxu1 %v6964_v11 }
 0x26a   :  { %2437 = vmatprep.subr.bf16.mxu1 %v6978_v13 }
 0x2fd   :  { %v1496_v63 = vpop.f32.mrb[16].mxu0  ;;  %v1537_v35 = vpop.f32.mrb[16].mxu1 }
 0x2fe   :  { %v1544_v36 = vadd.f32 %v1496_v63, %v1297_v61  ;;  %v1498_v2 = vpop.f32.mrb[17].mxu0  ;;  %v1539_v4 = vpop.f32.mrb[17].mxu1  ;;  %v1546_v30 = vadd.f32 %v1537_v35, %v1299_v27 }
 0x2ff   :  { %v1545_v5 = vadd.f32 %v1498_v2, %v1298_v62  ;;  %v1500_v6 = vpop.f32.mrb[18].mxu0  ;;  %v1541_v7 = vpop.f32.mrb[18].mxu1  ;;  %v1547_v13 = vadd.f32 %v1539_v4, %v1300_v12  ;;  %v5233_v12 = vld [vmem:[%s8357_s1 + $0x58] sm:$0xff] }
 0x300   :  { %v5229_v8 = vmul.f32 -1.442695, %v1544_v36  ;;  %v1501_v9 = vpop.f32.mrb[19].mxu0  ;;  %v1542_v10 = vpop.f32.mrb[19].mxu1  ;;  %v5232_v36 = vld [vmem:[%s8357_s1 + $0x50] sm:$0xff] }
 0x301   :  { %v5230_v11 = vmul.f32 -1.442695, %v1545_v5  ;;  %v5231_v28 = vmul.f32 -1.442695, %v1547_v13  ;;  %v1607_v7 = vunpack.c.l.bf16 %v5232_v36 }
 0x302   :  { %6092 = vpow2.f32 %v5229_v8  ;;  %v1608_v8 = vunpack.c.h.bf16 %v5232_v36  ;;  %v1610_v36 = vunpack.c.h.bf16 %v5233_v12 }
 0x303   :  { %6094 = vpow2.f32 %v5230_v11 }
 0x304   :  { %6096 = vpow2.f32 %v5231_v28 }
 0x305   :  { %6098 = vtanh.f32 %v1546_v30 }
 0x30c   :  { %v6093_v60 = vpop.eup %6092 }
 0x30d   :  { %v6095_v61 = vpop.eup %6094  ;;  %v1551_v63 = vadd.f32 1.0, %v6093_v60 }
 0x30e   :  { %v1557_v44 = vadd.f32 1.0, %v6095_v61  ;;  %v6097_v62 = vpop.eup %6096 }
 0x30f   :  { %6100 = vrcp.f32 %v1551_v63  ;;  %v6099_v2 = vpop.eup %6098  ;;  %v1564_v0 = vadd.f32 1.0, %v6097_v62 }
 0x310   :  { %6102 = vrcp.f32 %v1557_v44 }
 0x311   :  { %6104 = vrcp.f32 %v1564_v0 }
 0x319   :  { %v6101_v5 = vpop.eup %6100 }
 0x31a   :  { %v6103_v6 = vpop.eup %6102  ;;  %v1568_v4 = vmul.f32 %v6101_v5, %v6099_v2  ;;  %v1609_v5 = vunpack.c.l.bf16 %v5233_v12 }
 0x31b   :  { %v1567_v35 = vmul.f32 %v6103_v6, %v6992_v15  ;;  %v6105_v6 = vpop.eup %6104 }
 0x31d   :  { %v7277_v9 = vadd.f32 %v1568_v4, %v1567_v35  ;;  %v1806_v10 = vpop.f32.mrb[20].mxu0  ;;  %v1847_v11 = vpop.f32.mrb[20].mxu1 }
 0x31e   :  { %v1854_v44 = vadd.f32 %v1806_v10, %v1607_v7  ;;  %v1808_v13 = vpop.f32.mrb[21].mxu0  ;;  %v1849_v27 = vpop.f32.mrb[21].mxu1  ;;  %v1856_v7 = vadd.f32 %v1847_v11, %v1609_v5 }
 0x31f   :  { %6106 = vtanh.f32 %v7277_v9  ;;  %v1855_v28 = vadd.f32 %v1808_v13, %v1608_v8  ;;  %v1810_v30 = vpop.f32.mrb[22].mxu0  ;;  %v1851_v60 = vpop.f32.mrb[22].mxu1  ;;  %v1857_v2 = vadd.f32 %v1849_v27, %v1610_v36 }
 0x320   :  { %v5266_v61 = vmul.f32 -1.442695, %v1854_v44  ;;  %v1811_v15 = vpop.f32.mrb[23].mxu0  ;;  %v1852_v63 = vpop.f32.mrb[23].mxu1 }
 0x321   :  { %v5267_v62 = vmul.f32 -1.442695, %v1855_v28  ;;  %v5268_v0 = vmul.f32 -1.442695, %v1857_v2 }
 0x322   :  { %6108 = vpow2.f32 %v5266_v61  ;;  %v5271_v61 = vld [vmem:[%s8356_s0 + $0x38] sm:$0xff] }
 0x323   :  { %6110 = vpow2.f32 %v5267_v62 }
 0x324   :  { %6112 = vpow2.f32 %v5268_v0 }
 0x325   :  { %6114 = vtanh.f32 %v1856_v7  ;;  %v1924_v7 = vunpack.c.h.bf16 %v5271_v61 }
 0x329   :  { %v6107_v4 = vpop.eup %6106 }
 0x32a   :  { %v1571_v35 = vmul.f32 %v6107_v4, %v6105_v6 }
 0x32c   :  { %v6109_v10 = vpop.eup %6108  ;;  %5269 = vst [vmem:[%s8358_s4 + $0x10] sm:$0xff] %v1571_v35  ;;  %v1925_v8 = vpack.c.bf16 %v1571_v35, %v1571_v35 }
 0x32d   :  { %v6111_v44 = vpop.eup %6110  ;;  %v1861_v13 = vadd.f32 1.0, %v6109_v10  ;;  %v1923_v10 = vunpack.c.l.bf16 %v5271_v61  ;;  %v5308_v61 = vld [vmem:[%s8357_s1 + $0x48] sm:$0xff] }
 0x32e   :  { %v1867_v28 = vadd.f32 1.0, %v6111_v44  ;;  %2119 = vmatmul.mubr.bf16.vlgmr.msra.gmra.mrb[24].mxu0 %v1925_v8  ;;  %2160 = vmatmul.mubr.bf16.vlgmr.msra.gmra.mrb[24].mxu1 %v1925_v8 }
 0x32f   :  { %6116 = vrcp.f32 %v1861_v13  ;;  %2397 = vmatpush1.bf16.msra.mxu0 %v7001_v32  ;;  %2438 = vmatpush1.bf16.msra.mxu1 %v7006_v41  ;;  %v6113_v32 = vpop.eup %6112 }
 0x330   :  { %6118 = vrcp.f32 %v1867_v28  ;;  %2398 = vmatprep.subr.bf16.mxu0 %v7014_v45  ;;  %2439 = vmatprep.subr.bf16.mxu1 %v7019_v46  ;;  %v6115_v41 = vpop.eup %6114 }
 0x331   :  { %2428 = vmatprep.mubr.bf16.mxu0 %v8370_v57  ;;  %2469 = vmatprep.mubr.bf16.mxu1 %v8370_v57 }
 0x333   :  { %2399 = vmatpush1.bf16.msra.mxu0 %v7026_v49  ;;  %2440 = vmatpush1.bf16.msra.mxu1 %v7031_v50  ;;  %v1874_v49 = vadd.f32 1.0, %v6113_v32 }
 0x334   :  { %2400 = vmatprep.subr.bf16.mxu0 %v7038_v51  ;;  %2441 = vmatprep.subr.bf16.mxu1 %v7043_v14 }
 0x335   :  { %6120 = vrcp.f32 %v1874_v49 }
 0x337   :  { %2401 = vmatpush1.bf16.msra.mxu0 %v7052_v16  ;;  %2442 = vmatpush1.bf16.msra.mxu1 %v7057_v17 }
 0x338   :  { %2402 = vmatprep.subr.bf16.mxu0 %v7064_v18  ;;  %2443 = vmatprep.subr.bf16.mxu1 %v7069_v20  ;;  %v7339_v20 = vld [vmem:[%s8354_s2 + $0x4] ss:$16 sps:$4 sm:$0xff]  }
 0x339   :  { %v6117_v45 = vpop.eup %6116 }
 0x33a   :  { %v6119_v46 = vpop.eup %6118  ;;  %v1878_v11 = vmul.f32 %v6117_v45, %v6115_v41 }
 0x33b   :  { %v1877_v50 = vmul.f32 %v6119_v46, %v7120_v39  ;;  %2403 = vmatpush1.bf16.msra.mxu0 %v7076_v22  ;;  %2444 = vmatpush1.bf16.msra.mxu1 %v7081_v23  ;;  %v7344_v22 = vld [vmem:[%s8354_s2] ss:$16 sps:$4 sm:$0xff]   ;;  %v7351_v23 = vld [vmem:[%s8354_s2 + $0x24] ss:$16 sps:$4 sm:$0xff]   ;;  %v7392_v39 = vld [vmem:[%s8354_s2 + $0x8c] ss:$16 sps:$4 sm:$0xff]  }
 0x33c   :  { %2404 = vmatprep.subr.bf16.mxu0 %v7088_v25  ;;  %2445 = vmatprep.subr.bf16.mxu1 %v7093_v26  ;;  %v7356_v25 = vld [vmem:[%s8354_s2 + $0x20] ss:$16 sps:$4 sm:$0xff]   ;;  %v7363_v26 = vld [vmem:[%s8354_s2 + $0x44] ss:$16 sps:$4 sm:$0xff]  }
 0x33d   :  { %v7305_v51 = vadd.f32 %v1878_v11, %v1877_v50  ;;  %v5307_v46 = vld [vmem:[%s8357_s1 + $0x40] sm:$0xff] }
 0x33f   :  { %6122 = vtanh.f32 %v7305_v51  ;;  %2405 = vmatpush1.bf16.msra.mxu0 %v7101_v33  ;;  %2446 = vmatpush1.bf16.msra.mxu1 %v7106_v31  ;;  %v6121_v14 = vpop.eup %6120  ;;  %v7368_v33 = vld [vmem:[%s8354_s2 + $0x40] ss:$16 sps:$4 sm:$0xff]   ;;  %v7375_v31 = vld [vmem:[%s8354_s2 + $0x64] ss:$16 sps:$4 sm:$0xff]  }
 0x340   :  { %2406 = vmatprep.subr.bf16.mxu0 %v7113_v38  ;;  %2447 = vmatprep.subr.bf16.mxu1 %v7118_v34  ;;  %v7380_v38 = vld [vmem:[%s8354_s2 + $0x60] ss:$16 sps:$4 sm:$0xff]   ;;  %v7387_v34 = vld [vmem:[%s8354_s2 + $0x84] ss:$16 sps:$4 sm:$0xff]  }
 0x343   :  { %2407 = vmatpush1.bf16.msra.mxu0 %v7128_v40  ;;  %2448 = vmatpush1.bf16.msra.mxu1 %v7133_v37  ;;  %v7397_v40 = vld [vmem:[%s8354_s2 + $0x80] ss:$16 sps:$4 sm:$0xff]   ;;  %v7402_v37 = vld [vmem:[%s8354_s2 + $0x88] ss:$16 sps:$4 sm:$0xff]  }
 0x344   :  { %2408 = vmatprep.subr.bf16.mxu0 %v7140_v42  ;;  %2449 = vmatprep.subr.bf16.mxu1 %v7145_v43  ;;  %v7411_v42 = vld [vmem:[%s8354_s2 + $0xa4] ss:$16 sps:$4 sm:$0xff]   ;;  %v7416_v43 = vld [vmem:[%s8354_s2 + $0xac] ss:$16 sps:$4 sm:$0xff]  }
 0x347   :  { %2409 = vmatpush1.bf16.msra.mxu0 %v7152_v47  ;;  %2450 = vmatpush1.bf16.msra.mxu1 %v7157_v1  ;;  %v7421_v47 = vld [vmem:[%s8354_s2 + $0xa0] ss:$16 sps:$4 sm:$0xff]   ;;  %v7426_v1 = vld [vmem:[%s8354_s2 + $0xa8] ss:$16 sps:$4 sm:$0xff]  }
 0x348   :  { %2410 = vmatprep.subr.bf16.mxu0 %v7164_v48  ;;  %2451 = vmatprep.subr.bf16.mxu1 %v7169_v21  ;;  %v7435_v48 = vld [vmem:[%s8354_s2 + $0xc4] ss:$16 sps:$4 sm:$0xff]   ;;  %v7440_v21 = vld [vmem:[%s8354_s2 + $0xcc] ss:$16 sps:$4 sm:$0xff]  }
 0x349   :  { %v6123_v16 = vpop.eup %6122 }
 0x34a   :  { %v7320_v17 = vmul.f32 %v6123_v16, %v6121_v14 }
 0x34b   :  { %2411 = vmatpush1.bf16.msra.mxu0 %v7176_v24  ;;  %2452 = vmatpush1.bf16.msra.mxu1 %v7181_v3  ;;  %v7445_v24 = vld [vmem:[%s8354_s2 + $0xc0] ss:$16 sps:$4 sm:$0xff]   ;;  %v7450_v3 = vld [vmem:[%s8354_s2 + $0xc8] ss:$16 sps:$4 sm:$0xff]  }
 0x34c   :  { %8374 = vst [vmem:[#allocation5_spill] sm:$0xff] %v7320_v17  ;;  %v2235_v18 = vpack.c.bf16 %v7320_v17, %v7320_v17  ;;  %2751 = vmatprep.subr.bf16.mxu1 %v7213_v52  ;;  %2710 = vmatprep.subr.bf16.mxu0 %v7339_v20  ;;  %v7459_v52 = vld [vmem:[%s8354_s2 + $0xe4] ss:$16 sps:$4 sm:$0xff]  }
 0x34e   :  { %2429 = vmatmul.mubr.bf16.vlgmr.msra.gmra.mrb[28].mxu0 %v2235_v18  ;;  %2470 = vmatmul.mubr.bf16.vlgmr.msra.gmra.mrb[28].mxu1 %v2235_v18  ;;  %v2231_v18 = vunpack.c.l.bf16 %v5307_v46 }
 0x34f   :  { %2752 = vmatpush1.bf16.msra.mxu1 %v7218_v53  ;;  %2742 = vmatprep.mubr.bf16.mxu0 %v8370_v57  ;;  %v7464_v53 = vld [vmem:[%s8354_s2 + $0xec] ss:$16 sps:$4 sm:$0xff]  }
 0x350   :  { %2753 = vmatprep.subr.bf16.mxu1 %v7225_v54  ;;  %2783 = vmatprep.mubr.bf16.mxu1 %v8370_v57  ;;  %v7469_v54 = vld [vmem:[%s8354_s2 + $0xe0] ss:$16 sps:$4 sm:$0xff]  }
 0x351   :  { %2711 = vmatpush1.bf16.msra.mxu0 %v7344_v22 }
 0x352   :  { %2712 = vmatprep.subr.bf16.mxu0 %v7351_v23 }
 0x353   :  { %2754 = vmatpush1.bf16.msra.mxu1 %v7230_v19  ;;  %v7474_v19 = vld [vmem:[%s8354_s2 + $0xe8] ss:$16 sps:$4 sm:$0xff]  }
 0x354   :  { %2755 = vmatprep.subr.bf16.mxu1 %v7237_v55  ;;  %v7483_v55 = vld [vmem:[%s8355_s3 + $0x4] ss:$16 sps:$4 sm:$0xff]  }
 0x355   :  { %2713 = vmatpush1.bf16.msra.mxu0 %v7356_v25 }
 0x356   :  { %2714 = vmatprep.subr.bf16.mxu0 %v7363_v26 }
 0x357   :  { %2756 = vmatpush1.bf16.msra.mxu1 %v7242_v56  ;;  %v7488_v56 = vld [vmem:[%s8355_s3 + $0xc] ss:$16 sps:$4 sm:$0xff]  }
 0x358   :  { %2757 = vmatprep.subr.bf16.mxu1 %v7249_v58  ;;  %v5270_v58 = vld [vmem:[%s8356_s0 + $0x30] sm:$0xff] }
 0x359   :  { %2715 = vmatpush1.bf16.msra.mxu0 %v7368_v33  ;;  %v1922_v12 = vunpack.c.h.bf16 %v5270_v58 }
 0x35a   :  { %2716 = vmatprep.subr.bf16.mxu0 %v7375_v31 }
 0x35b   :  { %2758 = vmatpush1.bf16.msra.mxu1 %v7254_v59  ;;  %v1921_v59 = vunpack.c.l.bf16 %v5270_v58 }
 0x35c   :  { %2759 = vmatprep.subr.bf16.mxu1 %v7392_v39 }
 0x35d   :  { %2717 = vmatpush1.bf16.msra.mxu0 %v7380_v38 }
 0x35e   :  { %2718 = vmatprep.subr.bf16.mxu0 %v7387_v34 }
 0x35f   :  { %2760 = vmatpush1.bf16.msra.mxu1 %v7402_v37 }
 0x360   :  { %2761 = vmatprep.subr.bf16.mxu1 %v7416_v43 }
 0x361   :  { %2719 = vmatpush1.bf16.msra.mxu0 %v7397_v40 }
 0x362   :  { %2720 = vmatprep.subr.bf16.mxu0 %v7411_v42 }
 0x363   :  { %2762 = vmatpush1.bf16.msra.mxu1 %v7426_v1 }
 0x364   :  { %2763 = vmatprep.subr.bf16.mxu1 %v7440_v21 }
 0x365   :  { %2721 = vmatpush1.bf16.msra.mxu0 %v7421_v47 }
 0x366   :  { %2722 = vmatprep.subr.bf16.mxu0 %v7435_v48 }
 0x367   :  { %2764 = vmatpush1.bf16.msra.mxu1 %v7450_v3 }
 0x368   :  { %2765 = vmatprep.subr.bf16.mxu1 %v7464_v53 }
 0x369   :  { %2723 = vmatpush1.bf16.msra.mxu0 %v7445_v24 }
 0x36a   :  { %2724 = vmatprep.subr.bf16.mxu0 %v7459_v52 }
 0x36b   :  { %2766 = vmatpush1.bf16.msra.mxu1 %v7474_v19 }
 0x36c   :  { %3061 = vmatprep.subr.bf16.mxu1 %v7488_v56 }
 0x36d   :  { %2725 = vmatpush1.bf16.msra.mxu0 %v7469_v54 }
 0x36e   :  { %3020 = vmatprep.subr.bf16.mxu0 %v7483_v55 }
 0x401   :  { %v2120_v27 = vpop.f32.mrb[24].mxu0  ;;  %v2161_v30 = vpop.f32.mrb[24].mxu1 }
 0x402   :  { %v2168_v60 = vadd.f32 %v2120_v27, %v1921_v59  ;;  %v2122_v15 = vpop.f32.mrb[25].mxu0  ;;  %v2163_v63 = vpop.f32.mrb[25].mxu1  ;;  %v2170_v44 = vadd.f32 %v2161_v30, %v1923_v10  ;;  %v2232_v59 = vunpack.c.h.bf16 %v5307_v46 }
 0x403   :  { %v2169_v62 = vadd.f32 %v2122_v15, %v1922_v12  ;;  %v2124_v36 = vpop.f32.mrb[26].mxu0  ;;  %v2165_v2 = vpop.f32.mrb[26].mxu1  ;;  %v2171_v35 = vadd.f32 %v2163_v63, %v1924_v7 }
 0x404   :  { %v5304_v5 = vmul.f32 -1.442695, %v2168_v60  ;;  %v2125_v6 = vpop.f32.mrb[27].mxu0  ;;  %v2166_v4 = vpop.f32.mrb[27].mxu1 }
 0x405   :  { %v5305_v0 = vmul.f32 -1.442695, %v2169_v62  ;;  %v5306_v8 = vmul.f32 -1.442695, %v2171_v35  ;;  %v2233_v35 = vunpack.c.l.bf16 %v5308_v61 }
 0x406   :  { %6124 = vpow2.f32 %v5304_v5 }
 0x407   :  { %6126 = vpow2.f32 %v5305_v0  ;;  %v2234_v0 = vunpack.c.h.bf16 %v5308_v61  ;;  %v7575_v61 = vld [vmem:[%s8355_s3 + $0x64] ss:$16 sps:$4 sm:$0xff]  }
 0x408   :  { %6128 = vpow2.f32 %v5306_v8 }
 0x409   :  { %6130 = vtanh.f32 %v2170_v44 }
 0x410   :  { %v6125_v13 = vpop.eup %6124 }
 0x411   :  { %v6127_v28 = vpop.eup %6126  ;;  %v2175_v32 = vadd.f32 1.0, %v6125_v13 }
 0x412   :  { %v2181_v41 = vadd.f32 1.0, %v6127_v28  ;;  %v6129_v45 = vpop.eup %6128 }
 0x413   :  { %6132 = vrcp.f32 %v2175_v32  ;;  %v6131_v11 = vpop.eup %6130  ;;  %v2188_v16 = vadd.f32 1.0, %v6129_v45  ;;  %v7513_v32 = vld [vmem:[%s8355_s3] ss:$16 sps:$4 sm:$0xff]  }
 0x414   :  { %6134 = vrcp.f32 %v2181_v41  ;;  %v7518_v41 = vld [vmem:[%s8355_s3 + $0x8] ss:$16 sps:$4 sm:$0xff]  }
 0x415   :  { %6136 = vrcp.f32 %v2188_v16 }
 0x41d   :  { %v6133_v49 = vpop.eup %6132 }
 0x41e   :  { %v6135_v50 = vpop.eup %6134  ;;  %v2192_v14 = vmul.f32 %v6133_v49, %v6131_v11  ;;  %v7525_v11 = vld [vmem:[%s8355_s3 + $0x24] ss:$16 sps:$4 sm:$0xff]   ;;  %v7530_v49 = vld [vmem:[%s8355_s3 + $0x2c] ss:$16 sps:$4 sm:$0xff]  }
 0x41f   :  { %v2191_v58 = vmul.f32 %v6135_v50, %v7277_v9  ;;  %v6137_v10 = vpop.eup %6136 }
 0x421   :  { %v7502_v12 = vadd.f32 %v2192_v14, %v2191_v58  ;;  %v2430_v27 = vpop.f32.mrb[28].mxu0  ;;  %v2471_v30 = vpop.f32.mrb[28].mxu1  ;;  %v7542_v58 = vld [vmem:[%s8355_s3 + $0x28] ss:$16 sps:$4 sm:$0xff]  }
 0x422   :  { %v2478_v60 = vadd.f32 %v2430_v27, %v2231_v18  ;;  %v2432_v15 = vpop.f32.mrb[29].mxu0  ;;  %v2473_v63 = vpop.f32.mrb[29].mxu1  ;;  %v2480_v13 = vadd.f32 %v2471_v30, %v2233_v35  ;;  %v7537_v18 = vld [vmem:[%s8355_s3 + $0x20] ss:$16 sps:$4 sm:$0xff]   ;;  %v7554_v27 = vld [vmem:[%s8355_s3 + $0x4c] ss:$16 sps:$4 sm:$0xff]  }
 0x423   :  { %6138 = vtanh.f32 %v7502_v12  ;;  %v2479_v62 = vadd.f32 %v2432_v15, %v2232_v59  ;;  %v2434_v36 = vpop.f32.mrb[30].mxu0  ;;  %v2475_v2 = vpop.f32.mrb[30].mxu1  ;;  %v2481_v7 = vadd.f32 %v2473_v63, %v2234_v0  ;;  %v7549_v59 = vld [vmem:[%s8355_s3 + $0x44] ss:$16 sps:$4 sm:$0xff]   ;;  %v7563_v30 = vld [vmem:[%s8355_s3 + $0x40] ss:$16 sps:$4 sm:$0xff]  }
 0x424   :  { %v5341_v5 = vmul.f32 -1.442695, %v2478_v60  ;;  %v2435_v9 = vpop.f32.mrb[31].mxu0  ;;  %v2476_v6 = vpop.f32.mrb[31].mxu1  ;;  %v7568_v60 = vld [vmem:[%s8355_s3 + $0x48] ss:$16 sps:$4 sm:$0xff]  }
 0x425   :  { %v5342_v4 = vmul.f32 -1.442695, %v2479_v62  ;;  %v5343_v44 = vmul.f32 -1.442695, %v2481_v7  ;;  %v7580_v15 = vld [vmem:[%s8355_s3 + $0x6c] ss:$16 sps:$4 sm:$0xff]  }
 0x426   :  { %6140 = vpow2.f32 %v5341_v5  ;;  %v7587_v62 = vld [vmem:[%s8355_s3 + $0x60] ss:$16 sps:$4 sm:$0xff]   ;;  %v7592_v36 = vld [vmem:[%s8355_s3 + $0x68] ss:$16 sps:$4 sm:$0xff]   ;;  %v7599_v5 = vld [vmem:[%s8355_s3 + $0x84] ss:$16 sps:$4 sm:$0xff]  }
 0x427   :  { %6142 = vpow2.f32 %v5342_v4  ;;  %v7604_v9 = vld [vmem:[%s8355_s3 + $0x8c] ss:$16 sps:$4 sm:$0xff]  }
 0x428   :  { %6144 = vpow2.f32 %v5343_v44  ;;  %v7629_v44 = vld [vmem:[%s8355_s3 + $0xac] ss:$16 sps:$4 sm:$0xff]  }
 0x429   :  { %6146 = vtanh.f32 %v2480_v13 }
 0x42d   :  { %v6139_v8 = vpop.eup %6138 }
 0x42e   :  { %v7508_v28 = vmul.f32 %v6139_v8, %v6137_v10  ;;  %v7612_v10 = vld [vmem:[%s8355_s3 + $0x80] ss:$16 sps:$4 sm:$0xff]   ;;  %v7617_v8 = vld [vmem:[%s8355_s3 + $0x88] ss:$16 sps:$4 sm:$0xff]  }
 0x430   :  { %v6141_v45 = vpop.eup %6140  ;;  %v2549_v46 = vpack.c.bf16 %v7508_v28, %v7508_v28 }
 0x431   :  { %v6143_v50 = vpop.eup %6142  ;;  %v2485_v14 = vadd.f32 1.0, %v6141_v45  ;;  %v7639_v45 = vld [vmem:[%s8355_s3 + $0xa0] ss:$16 sps:$4 sm:$0xff]  }
 0x432   :  { %v2491_v16 = vadd.f32 1.0, %v6143_v50  ;;  %2743 = vmatmul.mubr.bf16.vlgmr.msra.gmra.mrb[32].mxu0 %v2549_v46  ;;  %2784 = vmatmul.mubr.bf16.vlgmr.msra.gmra.mrb[32].mxu1 %v2549_v46  ;;  %v6145_v63 = vpop.eup %6144  ;;  %v7644_v46 = vld [vmem:[%s8355_s3 + $0xa8] ss:$16 sps:$4 sm:$0xff]   ;;  %v7651_v50 = vld [vmem:[%s8355_s3 + $0xc4] ss:$16 sps:$4 sm:$0xff]  }
 0x433   :  { %6148 = vrcp.f32 %v2485_v14  ;;  %3021 = vmatpush1.bf16.msra.mxu0 %v7513_v32  ;;  %3062 = vmatpush1.bf16.msra.mxu1 %v7518_v41  ;;  %v6147_v2 = vpop.eup %6146  ;;  %v2498_v7 = vadd.f32 1.0, %v6145_v63  ;;  %v7656_v14 = vld [vmem:[%s8355_s3 + $0xcc] ss:$16 sps:$4 sm:$0xff]   ;;  %v7668_v63 = vld [vmem:[%s8355_s3 + $0xc8] ss:$16 sps:$4 sm:$0xff]  }
 0x434   :  { %6150 = vrcp.f32 %v2491_v16  ;;  %3022 = vmatprep.subr.bf16.mxu0 %v7525_v11  ;;  %3063 = vmatprep.subr.bf16.mxu1 %v7530_v49  ;;  %v7663_v16 = vld [vmem:[%s8355_s3 + $0xc0] ss:$16 sps:$4 sm:$0xff]  }
 0x435   :  { %3052 = vmatprep.mubr.bf16.mxu0 %v8370_v57  ;;  %3093 = vmatprep.mubr.bf16.mxu1 %v8370_v57  ;;  %6152 = vrcp.f32 %v2498_v7 }
 0x437   :  { %3023 = vmatpush1.bf16.msra.mxu0 %v7537_v18  ;;  %3064 = vmatpush1.bf16.msra.mxu1 %v7542_v58 }
 0x438   :  { %3024 = vmatprep.subr.bf16.mxu0 %v7549_v59  ;;  %3065 = vmatprep.subr.bf16.mxu1 %v7554_v27 }
 0x43b   :  { %3025 = vmatpush1.bf16.msra.mxu0 %v7563_v30  ;;  %3066 = vmatpush1.bf16.msra.mxu1 %v7568_v60 }
 0x43c   :  { %3026 = vmatprep.subr.bf16.mxu0 %v7575_v61  ;;  %3067 = vmatprep.subr.bf16.mxu1 %v7580_v15 }
 0x43d   :  { %v6149_v6 = vpop.eup %6148 }
 0x43e   :  { %v6151_v4 = vpop.eup %6150  ;;  %v2502_v0 = vmul.f32 %v6149_v6, %v6147_v2  ;;  %v7675_v2 = vld [vmem:[%s8355_s3 + $0xe4] ss:$16 sps:$4 sm:$0xff]   ;;  %v7680_v6 = vld [vmem:[%s8355_s3 + $0xec] ss:$16 sps:$4 sm:$0xff]  }
 0x43f   :  { %v2501_v35 = vmul.f32 %v6151_v4, %v7305_v51  ;;  %3027 = vmatpush1.bf16.msra.mxu0 %v7587_v62  ;;  %3068 = vmatpush1.bf16.msra.mxu1 %v7592_v36  ;;  %v7624_v51 = vld [vmem:[%s8355_s3 + $0xa4] ss:$16 sps:$4 sm:$0xff]   ;;  %v7687_v4 = vld [vmem:[%s8355_s3 + $0xe0] ss:$16 sps:$4 sm:$0xff]   ;;  %v6153_v7 = vpop.eup %6152 }
 0x440   :  { %3028 = vmatprep.subr.bf16.mxu0 %v7599_v5  ;;  %3069 = vmatprep.subr.bf16.mxu1 %v7604_v9 }
 0x441   :  { %v7631_v13 = vadd.f32 %v2502_v0, %v2501_v35  ;;  %v7692_v0 = vld [vmem:[%s8355_s3 + $0xe8] ss:$16 sps:$4 sm:$0xff]  }
 0x443   :  { %6154 = vtanh.f32 %v7631_v13  ;;  %3029 = vmatpush1.bf16.msra.mxu0 %v7612_v10  ;;  %3070 = vmatpush1.bf16.msra.mxu1 %v7617_v8 }
 0x444   :  { %3030 = vmatprep.subr.bf16.mxu0 %v7624_v51  ;;  %3071 = vmatprep.subr.bf16.mxu1 %v7629_v44 }
 0x447   :  { %3031 = vmatpush1.bf16.msra.mxu0 %v7639_v45  ;;  %3072 = vmatpush1.bf16.msra.mxu1 %v7644_v46 }
 0x448   :  { %3032 = vmatprep.subr.bf16.mxu0 %v7651_v50  ;;  %3073 = vmatprep.subr.bf16.mxu1 %v7656_v14 }
 0x44b   :  { %3033 = vmatpush1.bf16.msra.mxu0 %v7663_v16  ;;  %3074 = vmatpush1.bf16.msra.mxu1 %v7668_v63 }
 0x44c   :  { %3034 = vmatprep.subr.bf16.mxu0 %v7675_v2  ;;  %3075 = vmatprep.subr.bf16.mxu1 %v7680_v6 }
 0x44d   :  { %v6155_v35 = vpop.eup %6154 }
 0x44e   :  { %v7696_v29 = vmul.f32 %v6155_v35, %v6153_v7 }
 0x44f   :  { %3035 = vmatpush1.bf16.msra.mxu0 %v7687_v4  ;;  %3076 = vmatpush1.bf16.msra.mxu1 %v7692_v0 }
 0x450   :  { %v2859_v17 = vpack.c.bf16 %v7696_v29, %v7696_v29  ;;  %3334 = vmatprep.subr.bf16.mxu0 %v7339_v20  ;;  %v7729_v20 = vld [vmem:[%s8354_s2 + $0x8] ss:$16 sps:$4 sm:$0xff]  }
 0x452   :  { %3053 = vmatmul.mubr.bf16.vlgmr.msra.gmra.mrb[36].mxu0 %v2859_v17  ;;  %3094 = vmatmul.mubr.bf16.vlgmr.msra.gmra.mrb[36].mxu1 %v2859_v17  ;;  %v7724_v17 = vld [vmem:[%s8354_s2 + $0xc] ss:$16 sps:$4 sm:$0xff]  }
 0x453   :  { %3335 = vmatpush1.bf16.msra.mxu0 %v7344_v22  ;;  %3366 = vmatprep.mubr.bf16.mxu0 %v8370_v57  ;;  %v7736_v22 = vld [vmem:[%s8354_s2 + $0x2c] ss:$16 sps:$4 sm:$0xff]  }
 0x454   :  { %3336 = vmatprep.subr.bf16.mxu0 %v7351_v23  ;;  %3407 = vmatprep.mubr.bf16.mxu1 %v8370_v57  ;;  %v7741_v23 = vld [vmem:[%s8354_s2 + $0x28] ss:$16 sps:$4 sm:$0xff]  }
 0x455   :  { %3375 = vmatprep.subr.bf16.mxu1 %v7724_v17 }
 0x456   :  { %3376 = vmatpush1.bf16.msra.mxu1 %v7729_v20 }
 0x457   :  { %3337 = vmatpush1.bf16.msra.mxu0 %v7356_v25  ;;  %3377 = vmatprep.subr.bf16.mxu1 %v7736_v22  ;;  %v7748_v25 = vld [vmem:[%s8354_s2 + $0x4c] ss:$16 sps:$4 sm:$0xff]  }
 0x458   :  { %3338 = vmatprep.subr.bf16.mxu0 %v7363_v26  ;;  %v7753_v26 = vld [vmem:[%s8354_s2 + $0x48] ss:$16 sps:$4 sm:$0xff]  }
 0x45a   :  { %3378 = vmatpush1.bf16.msra.mxu1 %v7741_v23 }
 0x45b   :  { %3339 = vmatpush1.bf16.msra.mxu0 %v7368_v33  ;;  %3379 = vmatprep.subr.bf16.mxu1 %v7748_v25  ;;  %v7760_v33 = vld [vmem:[%s8354_s2 + $0x6c] ss:$16 sps:$4 sm:$0xff]  }
 0x45c   :  { %3340 = vmatprep.subr.bf16.mxu0 %v7375_v31  ;;  %8375 = vst [vmem:[#allocation6_spill] sm:$0xff] %v7760_v33  ;;  %v7765_v31 = vld [vmem:[%s8354_s2 + $0x68] ss:$16 sps:$4 sm:$0xff]  }
 0x45d   :  { %8376 = vst [vmem:[#allocation7_spill] sm:$0xff] %v7765_v31 }
 0x45e   :  { %3380 = vmatpush1.bf16.msra.mxu1 %v7753_v26 }
 0x45f   :  { %3341 = vmatpush1.bf16.msra.mxu0 %v7380_v38  ;;  %3381 = vmatprep.subr.bf16.mxu1 %v7760_v33  ;;  %v5345_v38 = vld [vmem:[%s8356_s0 + $0x40] sm:$0xff] }
 0x460   :  { %3342 = vmatprep.subr.bf16.mxu0 %v7387_v34  ;;  %v2545_v34 = vunpack.c.l.bf16 %v5345_v38 }
 0x462   :  { %3382 = vmatpush1.bf16.msra.mxu1 %v7765_v31 }
 0x463   :  { %3343 = vmatpush1.bf16.msra.mxu0 %v7397_v40  ;;  %3383 = vmatprep.subr.bf16.mxu1 %v7392_v39  ;;  %v2546_v39 = vunpack.c.h.bf16 %v5345_v38 }
 0x464   :  { %3344 = vmatprep.subr.bf16.mxu0 %v7411_v42 }
 0x466   :  { %3384 = vmatpush1.bf16.msra.mxu1 %v7402_v37 }
 0x467   :  { %3345 = vmatpush1.bf16.msra.mxu0 %v7421_v47  ;;  %3385 = vmatprep.subr.bf16.mxu1 %v7416_v43  ;;  %v5346_v43 = vld [vmem:[%s8356_s0 + $0x48] sm:$0xff] }
 0x468   :  { %3346 = vmatprep.subr.bf16.mxu0 %v7435_v48 }
 0x46a   :  { %3386 = vmatpush1.bf16.msra.mxu1 %v7426_v1 }
 0x46b   :  { %3347 = vmatpush1.bf16.msra.mxu0 %v7445_v24  ;;  %3387 = vmatprep.subr.bf16.mxu1 %v7440_v21 }
 0x46c   :  { %3348 = vmatprep.subr.bf16.mxu0 %v7459_v52 }
 0x46e   :  { %3388 = vmatpush1.bf16.msra.mxu1 %v7450_v3 }
 0x46f   :  { %3349 = vmatpush1.bf16.msra.mxu0 %v7469_v54  ;;  %3389 = vmatprep.subr.bf16.mxu1 %v7464_v53 }
 0x470   :  { %3644 = vmatprep.subr.bf16.mxu0 %v7483_v55 }
 0x472   :  { %3390 = vmatpush1.bf16.msra.mxu1 %v7474_v19  ;;  %v2548_v19 = vunpack.c.h.bf16 %v5346_v43 }
 0x473   :  { %3685 = vmatprep.subr.bf16.mxu1 %v7488_v56  ;;  %v2547_v56 = vunpack.c.l.bf16 %v5346_v43 }
 0x505   :  { %v2744_v40 = vpop.f32.mrb[32].mxu0  ;;  %v2785_v37 = vpop.f32.mrb[32].mxu1 }
 0x506   :  { %v2792_v42 = vadd.f32 %v2744_v40, %v2545_v34  ;;  %v2746_v47 = vpop.f32.mrb[33].mxu0  ;;  %v2787_v1 = vpop.f32.mrb[33].mxu1  ;;  %v2794_v35 = vadd.f32 %v2785_v37, %v2547_v56 }
 0x507   :  { %v2793_v48 = vadd.f32 %v2746_v47, %v2546_v39  ;;  %v2748_v21 = vpop.f32.mrb[34].mxu0  ;;  %v2789_v24 = vpop.f32.mrb[34].mxu1  ;;  %v2795_v55 = vadd.f32 %v2787_v1, %v2548_v19  ;;  %v5383_v19 = vld [vmem:[%s8357_s1 + $0x38] sm:$0xff] }
 0x508   :  { %v5379_v3 = vmul.f32 -1.442695, %v2792_v42  ;;  %v2749_v52 = vpop.f32.mrb[35].mxu0  ;;  %v2790_v53 = vpop.f32.mrb[35].mxu1  ;;  %v5382_v42 = vld [vmem:[%s8357_s1 + $0x30] sm:$0xff] }
 0x509   :  { %v5380_v54 = vmul.f32 -1.442695, %v2793_v48  ;;  %v5381_v7 = vmul.f32 -1.442695, %v2795_v55  ;;  %v2855_v24 = vunpack.c.l.bf16 %v5382_v42 }
 0x50a   :  { %6156 = vpow2.f32 %v5379_v3  ;;  %v2856_v3 = vunpack.c.h.bf16 %v5382_v42  ;;  %v2858_v42 = vunpack.c.h.bf16 %v5383_v19 }
 0x50b   :  { %6158 = vpow2.f32 %v5380_v54 }
 0x50c   :  { %6160 = vpow2.f32 %v5381_v7 }
 0x50d   :  { %6162 = vtanh.f32 %v2794_v35 }
 0x514   :  { %v6157_v38 = vpop.eup %6156 }
 0x515   :  { %v6159_v34 = vpop.eup %6158  ;;  %v2799_v40 = vadd.f32 1.0, %v6157_v38 }
 0x516   :  { %v2805_v31 = vadd.f32 1.0, %v6159_v34  ;;  %v6161_v39 = vpop.eup %6160 }
 0x517   :  { %6164 = vrcp.f32 %v2799_v40  ;;  %v6163_v47 = vpop.eup %6162  ;;  %v2812_v43 = vadd.f32 1.0, %v6161_v39 }
 0x518   :  { %6166 = vrcp.f32 %v2805_v31 }
 0x519   :  { %6168 = vrcp.f32 %v2812_v43 }
 0x521   :  { %v6165_v48 = vpop.eup %6164 }
 0x522   :  { %v6167_v21 = vpop.eup %6166  ;;  %v2816_v1 = vmul.f32 %v6165_v48, %v6163_v47  ;;  %v2857_v48 = vunpack.c.l.bf16 %v5383_v19  ;;  %v8000_v19 = vld [vmem:[%s8355_s3 + $0xc] ss:$16 sps:$4 sm:$0xff]  }
 0x523   :  { %v2815_v37 = vmul.f32 %v6167_v21, %v7502_v12  ;;  %v6169_v21 = vpop.eup %6168 }
 0x525   :  { %v7788_v52 = vadd.f32 %v2816_v1, %v2815_v37  ;;  %v3054_v53 = vpop.f32.mrb[36].mxu0  ;;  %v3095_v54 = vpop.f32.mrb[36].mxu1 }
 0x526   :  { %v3102_v31 = vadd.f32 %v3054_v53, %v2855_v24  ;;  %v3056_v55 = vpop.f32.mrb[37].mxu0  ;;  %v3097_v56 = vpop.f32.mrb[37].mxu1  ;;  %v3104_v24 = vadd.f32 %v3095_v54, %v2857_v48  ;;  %v7995_v54 = vld [vmem:[%s8355_s3 + $0x4] ss:$16 sps:$4 sm:$0xff]  }
 0x527   :  { %6170 = vtanh.f32 %v7788_v52  ;;  %v3103_v7 = vadd.f32 %v3056_v55, %v2856_v3  ;;  %v3058_v35 = vpop.f32.mrb[38].mxu0  ;;  %v3099_v38 = vpop.f32.mrb[38].mxu1  ;;  %v3105_v47 = vadd.f32 %v3097_v56, %v2858_v42  ;;  %v5420_v56 = vld [vmem:[%s8356_s0 + $0x50] sm:$0xff]  ;;  %v5421_v42 = vld [vmem:[%s8356_s0 + $0x58] sm:$0xff] }
 0x528   :  { %v5416_v34 = vmul.f32 -1.442695, %v3102_v31  ;;  %v3059_v12 = vpop.f32.mrb[39].mxu0  ;;  %v3100_v40 = vpop.f32.mrb[39].mxu1  ;;  %v3169_v38 = vunpack.c.l.bf16 %v5420_v56 }
 0x529   :  { %v5417_v39 = vmul.f32 -1.442695, %v3103_v7  ;;  %v5418_v43 = vmul.f32 -1.442695, %v3105_v47 }
 0x52a   :  { %6172 = vpow2.f32 %v5416_v34  ;;  %v3170_v34 = vunpack.c.h.bf16 %v5420_v56 }
 0x52b   :  { %6174 = vpow2.f32 %v5417_v39 }
 0x52c   :  { %6176 = vpow2.f32 %v5418_v43 }
 0x52d   :  { %6178 = vtanh.f32 %v3104_v24 }
 0x531   :  { %v6171_v1 = vpop.eup %6170 }
 0x532   :  { %v2819_v37 = vmul.f32 %v6171_v1, %v6169_v21 }
 0x534   :  { %v6173_v53 = vpop.eup %6172  ;;  %v3173_v33 = vpack.c.bf16 %v2819_v37, %v2819_v37  ;;  %v5024_v3 = vadd.f32 %v2819_v37, %v7696_v29 }
 0x535   :  { %v6175_v55 = vpop.eup %6174  ;;  %v3109_v35 = vadd.f32 1.0, %v6173_v53 }
 0x536   :  { %v3115_v31 = vadd.f32 1.0, %v6175_v55  ;;  %3367 = vmatmul.mubr.bf16.vlgmr.msra.gmra.mrb[40].mxu0 %v3173_v33  ;;  %v5032_v7 = vmul.f32 0.5, %v5024_v3  ;;  %3408 = vmatmul.mubr.bf16.vlgmr.msra.gmra.mrb[40].mxu1 %v3173_v33  ;;  %v6177_v29 = vpop.eup %6176  ;;  %v7986_v33 = vld [vmem:[%s8354_s2 + $0xe8] ss:$16 sps:$4 sm:$0xff]   ;;  %v3172_v55 = vunpack.c.h.bf16 %v5421_v42 }
 0x537   :  { %6180 = vrcp.f32 %v3109_v35  ;;  %3645 = vmatpush1.bf16.msra.mxu0 %v7513_v32  ;;  %3686 = vmatpush1.bf16.msra.mxu1 %v7518_v41  ;;  %v6179_v32 = vpop.eup %6178 }
 0x538   :  { %6182 = vrcp.f32 %v3115_v31  ;;  %5040 = vst [vmem:[%s8358_s4 + $0x20] sm:$0xff] %v5032_v7  ;;  %3646 = vmatprep.subr.bf16.mxu0 %v7525_v11  ;;  %3687 = vmatprep.subr.bf16.mxu1 %v7530_v49  ;;  %v3171_v31 = vunpack.c.l.bf16 %v5421_v42 }
 0x539   :  { %3676 = vmatprep.mubr.bf16.mxu0 %v8370_v57  ;;  %3717 = vmatprep.mubr.bf16.mxu1 %v8370_v57 }
 0x53b   :  { %3647 = vmatpush1.bf16.msra.mxu0 %v7537_v18  ;;  %3688 = vmatpush1.bf16.msra.mxu1 %v7542_v58  ;;  %v3122_v18 = vadd.f32 1.0, %v6177_v29 }
 0x53c   :  { %3648 = vmatprep.subr.bf16.mxu0 %v7549_v59  ;;  %3689 = vmatprep.subr.bf16.mxu1 %v7554_v27 }
 0x53d   :  { %6184 = vrcp.f32 %v3122_v18 }
 0x53f   :  { %3649 = vmatpush1.bf16.msra.mxu0 %v7563_v30  ;;  %3690 = vmatpush1.bf16.msra.mxu1 %v7568_v60 }
 0x540   :  { %3650 = vmatprep.subr.bf16.mxu0 %v7575_v61  ;;  %3691 = vmatprep.subr.bf16.mxu1 %v7580_v15 }
 0x541   :  { %v6181_v41 = vpop.eup %6180 }
 0x542   :  { %v6183_v11 = vpop.eup %6182  ;;  %v3126_v49 = vmul.f32 %v6181_v41, %v6179_v32 }
 0x543   :  { %v3125_v58 = vmul.f32 %v6183_v11, %v7631_v13  ;;  %3651 = vmatpush1.bf16.msra.mxu0 %v7587_v62  ;;  %3692 = vmatpush1.bf16.msra.mxu1 %v7592_v36  ;;  %v8378_v36 = vld [vmem:[#allocation7_spill] sm:$0xff] }
 0x544   :  { %3652 = vmatprep.subr.bf16.mxu0 %v7599_v5  ;;  %3693 = vmatprep.subr.bf16.mxu1 %v7604_v9  ;;  %v7851_v5 = vld [vmem:[%s8354_s2 + $0x4] ss:$16 sps:$4 sm:$0xff]   ;;  %v7856_v9 = vld [vmem:[%s8354_s2] ss:$16 sps:$4 sm:$0xff]  }
 0x545   :  { %v7817_v59 = vadd.f32 %v3126_v49, %v3125_v58  ;;  %v7887_v13 = vld [vmem:[%s8354_s2 + $0x64] ss:$16 sps:$4 sm:$0xff]  }
 0x546   :  { %v5457_v58 = vld [vmem:[%s8357_s1 + $0x20] sm:$0xff] }
 0x547   :  { %6186 = vtanh.f32 %v7817_v59  ;;  %3653 = vmatpush1.bf16.msra.mxu0 %v7612_v10  ;;  %3694 = vmatpush1.bf16.msra.mxu1 %v7617_v8  ;;  %v6185_v27 = vpop.eup %6184  ;;  %v7863_v10 = vld [vmem:[%s8354_s2 + $0x24] ss:$16 sps:$4 sm:$0xff]   ;;  %v7868_v8 = vld [vmem:[%s8354_s2 + $0x20] ss:$16 sps:$4 sm:$0xff]  }
 0x548   :  { %3654 = vmatprep.subr.bf16.mxu0 %v7624_v51  ;;  %3695 = vmatprep.subr.bf16.mxu1 %v7629_v44  ;;  %v7875_v51 = vld [vmem:[%s8354_s2 + $0x44] ss:$16 sps:$4 sm:$0xff]   ;;  %v7880_v44 = vld [vmem:[%s8354_s2 + $0x40] ss:$16 sps:$4 sm:$0xff]  }
 0x54b   :  { %3655 = vmatpush1.bf16.msra.mxu0 %v7639_v45  ;;  %3696 = vmatpush1.bf16.msra.mxu1 %v7644_v46  ;;  %v7892_v45 = vld [vmem:[%s8354_s2 + $0x60] ss:$16 sps:$4 sm:$0xff]   ;;  %v7899_v46 = vld [vmem:[%s8354_s2 + $0x84] ss:$16 sps:$4 sm:$0xff]  }
 0x54c   :  { %3656 = vmatprep.subr.bf16.mxu0 %v7651_v50  ;;  %3697 = vmatprep.subr.bf16.mxu1 %v7656_v14  ;;  %v7904_v50 = vld [vmem:[%s8354_s2 + $0x8c] ss:$16 sps:$4 sm:$0xff]   ;;  %v7909_v14 = vld [vmem:[%s8354_s2 + $0x80] ss:$16 sps:$4 sm:$0xff]  }
 0x54f   :  { %3657 = vmatpush1.bf16.msra.mxu0 %v7663_v16  ;;  %3698 = vmatpush1.bf16.msra.mxu1 %v7668_v63  ;;  %v7914_v16 = vld [vmem:[%s8354_s2 + $0x88] ss:$16 sps:$4 sm:$0xff]   ;;  %v7923_v63 = vld [vmem:[%s8354_s2 + $0xa4] ss:$16 sps:$4 sm:$0xff]  }
 0x550   :  { %3658 = vmatprep.subr.bf16.mxu0 %v7675_v2  ;;  %3699 = vmatprep.subr.bf16.mxu1 %v7680_v6  ;;  %v7928_v2 = vld [vmem:[%s8354_s2 + $0xac] ss:$16 sps:$4 sm:$0xff]   ;;  %v7933_v6 = vld [vmem:[%s8354_s2 + $0xa0] ss:$16 sps:$4 sm:$0xff]  }
 0x551   :  { %v6187_v30 = vpop.eup %6186 }
 0x552   :  { %v3129_v60 = vmul.f32 %v6187_v30, %v6185_v27 }
 0x553   :  { %3659 = vmatpush1.bf16.msra.mxu0 %v7687_v4  ;;  %3700 = vmatpush1.bf16.msra.mxu1 %v7692_v0  ;;  %v7938_v4 = vld [vmem:[%s8354_s2 + $0xa8] ss:$16 sps:$4 sm:$0xff]   ;;  %v7947_v0 = vld [vmem:[%s8354_s2 + $0xc4] ss:$16 sps:$4 sm:$0xff]  }
 0x554   :  { %v3483_v61 = vpack.c.bf16 %v3129_v60, %v3129_v60  ;;  %v5023_v15 = vadd.f32 %v3129_v60, %v7508_v28  ;;  %3999 = vmatprep.subr.bf16.mxu1 %v7724_v17  ;;  %v8377_v28 = vld [vmem:[#allocation6_spill] sm:$0xff]  ;;  %3958 = vmatprep.subr.bf16.mxu0 %v7851_v5 }
 0x555   :  { %v7952_v17 = vld [vmem:[%s8354_s2 + $0xcc] ss:$16 sps:$4 sm:$0xff]  }
 0x556   :  { %3677 = vmatmul.mubr.bf16.vlgmr.msra.gmra.mrb[44].mxu0 %v3483_v61  ;;  %v5031_v62 = vmul.f32 0.5, %v5023_v15  ;;  %3718 = vmatmul.mubr.bf16.vlgmr.msra.gmra.mrb[44].mxu1 %v3483_v61 }
 0x557   :  { %4000 = vmatpush1.bf16.msra.mxu1 %v7729_v20  ;;  %3990 = vmatprep.mubr.bf16.mxu0 %v8370_v57  ;;  %v7957_v20 = vld [vmem:[%s8354_s2 + $0xc0] ss:$16 sps:$4 sm:$0xff]  }
 0x558   :  { %5039 = vst [vmem:[%s8358_s4 + $0x18] sm:$0xff] %v5031_v62  ;;  %4001 = vmatprep.subr.bf16.mxu1 %v7736_v22  ;;  %4031 = vmatprep.mubr.bf16.mxu1 %v8370_v57  ;;  %v7962_v22 = vld [vmem:[%s8354_s2 + $0xc8] ss:$16 sps:$4 sm:$0xff]   ;;  %v3479_v62 = vunpack.c.l.bf16 %v5457_v58 }
 0x559   :  { %3959 = vmatpush1.bf16.msra.mxu0 %v7856_v9 }
 0x55a   :  { %3960 = vmatprep.subr.bf16.mxu0 %v7863_v10 }
 0x55b   :  { %4002 = vmatpush1.bf16.msra.mxu1 %v7741_v23  ;;  %v7971_v23 = vld [vmem:[%s8354_s2 + $0xe4] ss:$16 sps:$4 sm:$0xff]  }
 0x55c   :  { %4003 = vmatprep.subr.bf16.mxu1 %v7748_v25  ;;  %v7976_v25 = vld [vmem:[%s8354_s2 + $0xec] ss:$16 sps:$4 sm:$0xff]  }
 0x55d   :  { %3961 = vmatpush1.bf16.msra.mxu0 %v7868_v8 }
 0x55e   :  { %3962 = vmatprep.subr.bf16.mxu0 %v7875_v51 }
 0x55f   :  { %4004 = vmatpush1.bf16.msra.mxu1 %v7753_v26  ;;  %v7981_v26 = vld [vmem:[%s8354_s2 + $0xe0] ss:$16 sps:$4 sm:$0xff]  }
 0x560   :  { %4005 = vmatprep.subr.bf16.mxu1 %v8377_v28 }
 0x561   :  { %3963 = vmatpush1.bf16.msra.mxu0 %v7880_v44 }
 0x562   :  { %3964 = vmatprep.subr.bf16.mxu0 %v7887_v13 }
 0x563   :  { %4006 = vmatpush1.bf16.msra.mxu1 %v8378_v36  ;;  %v3480_v36 = vunpack.c.h.bf16 %v5457_v58 }
 0x564   :  { %4007 = vmatprep.subr.bf16.mxu1 %v7904_v50 }
 0x565   :  { %3965 = vmatpush1.bf16.msra.mxu0 %v7892_v45 }
 0x566   :  { %3966 = vmatprep.subr.bf16.mxu0 %v7899_v46 }
 0x567   :  { %4008 = vmatpush1.bf16.msra.mxu1 %v7914_v16 }
 0x568   :  { %4009 = vmatprep.subr.bf16.mxu1 %v7928_v2 }
 0x569   :  { %3967 = vmatpush1.bf16.msra.mxu0 %v7909_v14 }
 0x56a   :  { %3968 = vmatprep.subr.bf16.mxu0 %v7923_v63 }
 0x56b   :  { %4010 = vmatpush1.bf16.msra.mxu1 %v7938_v4 }
 0x56c   :  { %4011 = vmatprep.subr.bf16.mxu1 %v7952_v17 }
 0x56d   :  { %3969 = vmatpush1.bf16.msra.mxu0 %v7933_v6 }
 0x56e   :  { %3970 = vmatprep.subr.bf16.mxu0 %v7947_v0 }
 0x56f   :  { %4012 = vmatpush1.bf16.msra.mxu1 %v7962_v22 }
 0x570   :  { %4013 = vmatprep.subr.bf16.mxu1 %v7976_v25 }
 0x571   :  { %3971 = vmatpush1.bf16.msra.mxu0 %v7957_v20 }
 0x572   :  { %3972 = vmatprep.subr.bf16.mxu0 %v7971_v23 }
 0x573   :  { %4014 = vmatpush1.bf16.msra.mxu1 %v7986_v33 }
 0x574   :  { %4309 = vmatprep.subr.bf16.mxu1 %v8000_v19 }
 0x575   :  { %3973 = vmatpush1.bf16.msra.mxu0 %v7981_v26 }
 0x576   :  { %4268 = vmatprep.subr.bf16.mxu0 %v7995_v54 }
 0x609   :  { %v3368_v12 = vpop.f32.mrb[40].mxu0  ;;  %v3409_v40 = vpop.f32.mrb[40].mxu1 }
 0x60a   :  { %v3416_v39 = vadd.f32 %v3368_v12, %v3169_v38  ;;  %v3370_v47 = vpop.f32.mrb[41].mxu0  ;;  %v3411_v48 = vpop.f32.mrb[41].mxu1  ;;  %v3418_v29 = vadd.f32 %v3409_v40, %v3171_v31  ;;  %v5458_v40 = vld [vmem:[%s8357_s1 + $0x28] sm:$0xff] }
 0x60b   :  { %v3417_v21 = vadd.f32 %v3370_v47, %v3170_v34  ;;  %v3372_v1 = vpop.f32.mrb[42].mxu0  ;;  %v3413_v43 = vpop.f32.mrb[42].mxu1  ;;  %v3419_v35 = vadd.f32 %v3411_v48, %v3172_v55 }
 0x60c   :  { %v5454_v24 = vmul.f32 -1.442695, %v3416_v39  ;;  %v3373_v37 = vpop.f32.mrb[43].mxu0  ;;  %v3414_v53 = vpop.f32.mrb[43].mxu1 }
 0x60d   :  { %v5455_v3 = vmul.f32 -1.442695, %v3417_v21  ;;  %v5456_v7 = vmul.f32 -1.442695, %v3419_v35  ;;  %v3482_v37 = vunpack.c.h.bf16 %v5458_v40 }
 0x60e   :  { %6188 = vpow2.f32 %v5454_v24 }
 0x60f   :  { %6190 = vpow2.f32 %v5455_v3  ;;  %v3481_v3 = vunpack.c.l.bf16 %v5458_v40  ;;  %v8080_v40 = vld [vmem:[%s8355_s3 + $0x48] ss:$16 sps:$4 sm:$0xff]  }
 0x610   :  { %6192 = vpow2.f32 %v5456_v7 }
 0x611   :  { %6194 = vtanh.f32 %v3418_v29 }
 0x618   :  { %v6189_v32 = vpop.eup %6188 }
 0x619   :  { %v6191_v41 = vpop.eup %6190  ;;  %v3423_v11 = vadd.f32 1.0, %v6189_v32  ;;  %v8023_v32 = vld [vmem:[%s8355_s3] ss:$16 sps:$4 sm:$0xff]  }
 0x61a   :  { %v3429_v49 = vadd.f32 1.0, %v6191_v41  ;;  %v6193_v18 = vpop.eup %6192  ;;  %v8028_v41 = vld [vmem:[%s8355_s3 + $0x8] ss:$16 sps:$4 sm:$0xff]  }
 0x61b   :  { %6196 = vrcp.f32 %v3423_v11  ;;  %v6195_v27 = vpop.eup %6194  ;;  %v3436_v15 = vadd.f32 1.0, %v6193_v18  ;;  %v8379_v18 = vld [vmem:[#allocation5_spill] sm:$0xff] }
 0x61c   :  { %6198 = vrcp.f32 %v3429_v49 }
 0x61d   :  { %6200 = vrcp.f32 %v3436_v15 }
 0x625   :  { %v6197_v30 = vpop.eup %6196 }
 0x626   :  { %v6199_v60 = vpop.eup %6198  ;;  %v3440_v61 = vmul.f32 %v6197_v30, %v6195_v27  ;;  %v8034_v27 = vld [vmem:[%s8355_s3 + $0x24] ss:$16 sps:$4 sm:$0xff]   ;;  %v8039_v30 = vld [vmem:[%s8355_s3 + $0x2c] ss:$16 sps:$4 sm:$0xff]  }
 0x627   :  { %v3439_v28 = vmul.f32 %v6199_v60, %v7788_v52  ;;  %v6201_v55 = vpop.eup %6200 }
 0x629   :  { %v8014_v56 = vadd.f32 %v3440_v61, %v3439_v28  ;;  %v3678_v38 = vpop.f32.mrb[44].mxu0  ;;  %v3719_v34 = vpop.f32.mrb[44].mxu1  ;;  %v8046_v28 = vld [vmem:[%s8355_s3 + $0x20] ss:$16 sps:$4 sm:$0xff]  }
 0x62a   :  { %v3726_v12 = vadd.f32 %v3678_v38, %v3479_v62  ;;  %v3680_v39 = vpop.f32.mrb[45].mxu0  ;;  %v3721_v42 = vpop.f32.mrb[45].mxu1  ;;  %v3728_v7 = vadd.f32 %v3719_v34, %v3481_v3  ;;  %v8061_v38 = vld [vmem:[%s8355_s3 + $0x44] ss:$16 sps:$4 sm:$0xff]   ;;  %v8066_v34 = vld [vmem:[%s8355_s3 + $0x4c] ss:$16 sps:$4 sm:$0xff]  }
 0x62b   :  { %6202 = vtanh.f32 %v8014_v56  ;;  %v3727_v47 = vadd.f32 %v3680_v39, %v3480_v36  ;;  %v3682_v48 = vpop.f32.mrb[46].mxu0  ;;  %v3723_v21 = vpop.f32.mrb[46].mxu1  ;;  %v3729_v53 = vadd.f32 %v3721_v42, %v3482_v37  ;;  %v8051_v36 = vld [vmem:[%s8355_s3 + $0x28] ss:$16 sps:$4 sm:$0xff]   ;;  %v8087_v39 = vld [vmem:[%s8355_s3 + $0x64] ss:$16 sps:$4 sm:$0xff]  }
 0x62c   :  { %v5491_v1 = vmul.f32 -1.442695, %v3726_v12  ;;  %v3683_v52 = vpop.f32.mrb[47].mxu0  ;;  %v3724_v43 = vpop.f32.mrb[47].mxu1  ;;  %v8075_v12 = vld [vmem:[%s8355_s3 + $0x40] ss:$16 sps:$4 sm:$0xff]  }
 0x62d   :  { %v5492_v24 = vmul.f32 -1.442695, %v3727_v47  ;;  %v5493_v31 = vmul.f32 -1.442695, %v3729_v53  ;;  %v8092_v42 = vld [vmem:[%s8355_s3 + $0x6c] ss:$16 sps:$4 sm:$0xff]  }
 0x62e   :  { %6204 = vpow2.f32 %v5491_v1  ;;  %v8099_v48 = vld [vmem:[%s8355_s3 + $0x60] ss:$16 sps:$4 sm:$0xff]   ;;  %v8104_v21 = vld [vmem:[%s8355_s3 + $0x68] ss:$16 sps:$4 sm:$0xff]   ;;  %v8111_v52 = vld [vmem:[%s8355_s3 + $0x84] ss:$16 sps:$4 sm:$0xff]  }
 0x62f   :  { %6206 = vpow2.f32 %v5492_v24  ;;  %v8116_v43 = vld [vmem:[%s8355_s3 + $0x8c] ss:$16 sps:$4 sm:$0xff]  }
 0x630   :  { %6208 = vpow2.f32 %v5493_v31  ;;  %v8129_v31 = vld [vmem:[%s8355_s3 + $0x88] ss:$16 sps:$4 sm:$0xff]  }
 0x631   :  { %6210 = vtanh.f32 %v3728_v7  ;;  %v8141_v7 = vld [vmem:[%s8355_s3 + $0xac] ss:$16 sps:$4 sm:$0xff]  }
 0x635   :  { %v6203_v35 = vpop.eup %6202 }
 0x636   :  { %v3443_v29 = vmul.f32 %v6203_v35, %v6201_v55  ;;  %v8124_v35 = vld [vmem:[%s8355_s3 + $0x80] ss:$16 sps:$4 sm:$0xff]  }
 0x638   :  { %v6205_v11 = vpop.eup %6204  ;;  %v3797_v49 = vpack.c.bf16 %v3443_v29, %v3443_v29  ;;  %v5025_v58 = vadd.f32 %v3443_v29, %v8379_v18  ;;  %v8163_v18 = vld [vmem:[%s8355_s3 + $0xc4] ss:$16 sps:$4 sm:$0xff]  }
 0x639   :  { %v6207_v60 = vpop.eup %6206  ;;  %v3733_v61 = vadd.f32 1.0, %v6205_v11  ;;  %v8151_v11 = vld [vmem:[%s8355_s3 + $0xa0] ss:$16 sps:$4 sm:$0xff]  }
 0x63a   :  { %v3739_v15 = vadd.f32 1.0, %v6207_v60  ;;  %3991 = vmatmul.mubr.bf16.vlgmr.msra.gmra.mrb[48].mxu0 %v3797_v49  ;;  %v5033_v62 = vmul.f32 0.5, %v5025_v58  ;;  %4032 = vmatmul.mubr.bf16.vlgmr.msra.gmra.mrb[48].mxu1 %v3797_v49  ;;  %v6209_v47 = vpop.eup %6208  ;;  %v8156_v49 = vld [vmem:[%s8355_s3 + $0xa8] ss:$16 sps:$4 sm:$0xff]   ;;  %v8168_v58 = vld [vmem:[%s8355_s3 + $0xcc] ss:$16 sps:$4 sm:$0xff]  }
 0x63b   :  { %6212 = vrcp.f32 %v3733_v61  ;;  %4269 = vmatpush1.bf16.msra.mxu0 %v8023_v32  ;;  %4310 = vmatpush1.bf16.msra.mxu1 %v8028_v41  ;;  %v6211_v1 = vpop.eup %6210  ;;  %v3746_v3 = vadd.f32 1.0, %v6209_v47  ;;  %v8175_v60 = vld [vmem:[%s8355_s3 + $0xc0] ss:$16 sps:$4 sm:$0xff]   ;;  %v8180_v61 = vld [vmem:[%s8355_s3 + $0xc8] ss:$16 sps:$4 sm:$0xff]  }
 0x63c   :  { %6214 = vrcp.f32 %v3739_v15  ;;  %5041 = vst [vmem:[%s8358_s4 + $0x28] sm:$0xff] %v5033_v62  ;;  %4270 = vmatprep.subr.bf16.mxu0 %v8034_v27  ;;  %4311 = vmatprep.subr.bf16.mxu1 %v8039_v30  ;;  %8380 = vst [vmem:[#allocation6_spill] sm:$0xff] %v8175_v60  ;;  %v8187_v15 = vld [vmem:[%s8355_s3 + $0xe4] ss:$16 sps:$4 sm:$0xff]   ;;  %v8192_v62 = vld [vmem:[%s8355_s3 + $0xec] ss:$16 sps:$4 sm:$0xff]  }
 0x63d   :  { %4300 = vmatprep.mubr.bf16.mxu0 %v8370_v57  ;;  %4341 = vmatprep.mubr.bf16.mxu1 %v8370_v57  ;;  %6216 = vrcp.f32 %v3746_v3  ;;  %8381 = vst [vmem:[#allocation7_spill] sm:$0xff] %v8180_v61  ;;  %v8199_v47 = vld [vmem:[%s8355_s3 + $0xe0] ss:$16 sps:$4 sm:$0xff]  }
 0x63e   :  { %v5006_v3 = vld [vmem:[%s8358_s4 + $0x10] sm:$0xff] }
 0x63f   :  { %4271 = vmatpush1.bf16.msra.mxu0 %v8046_v28  ;;  %4312 = vmatpush1.bf16.msra.mxu1 %v8051_v36 }
 0x640   :  { %4272 = vmatprep.subr.bf16.mxu0 %v8061_v38  ;;  %4313 = vmatprep.subr.bf16.mxu1 %v8066_v34 }
 0x643   :  { %4273 = vmatpush1.bf16.msra.mxu0 %v8075_v12  ;;  %4314 = vmatpush1.bf16.msra.mxu1 %v8080_v40 }
 0x644   :  { %4274 = vmatprep.subr.bf16.mxu0 %v8087_v39  ;;  %4315 = vmatprep.subr.bf16.mxu1 %v8092_v42 }
 0x645   :  { %v6213_v24 = vpop.eup %6212 }
 0x646   :  { %v6215_v37 = vpop.eup %6214  ;;  %v3750_v53 = vmul.f32 %v6213_v24, %v6211_v1  ;;  %v8204_v1 = vld [vmem:[%s8355_s3 + $0xe8] ss:$16 sps:$4 sm:$0xff]  }
 0x647   :  { %v3749_v55 = vmul.f32 %v6215_v37, %v7817_v59  ;;  %4275 = vmatpush1.bf16.msra.mxu0 %v8099_v48  ;;  %4316 = vmatpush1.bf16.msra.mxu1 %v8104_v21  ;;  %v8136_v59 = vld [vmem:[%s8355_s3 + $0xa4] ss:$16 sps:$4 sm:$0xff]   ;;  %v6217_v24 = vpop.eup %6216 }
 0x648   :  { %4276 = vmatprep.subr.bf16.mxu0 %v8111_v52  ;;  %4317 = vmatprep.subr.bf16.mxu1 %v8116_v43 }
 0x649   :  { %v8143_v29 = vadd.f32 %v3750_v53, %v3749_v55 }
 0x64b   :  { %6218 = vtanh.f32 %v8143_v29  ;;  %4277 = vmatpush1.bf16.msra.mxu0 %v8124_v35  ;;  %4318 = vmatpush1.bf16.msra.mxu1 %v8129_v31 }
 0x64c   :  { %4278 = vmatprep.subr.bf16.mxu0 %v8136_v59  ;;  %4319 = vmatprep.subr.bf16.mxu1 %v8141_v7 }
 0x64f   :  { %4279 = vmatpush1.bf16.msra.mxu0 %v8151_v11  ;;  %4320 = vmatpush1.bf16.msra.mxu1 %v8156_v49 }
 0x650   :  { %4280 = vmatprep.subr.bf16.mxu0 %v8163_v18  ;;  %4321 = vmatprep.subr.bf16.mxu1 %v8168_v58 }
 0x653   :  { %4281 = vmatpush1.bf16.msra.mxu0 %v8175_v60  ;;  %4322 = vmatpush1.bf16.msra.mxu1 %v8180_v61 }
 0x654   :  { %4282 = vmatprep.subr.bf16.mxu0 %v8187_v15  ;;  %4323 = vmatprep.subr.bf16.mxu1 %v8192_v62 }
 0x655   :  { %v6219_v37 = vpop.eup %6218 }
 0x656   :  { %v3753_v53 = vmul.f32 %v6219_v37, %v6217_v24 }
 0x657   :  { %4283 = vmatpush1.bf16.msra.mxu0 %v8199_v47  ;;  %4324 = vmatpush1.bf16.msra.mxu1 %v8204_v1 }
 0x658   :  { %v4107_v55 = vpack.c.bf16 %v3753_v53, %v3753_v53  ;;  %v5022_v61 = vadd.f32 %v5006_v3, %v3753_v53  ;;  %4582 = vmatprep.subr.bf16.mxu0 %v7851_v5  ;;  %v6018_v5 = vld [vmem:[%s8354_s2 + $0xc] ss:$16 sps:$4 sm:$0xff]  }
 0x659   :  { %4623 = vmatprep.subr.bf16.mxu1 %v6018_v5 }
 0x65a   :  { %4301 = vmatmul.mubr.bf16.vlgmr.msra.gmra.mrb[52].mxu0 %v4107_v55  ;;  %v5030_v60 = vmul.f32 0.5, %v5022_v61  ;;  %4342 = vmatmul.mubr.bf16.vlgmr.msra.gmra.mrb[52].mxu1 %v4107_v55 }
 0x65b   :  { %4583 = vmatpush1.bf16.msra.mxu0 %v7856_v9  ;;  %4614 = vmatprep.mubr.bf16.mxu0 %v8370_v57  ;;  %v6016_v9 = vld [vmem:[%s8354_s2 + $0x8] ss:$16 sps:$4 sm:$0xff]  }
 0x65c   :  { %5038 = vst [vmem:[%s8358_s4 + $0x10] sm:$0xff] %v5030_v60  ;;  %4584 = vmatprep.subr.bf16.mxu0 %v7863_v10  ;;  %4655 = vmatprep.mubr.bf16.mxu1 %v8370_v57  ;;  %v6021_v10 = vld [vmem:[%s8354_s2 + $0x2c] ss:$16 sps:$4 sm:$0xff]  }
 0x65d   :  { %4624 = vmatpush1.bf16.msra.mxu1 %v6016_v9  ;;  %v5532_v9 = vld [vmem:[%s8357_s1 + $0x10] sm:$0xff] }
 0x65e   :  { %4625 = vmatprep.subr.bf16.mxu1 %v6021_v10 }
 0x65f   :  { %4585 = vmatpush1.bf16.msra.mxu0 %v7868_v8  ;;  %v6019_v8 = vld [vmem:[%s8354_s2 + $0x28] ss:$16 sps:$4 sm:$0xff]  }
 0x660   :  { %4586 = vmatprep.subr.bf16.mxu0 %v7875_v51  ;;  %v6024_v51 = vld [vmem:[%s8354_s2 + $0x4c] ss:$16 sps:$4 sm:$0xff]  }
 0x661   :  { %4626 = vmatpush1.bf16.msra.mxu1 %v6019_v8 }
 0x662   :  { %4627 = vmatprep.subr.bf16.mxu1 %v6024_v51 }
 0x663   :  { %4587 = vmatpush1.bf16.msra.mxu0 %v7880_v44  ;;  %v6022_v44 = vld [vmem:[%s8354_s2 + $0x48] ss:$16 sps:$4 sm:$0xff]  }
 0x664   :  { %4588 = vmatprep.subr.bf16.mxu0 %v7887_v13  ;;  %v6027_v13 = vld [vmem:[%s8354_s2 + $0x6c] ss:$16 sps:$4 sm:$0xff]  }
 0x665   :  { %4628 = vmatpush1.bf16.msra.mxu1 %v6022_v44 }
 0x666   :  { %4629 = vmatprep.subr.bf16.mxu1 %v6027_v13 }
 0x667   :  { %4589 = vmatpush1.bf16.msra.mxu0 %v7892_v45  ;;  %v6025_v45 = vld [vmem:[%s8354_s2 + $0x68] ss:$16 sps:$4 sm:$0xff]  }
 0x668   :  { %4590 = vmatprep.subr.bf16.mxu0 %v7899_v46  ;;  %v5495_v46 = vld [vmem:[%s8356_s0 + $0x60] sm:$0xff] }
 0x669   :  { %4630 = vmatpush1.bf16.msra.mxu1 %v6025_v45  ;;  %v4103_v45 = vunpack.c.l.bf16 %v5532_v9 }
 0x66a   :  { %4631 = vmatprep.subr.bf16.mxu1 %v7904_v50  ;;  %v3793_v50 = vunpack.c.l.bf16 %v5495_v46 }
 0x66b   :  { %4591 = vmatpush1.bf16.msra.mxu0 %v7909_v14  ;;  %v3794_v14 = vunpack.c.h.bf16 %v5495_v46 }
 0x66c   :  { %4592 = vmatprep.subr.bf16.mxu0 %v7923_v63 }
 0x66d   :  { %4632 = vmatpush1.bf16.msra.mxu1 %v7914_v16 }
 0x66e   :  { %4633 = vmatprep.subr.bf16.mxu1 %v7928_v2 }
 0x66f   :  { %4593 = vmatpush1.bf16.msra.mxu0 %v7933_v6  ;;  %v5496_v6 = vld [vmem:[%s8356_s0 + $0x68] sm:$0xff] }
 0x670   :  { %4594 = vmatprep.subr.bf16.mxu0 %v7947_v0  ;;  %v3795_v60 = vunpack.c.l.bf16 %v5496_v6 }
 0x671   :  { %4634 = vmatpush1.bf16.msra.mxu1 %v7938_v4 }
 0x672   :  { %4635 = vmatprep.subr.bf16.mxu1 %v7952_v17 }
 0x673   :  { %4595 = vmatpush1.bf16.msra.mxu0 %v7957_v20 }
 0x674   :  { %4596 = vmatprep.subr.bf16.mxu0 %v7971_v23 }
 0x675   :  { %4636 = vmatpush1.bf16.msra.mxu1 %v7962_v22 }
 0x676   :  { %4637 = vmatprep.subr.bf16.mxu1 %v7976_v25 }
 0x677   :  { %4597 = vmatpush1.bf16.msra.mxu0 %v7981_v26 }
 0x678   :  { %4891 = vmatprep.subr.bf16.mxu0 %v7995_v54  ;;  %v3796_v54 = vunpack.c.h.bf16 %v5496_v6  ;;  %v5533_v6 = vld [vmem:[%s8357_s1 + $0x18] sm:$0xff] }
 0x679   :  { %4638 = vmatpush1.bf16.msra.mxu1 %v7986_v33 }
 0x67a   :  { %4932 = vmatprep.subr.bf16.mxu1 %v8000_v19 }
 0x70d   :  { %v3992_v16 = vpop.f32.mrb[48].mxu0  ;;  %v4033_v63 = vpop.f32.mrb[48].mxu1 }
 0x70e   :  { %v4040_v2 = vadd.f32 %v3992_v16, %v3793_v50  ;;  %v3994_v4 = vpop.f32.mrb[49].mxu0  ;;  %v4035_v0 = vpop.f32.mrb[49].mxu1  ;;  %v4042_v24 = vadd.f32 %v4033_v63, %v3795_v60  ;;  %v4104_v50 = vunpack.c.h.bf16 %v5532_v9 }
 0x70f   :  { %v4041_v17 = vadd.f32 %v3994_v4, %v3794_v14  ;;  %v3996_v20 = vpop.f32.mrb[50].mxu0  ;;  %v4037_v22 = vpop.f32.mrb[50].mxu1  ;;  %v4043_v19 = vadd.f32 %v4035_v0, %v3796_v54 }
 0x710   :  { %v5529_v23 = vmul.f32 -1.442695, %v4040_v2  ;;  %v3997_v25 = vpop.f32.mrb[51].mxu0  ;;  %v4038_v26 = vpop.f32.mrb[51].mxu1 }
 0x711   :  { %v5530_v33 = vmul.f32 -1.442695, %v4041_v17  ;;  %v5531_v61 = vmul.f32 -1.442695, %v4043_v19  ;;  %v4105_v19 = vunpack.c.l.bf16 %v5533_v6 }
 0x712   :  { %6220 = vpow2.f32 %v5529_v23 }
 0x713   :  { %6222 = vpow2.f32 %v5530_v33  ;;  %v4106_v33 = vunpack.c.h.bf16 %v5533_v6 }
 0x714   :  { %6224 = vpow2.f32 %v5531_v61 }
 0x715   :  { %6226 = vtanh.f32 %v4042_v24 }
 0x71c   :  { %v6221_v37 = vpop.eup %6220 }
 0x71d   :  { %v6223_v53 = vpop.eup %6222  ;;  %v4047_v3 = vadd.f32 1.0, %v6221_v37 }
 0x71e   :  { %v4053_v55 = vadd.f32 1.0, %v6223_v53  ;;  %v6225_v5 = vpop.eup %6224 }
 0x71f   :  { %6228 = vrcp.f32 %v4047_v3  ;;  %v6227_v10 = vpop.eup %6226  ;;  %v4060_v13 = vadd.f32 1.0, %v6225_v5  ;;  %v8382_v5 = vld [vmem:[#allocation4_spill] sm:$0xff] }
 0x720   :  { %6230 = vrcp.f32 %v4053_v55 }
 0x721   :  { %6232 = vrcp.f32 %v4060_v13 }
 0x729   :  { %v6229_v8 = vpop.eup %6228 }
 0x72a   :  { %v6231_v51 = vpop.eup %6230  ;;  %v4064_v44 = vmul.f32 %v6229_v8, %v6227_v10 }
 0x72b   :  { %v4063_v46 = vmul.f32 %v6231_v51, %v8014_v56  ;;  %v6233_v60 = vpop.eup %6232 }
 0x72d   :  { %v8278_v14 = vadd.f32 %v4064_v44, %v4063_v46  ;;  %v4302_v16 = vpop.f32.mrb[52].mxu0  ;;  %v4343_v63 = vpop.f32.mrb[52].mxu1 }
 0x72e   :  { %v4350_v2 = vadd.f32 %v4302_v16, %v4103_v45  ;;  %v4304_v4 = vpop.f32.mrb[53].mxu0  ;;  %v4345_v0 = vpop.f32.mrb[53].mxu1  ;;  %v4352_v37 = vadd.f32 %v4343_v63, %v4105_v19 }
 0x72f   :  { %6234 = vtanh.f32 %v8278_v14  ;;  %v4351_v17 = vadd.f32 %v4304_v4, %v4104_v50  ;;  %v4306_v20 = vpop.f32.mrb[54].mxu0  ;;  %v4347_v22 = vpop.f32.mrb[54].mxu1  ;;  %v4353_v54 = vadd.f32 %v4345_v0, %v4106_v33 }
 0x730   :  { %v5566_v23 = vmul.f32 -1.442695, %v4350_v2  ;;  %v4307_v56 = vpop.f32.mrb[55].mxu0  ;;  %v4348_v25 = vpop.f32.mrb[55].mxu1 }
 0x731   :  { %v5567_v26 = vmul.f32 -1.442695, %v4351_v17  ;;  %v5568_v24 = vmul.f32 -1.442695, %v4353_v54 }
 0x732   :  { %6236 = vpow2.f32 %v5566_v23  ;;  %v4692_v23 = vld [vmem:[%s8357_s1] sm:$0xff] }
 0x733   :  { %6238 = vpow2.f32 %v5567_v26  ;;  %v4726_v19 = vunpack.c.l.bf16 %v4692_v23 }
 0x734   :  { %6240 = vpow2.f32 %v5568_v24 }
 0x735   :  { %6242 = vtanh.f32 %v4352_v37 }
 0x739   :  { %v6235_v61 = vpop.eup %6234 }
 0x73a   :  { %v4067_v53 = vmul.f32 %v6235_v61, %v6233_v60  ;;  %v4727_v61 = vunpack.c.h.bf16 %v4692_v23 }
 0x73c   :  { %v6237_v3 = vpop.eup %6236  ;;  %v4421_v55 = vpack.c.bf16 %v4067_v53, %v4067_v53  ;;  %v5026_v9 = vadd.f32 %v4067_v53, %v8382_v5 }
 0x73d   :  { %v6239_v10 = vpop.eup %6238  ;;  %v4357_v8 = vadd.f32 1.0, %v6237_v3 }
 0x73e   :  { %v4363_v51 = vadd.f32 1.0, %v6239_v10  ;;  %4615 = vmatmul.mubr.bf16.vlgmr.msra.gmra.mrb[56].mxu0 %v4421_v55  ;;  %v5034_v44 = vmul.f32 0.5, %v5026_v9  ;;  %4656 = vmatmul.mubr.bf16.vlgmr.msra.gmra.mrb[56].mxu1 %v4421_v55  ;;  %v4693_v55 = vld [vmem:[%s8357_s1 + $0x8] sm:$0xff] }
 0x73f   :  { %6244 = vrcp.f32 %v4357_v8  ;;  %4892 = vmatpush1.bf16.msra.mxu0 %v8023_v32  ;;  %4933 = vmatpush1.bf16.msra.mxu1 %v8028_v41  ;;  %v6241_v32 = vpop.eup %6240 }
 0x740   :  { %6246 = vrcp.f32 %v4363_v51  ;;  %5042 = vst [vmem:[%s8358_s4 + $0x30] sm:$0xff] %v5034_v44  ;;  %4893 = vmatprep.subr.bf16.mxu0 %v8034_v27  ;;  %4934 = vmatprep.subr.bf16.mxu1 %v8039_v30  ;;  %v6243_v41 = vpop.eup %6242 }
 0x741   :  { %4923 = vmatprep.mubr.bf16.mxu0 %v8370_v57  ;;  %4964 = vmatprep.mubr.bf16.mxu1 %v8370_v57 }
 0x743   :  { %4894 = vmatpush1.bf16.msra.mxu0 %v8046_v28  ;;  %4935 = vmatpush1.bf16.msra.mxu1 %v8051_v36  ;;  %v4370_v28 = vadd.f32 1.0, %v6241_v32 }
 0x744   :  { %4895 = vmatprep.subr.bf16.mxu0 %v8061_v38  ;;  %4936 = vmatprep.subr.bf16.mxu1 %v8066_v34  ;;  %v8383_v34 = vld [vmem:[#allocation6_spill] sm:$0xff] }
 0x745   :  { %6248 = vrcp.f32 %v4370_v28 }
 0x747   :  { %4896 = vmatpush1.bf16.msra.mxu0 %v8075_v12  ;;  %4937 = vmatpush1.bf16.msra.mxu1 %v8080_v40  ;;  %v8384_v12 = vld [vmem:[#allocation7_spill] sm:$0xff] }
 0x748   :  { %4897 = vmatprep.subr.bf16.mxu0 %v8087_v39  ;;  %4938 = vmatprep.subr.bf16.mxu1 %v8092_v42 }
 0x749   :  { %v6245_v27 = vpop.eup %6244 }
 0x74a   :  { %v6247_v57 = vpop.eup %6246  ;;  %v4374_v30 = vmul.f32 %v6245_v27, %v6243_v41  ;;  %v4729_v27 = vunpack.c.h.bf16 %v4693_v55 }
 0x74b   :  { %v4373_v36 = vmul.f32 %v6247_v57, %v8143_v29  ;;  %4898 = vmatpush1.bf16.msra.mxu0 %v8099_v48  ;;  %4939 = vmatpush1.bf16.msra.mxu1 %v8104_v21  ;;  %v5005_v48 = vld [vmem:[%s8358_s4 + $0x8] sm:$0xff] }
 0x74c   :  { %4899 = vmatprep.subr.bf16.mxu0 %v8111_v52  ;;  %4940 = vmatprep.subr.bf16.mxu1 %v8116_v43 }
 0x74d   :  { %v8307_v38 = vadd.f32 %v4374_v30, %v4373_v36  ;;  %v4728_v30 = vunpack.c.l.bf16 %v4693_v55 }
 0x74f   :  { %6250 = vtanh.f32 %v8307_v38  ;;  %4900 = vmatpush1.bf16.msra.mxu0 %v8124_v35  ;;  %4941 = vmatpush1.bf16.msra.mxu1 %v8129_v31  ;;  %v6249_v40 = vpop.eup %6248  ;;  %v5570_v35 = vld [vmem:[%s8356_s0 + $0x70] sm:$0xff] }
 0x750   :  { %4901 = vmatprep.subr.bf16.mxu0 %v8136_v59  ;;  %4942 = vmatprep.subr.bf16.mxu1 %v8141_v7  ;;  %v4417_v31 = vunpack.c.l.bf16 %v5570_v35  ;;  %v4418_v59 = vunpack.c.h.bf16 %v5570_v35 }
 0x753   :  { %4902 = vmatpush1.bf16.msra.mxu0 %v8151_v11  ;;  %4943 = vmatpush1.bf16.msra.mxu1 %v8156_v49  ;;  %v5571_v49 = vld [vmem:[%s8356_s0 + $0x78] sm:$0xff] }
 0x754   :  { %4903 = vmatprep.subr.bf16.mxu0 %v8163_v18  ;;  %4944 = vmatprep.subr.bf16.mxu1 %v8168_v58  ;;  %v4420_v50 = vunpack.c.h.bf16 %v5571_v49  ;;  %v4419_v63 = vunpack.c.l.bf16 %v5571_v49 }
 0x757   :  { %4904 = vmatpush1.bf16.msra.mxu0 %v8383_v34  ;;  %4945 = vmatpush1.bf16.msra.mxu1 %v8384_v12 }
 0x758   :  { %4905 = vmatprep.subr.bf16.mxu0 %v8187_v15  ;;  %4946 = vmatprep.subr.bf16.mxu1 %v8192_v62 }
 0x759   :  { %v6251_v39 = vpop.eup %6250 }
 0x75a   :  { %v4377_v42 = vmul.f32 %v6251_v39, %v6249_v40 }
 0x75b   :  { %4906 = vmatpush1.bf16.msra.mxu0 %v8199_v47  ;;  %4947 = vmatpush1.bf16.msra.mxu1 %v8204_v1 }
 0x75c   :  { %v4730_v21 = vpack.c.bf16 %v4377_v42, %v4377_v42  ;;  %v5021_v52 = vadd.f32 %v5005_v48, %v4377_v42  ;;  %v8385_v42 = vld [vmem:[#allocation3_spill] sm:$0xff] }
 0x75e   :  { %4924 = vmatmul.mubr.bf16.vlgmr.msra.gmra.mrb[60].mxu0 %v4730_v21  ;;  %v5029_v43 = vmul.f32 0.5, %v5021_v52  ;;  %4965 = vmatmul.mubr.bf16.vlgmr.msra.gmra.mrb[60].mxu1 %v4730_v21 }
 0x760   :  { %5037 = vst [vmem:[%s8358_s4 + $0x8] sm:$0xff] %v5029_v43 }
 0x811   :  { %v4616_v7 = vpop.f32.mrb[56].mxu0  ;;  %v4657_v29 = vpop.f32.mrb[56].mxu1 }
 0x812   :  { %v4664_v11 = vadd.f32 %v4616_v7, %v4417_v31  ;;  %v4618_v18 = vpop.f32.mrb[57].mxu0  ;;  %v4659_v58 = vpop.f32.mrb[57].mxu1  ;;  %v4666_v6 = vadd.f32 %v4657_v29, %v4419_v63 }
 0x813   :  { %v4665_v15 = vadd.f32 %v4618_v18, %v4418_v59  ;;  %v4620_v62 = vpop.f32.mrb[58].mxu0  ;;  %v4661_v47 = vpop.f32.mrb[58].mxu1  ;;  %v4667_v16 = vadd.f32 %v4659_v58, %v4420_v50 }
 0x814   :  { %v5604_v1 = vmul.f32 -1.442695, %v4664_v11  ;;  %v4621_v13 = vpop.f32.mrb[59].mxu0  ;;  %v4662_v45 = vpop.f32.mrb[59].mxu1 }
 0x815   :  { %v5605_v46 = vmul.f32 -1.442695, %v4665_v15  ;;  %v5606_v2 = vmul.f32 -1.442695, %v4667_v16 }
 0x816   :  { %6252 = vpow2.f32 %v5604_v1  ;;  %v5004_v1 = vld [vmem:[%s8358_s4] sm:$0xff] }
 0x817   :  { %6254 = vpow2.f32 %v5605_v46 }
 0x818   :  { %6256 = vpow2.f32 %v5606_v2 }
 0x819   :  { %6258 = vtanh.f32 %v4666_v6 }
 0x820   :  { %v6253_v4 = vpop.eup %6252 }
 0x821   :  { %v6255_v0 = vpop.eup %6254  ;;  %v4671_v17 = vadd.f32 1.0, %v6253_v4 }
 0x822   :  { %v4677_v20 = vadd.f32 1.0, %v6255_v0  ;;  %v6257_v22 = vpop.eup %6256 }
 0x823   :  { %6260 = vrcp.f32 %v4671_v17  ;;  %v6259_v56 = vpop.eup %6258  ;;  %v4684_v54 = vadd.f32 1.0, %v6257_v22 }
 0x824   :  { %6262 = vrcp.f32 %v4677_v20 }
 0x825   :  { %6264 = vrcp.f32 %v4684_v54 }
 0x82d   :  { %v6261_v25 = vpop.eup %6260 }
 0x82e   :  { %v6263_v26 = vpop.eup %6262  ;;  %v4688_v33 = vmul.f32 %v6261_v25, %v6259_v56 }
 0x82f   :  { %v4687_v60 = vmul.f32 %v6263_v26, %v8278_v14  ;;  %v6265_v28 = vpop.eup %6264 }
 0x831   :  { %v4689_v24 = vadd.f32 %v4688_v33, %v4687_v60  ;;  %v4925_v37 = vpop.f32.mrb[60].mxu0  ;;  %v4966_v53 = vpop.f32.mrb[60].mxu1 }
 0x832   :  { %v4973_v3 = vadd.f32 %v4925_v37, %v4726_v19  ;;  %v4927_v5 = vpop.f32.mrb[61].mxu0  ;;  %v4968_v9 = vpop.f32.mrb[61].mxu1  ;;  %v4975_v40 = vadd.f32 %v4966_v53, %v4728_v30 }
 0x833   :  { %6266 = vtanh.f32 %v4689_v24  ;;  %v4974_v10 = vadd.f32 %v4927_v5, %v4727_v61  ;;  %v4929_v8 = vpop.f32.mrb[62].mxu0  ;;  %v4970_v51 = vpop.f32.mrb[62].mxu1  ;;  %v4976_v57 = vadd.f32 %v4968_v9, %v4729_v27 }
 0x834   :  { %v5639_v44 = vmul.f32 -1.442695, %v4973_v3  ;;  %v4930_v32 = vpop.f32.mrb[63].mxu0  ;;  %v4971_v41 = vpop.f32.mrb[63].mxu1 }
 0x835   :  { %v5640_v14 = vmul.f32 -1.442695, %v4974_v10  ;;  %v5641_v34 = vmul.f32 -1.442695, %v4976_v57 }
 0x836   :  { %6268 = vpow2.f32 %v5639_v44 }
 0x837   :  { %6270 = vpow2.f32 %v5640_v14 }
 0x838   :  { %6272 = vpow2.f32 %v5641_v34 }
 0x839   :  { %6274 = vtanh.f32 %v4975_v40 }
 0x83d   :  { %v6267_v36 = vpop.eup %6266 }
 0x83e   :  { %v4691_v12 = vmul.f32 %v6267_v36, %v6265_v28 }
 0x840   :  { %v6269_v39 = vpop.eup %6268  ;;  %v5027_v48 = vadd.f32 %v4691_v12, %v8385_v42 }
 0x841   :  { %v6271_v21 = vpop.eup %6270  ;;  %v4980_v52 = vadd.f32 1.0, %v6269_v39 }
 0x842   :  { %v5035_v43 = vmul.f32 0.5, %v5027_v48  ;;  %v4986_v35 = vadd.f32 1.0, %v6271_v21  ;;  %v6273_v31 = vpop.eup %6272 }
 0x843   :  { %6276 = vrcp.f32 %v4980_v52  ;;  %v6275_v59 = vpop.eup %6274  ;;  %v4993_v49 = vadd.f32 1.0, %v6273_v31 }
 0x844   :  { %5043 = vst [vmem:[%s8358_s4 + $0x38] sm:$0xff] %v5035_v43  ;;  %6278 = vrcp.f32 %v4986_v35 }
 0x845   :  { %6280 = vrcp.f32 %v4993_v49 }
 0x84d   :  { %v6277_v7 = vpop.eup %6276 }
 0x84e   :  { %v6279_v29 = vpop.eup %6278  ;;  %v4997_v11 = vmul.f32 %v6277_v7, %v6275_v59 }
 0x84f   :  { %v4996_v18 = vmul.f32 %v6279_v29, %v8307_v38  ;;  %v6281_v15 = vpop.eup %6280 }
 0x851   :  { %v4998_v58 = vadd.f32 %v4997_v11, %v4996_v18 }
 0x853   :  { %6282 = vtanh.f32 %v4998_v58 }
 0x85d   :  { %v6283_v62 = vpop.eup %6282 }
 0x85e   :  { %v5000_v47 = vmul.f32 %v6283_v62, %v6281_v15 }
 0x860   :  { %v5020_v13 = vadd.f32 %v5004_v1, %v5000_v47 }
 0x862   :  { %v5028_v45 = vmul.f32 0.5, %v5020_v13 }
 0x864   :  { %5036 = vst [vmem:[%s8358_s4] sm:$0xff] %v5028_v45 }

</bundles_post_ra>
